<compile_context>
chip_gen: v6e
topology: v6e:2x2x1
jax: 0.10.0
libtpu: 0.0.40
codegen_flags: <defaults>
</compile_context>

<pallas_src>
import functools
import math

import jax
import jax.numpy as jnp
import numpy as np
from jax import lax
from jax.experimental import pallas as pl
from jax.experimental.pallas import tpu as pltpu

_TWO_PI = 2.0 * math.pi
_HALF_PI = 0.5 * math.pi


def _round_up(x, m):
    return ((x + m - 1) // m) * m


# -----------------------------------------------------------------------------
# Primary kernel: edge-major output.  out[m, t*(rpow+1)+p] =
#     mask_m * r_m**(-p) * sin(2*pi*scale_t*r_m + phase_t)
# -----------------------------------------------------------------------------
def _rad_prod_edge_major_kernel(norms_ref, mask_ref, out_ref, *, trig_basis, rpow):
    T = trig_basis + 1
    two_t = 2 * T
    rp1 = rpow + 1
    K = two_t * rp1
    tm = norms_ref.shape[1]

    r = norms_ref[...]                                  # (1, tm)
    msk = mask_ref[...]                                 # (1, tm)
    valid = (msk != 0.0) & (r > 0.0)                    # edge_mask * positive_norms
    safe_r = jnp.where(valid, r, 1.0)
    inv_r = 1.0 / safe_r                                # exact divide (not approx recip)

    # Deduplicated trig rows (two_t, tm); scales/phases baked as constants.
    t_idx = lax.broadcasted_iota(jnp.int32, (two_t, 1), 0)
    scale = jnp.where(t_idx < T, t_idx, t_idx - T).astype(jnp.float32)
    phase = jnp.where((t_idx == 0) | (t_idx >= T),
                      jnp.float32(_HALF_PI), jnp.float32(0.0))
    r_b = jnp.broadcast_to(r, (two_t, tm))
    v_b = jnp.broadcast_to(valid, (two_t, tm))
    trig = jnp.where(v_b, jnp.sin(_TWO_PI * scale * r_b + phase), 0.0)

    # Deduplicated powers r**(-p), p = 0..rpow (rp1, tm): cumulative VPU multiplies.
    p_idx = lax.broadcasted_iota(jnp.int32, (rp1, tm), 0)
    inv_b = jnp.broadcast_to(inv_r, (rp1, tm))
    powr = jnp.ones((rp1, tm), jnp.float32)
    for k in range(1, rp1):
        powr = powr * jnp.where(p_idx >= k, inv_b, jnp.float32(1.0))

    # Constant 0/1 selection matrices: scatter each factor to the edge-major
    # (tm, K) layout on the MXU (idle otherwise).  Exact at HIGHEST precision.
    tt = lax.broadcasted_iota(jnp.int32, (two_t, K), 0)
    jj = lax.broadcasted_iota(jnp.int32, (two_t, K), 1)
    sel_t = ((jj >= tt * rp1) & (jj < (tt + 1) * rp1)).astype(jnp.float32)

    pp = lax.broadcasted_iota(jnp.int32, (rp1, K), 0)
    jj2 = lax.broadcasted_iota(jnp.int32, (rp1, K), 1)
    sel_p = jnp.zeros((rp1, K), jnp.float32)
    for t in range(two_t):                              # avoids vector int mod
        sel_p = sel_p + (jj2 == (t * rp1 + pp)).astype(jnp.float32)

    dn = (((0,), (0,)), ((), ()))                       # contract the tiny basis dim of the lhs
    trig_e = lax.dot_general(trig, sel_t, dn,
                             precision=lax.Precision.HIGHEST,
                             preferred_element_type=jnp.float32)     # (tm, K)
    pow_e = lax.dot_general(powr, sel_p, dn,
                            precision=lax.Precision.HIGHEST,
                            preferred_element_type=jnp.float32)      # (tm, K)
    out_ref[...] = trig_e * pow_e


def _edge_major_call(norms_flat, mask_flat, *, trig_basis, rpow, tile_m):
    _, m_pad = norms_flat.shape
    K = 2 * (trig_basis + 1) * (rpow + 1)
    n_tiles = m_pad // tile_m
    kernel = functools.partial(_rad_prod_edge_major_kernel,
                               trig_basis=trig_basis, rpow=rpow)
    return pl.pallas_call(
        kernel,
        out_shape=jax.ShapeDtypeStruct((m_pad, K), jnp.float32),
        grid=(n_tiles,),
        in_specs=[pl.BlockSpec((1, tile_m), lambda i: (0, i)),
                  pl.BlockSpec((1, tile_m), lambda i: (0, i))],
        out_specs=pl.BlockSpec((tile_m, K), lambda i: (i, 0)),
        compiler_params=pltpu.CompilerParams(dimension_semantics=("parallel",)),
    )(norms_flat, mask_flat)


# -----------------------------------------------------------------------------
# Fallback kernel (previously validated): basis-major output + XLA transpose.
# -----------------------------------------------------------------------------
def _rad_prod_basis_major_kernel(scale_ref, phase_ref, negpow_ref,
                                 norms_ref, mask_ref, out_ref):
    r = norms_ref[...]
    m = mask_ref[...]
    valid = (m != 0.0) & (r > 0.0)
    K, TM = out_ref.shape
    r_b = jnp.broadcast_to(r, (K, TM))
    valid_b = jnp.broadcast_to(valid, (K, TM))
    trig = jnp.sin(_TWO_PI * scale_ref[...] * r_b + phase_ref[...])
    safe_r = jnp.where(valid_b, r_b, 1.0)
    rpowers = jnp.exp(negpow_ref[...] * jnp.log(safe_r))
    out_ref[...] = jnp.where(valid_b, trig * rpowers, 0.0)


def _basis_major_call(norms_flat, mask_flat, *, trig_basis, rpow, tile_m):
    _, m_pad = norms_flat.shape
    T = trig_basis + 1
    rp1 = rpow + 1
    two_t = 2 * T
    K = two_t * rp1
    n_tiles = m_pad // tile_m

    scales_flat = jnp.concatenate([jnp.arange(T, dtype=jnp.float32)] * 2)
    phases_flat = jnp.concatenate(
        [jnp.zeros(T, jnp.float32), _HALF_PI * jnp.ones(T, jnp.float32)]).at[0].set(_HALF_PI)
    scale_col = jnp.repeat(scales_flat, rp1).reshape(K, 1)
    phase_col = jnp.repeat(phases_flat, rp1).reshape(K, 1)
    negpow_col = -jnp.tile(jnp.arange(rp1, dtype=jnp.float32), two_t).reshape(K, 1)

    return pl.pallas_call(
        _rad_prod_basis_major_kernel,
        out_shape=jax.ShapeDtypeStruct((K, m_pad), jnp.float32),
        grid=(n_tiles,),
        in_specs=[pl.BlockSpec((K, 1), lambda i: (0, 0)),
                  pl.BlockSpec((K, 1), lambda i: (0, 0)),
                  pl.BlockSpec((K, 1), lambda i: (0, 0)),
                  pl.BlockSpec((1, tile_m), lambda i: (0, i)),
                  pl.BlockSpec((1, tile_m), lambda i: (0, i))],
        out_specs=pl.BlockSpec((K, tile_m), lambda i: (0, i)),
        compiler_params=pltpu.CompilerParams(dimension_semantics=("parallel",)),
    )(scale_col, phase_col, negpow_col, norms_flat, mask_flat)


# -----------------------------------------------------------------------------
# One-time probe: compile + numerically validate the edge-major kernel against
# the proven basis-major kernel on a tiny input.  Safety net only.
# -----------------------------------------------------------------------------
_EDGE_MAJOR_OK = {}


def _edge_major_supported(trig_basis, rpow):
    key = (trig_basis, rpow)
    if key not in _EDGE_MAJOR_OK:
        try:
            m = 256
            r = (0.25 + 1.75 * jnp.arange(m, dtype=jnp.float32) / m).reshape(1, m)
            r = r.at[0, 3].set(0.0)                        # r == 0 -> masked out
            msk = jnp.ones((1, m), jnp.float32).at[0, 7].set(0.0)
            got = jax.block_until_ready(
                _edge_major_call(r, msk, trig_basis=trig_basis, rpow=rpow, tile_m=m))
            want = jax.block_until_ready(
                _basis_major_call(r, msk, trig_basis=trig_basis, rpow=rpow, tile_m=m))
            ok = bool(np.allclose(np.asarray(got), np.asarray(want).T,
                                  rtol=2e-5, atol=1e-5))
        except Exception:
            ok = False
        _EDGE_MAJOR_OK[key] = ok
    return _EDGE_MAJOR_OK[key]


# -----------------------------------------------------------------------------
# Wrapper
# -----------------------------------------------------------------------------
def rad_poly_trig_pallas(norms, edge_mask, trig_basis, rpow, tile_m=2048):
    s = tuple(norms.shape)
    M = int(np.prod(s))
    T = trig_basis + 1
    rp1 = rpow + 1
    num_rad = T * rp1
    K = 2 * num_rad

    # Large lane-dense tiles amortize the ~0.35us/grid-step overhead; shrink to a
    # single 8-aligned tile for small problems.  (Can be raised to 4096-8192 with
    # pltpu.CompilerParams(vmem_limit_bytes=...) for very large edge counts.)
    if M <= tile_m:
        tile_m = max(8, _round_up(M, 8))
    else:
        tile_m = _round_up(tile_m, 128)
    n_tiles = pl.cdiv(M, tile_m)
    m_pad = n_tiles * tile_m

    norms32 = jnp.asarray(norms, jnp.float32).reshape(-1)
    mask32 = jnp.asarray(edge_mask, jnp.float32).reshape(-1)
    if m_pad == M:
        norms_flat = norms32.reshape(1, M)
        mask_flat = mask32.reshape(1, M)
    else:
        norms_flat = jnp.zeros((1, m_pad), jnp.float32).at[0, :M].set(norms32)
        mask_flat = jnp.zeros((1, m_pad), jnp.float32).at[0, :M].set(mask32)

    if _edge_major_supported(trig_basis, rpow):
        out = _edge_major_call(norms_flat, mask_flat,
                               trig_basis=trig_basis, rpow=rpow, tile_m=tile_m)
        # Edge-major output: reshape below is a free view (no transpose pass).
        rad_prod = out[:M].reshape(s + (num_rad, 2))
    else:
        out = _basis_major_call(norms_flat, mask_flat,
                                trig_basis=trig_basis, rpow=rpow, tile_m=tile_m)
        rad_prod = out[:, :M].T.reshape(s + (num_rad, 2))
    return rad_prod


# -----------------------------------------------------------------------------
# Module ports
# -----------------------------------------------------------------------------
class RadPolyTrig:
    """JAX/Pallas port of cormorant RadPolyTrig (mix=False path).

    The deterministic __init__ values of the scales/phases parameters are baked
    into the kernel as compile-time constants (they equal the formulas below).
    """

    def __init__(self, max_sh, basis_set, num_channels, mix=False):
        trig_basis, rpow = basis_set
        assert trig_basis >= 0 and rpow >= 0
        self.trig_basis = trig_basis
        self.rpow = rpow
        self.max_sh = max_sh
        self.num_rad = (trig_basis + 1) * (rpow + 1)
        self.num_channels = num_channels
        T = trig_basis + 1
        self.scales = jnp.concatenate(
            [jnp.arange(T, dtype=jnp.float32), jnp.arange(T, dtype=jnp.float32)])
        phases = jnp.concatenate(
            [jnp.zeros(T, jnp.float32), _HALF_PI * jnp.ones(T, jnp.float32)])
        self.phases = phases.at[0].set(_HALF_PI)
        assert mix in (False, 'none'), "RadialFilters only exercises mix=False"
        # TODO(synk): mix='real'/'cplx' Linear mixing path not implemented (RadialFilters
        # constructs RadPolyTrig with the default mix=False, so it is never used here).
        self.mix = mix
        self.radial_types = (self.num_rad,) * (max_sh + 1)

    def __call__(self, norms, edge_mask):
        rad_prod = rad_poly_trig_pallas(norms, edge_mask, self.trig_basis, self.rpow)
        return [rad_prod] * (self.max_sh + 1)


class RadialFilters:
    """JAX/Pallas port of cormorant RadialFilters."""

    def __init__(self, max_sh, basis_set, num_channels_out, num_levels):
        self.num_levels = num_levels
        self.max_sh = max_sh
        self.rad_funcs = [RadPolyTrig(max_sh[level], basis_set, num_channels_out[level])
                          for level in range(num_levels)]
        self.tau = [rf.radial_types for rf in self.rad_funcs]
        self.num_rad_channels = self.tau[0][0]

    def __call__(self, norms, base_mask):
        return [rf(norms, base_mask) for rf in self.rad_funcs]


def _reference_rad_poly_trig(norms, edge_mask, scales, phases, rpow, num_rad):
    """Pure-JAX mirror of the PyTorch forward for verification."""
    s = norms.shape
    em = ((edge_mask != 0) & (norms > 0))[..., None]
    n = norms[..., None]
    rad_powers = jnp.stack(
        [jnp.where(em, jnp.where(em, n, 1.0) ** (-float(p)), 0.0) for p in range(rpow + 1)],
        axis=-1)
    rad_trig = jnp.where(em, jnp.sin(2 * math.pi * scales * n + phases), 0.0)[..., None]
    return (rad_powers * rad_trig).reshape(s + (num_rad, 2))


if __name__ == "__main__":
    key = jax.random.PRNGKey(0)
    pos_key, mask_key = jax.random.split(key)

    # Small example: batch=2, natoms=8 -> norms / edge_mask of shape (2, 8, 8).
    B, N = 2, 8
    positions = jax.random.normal(pos_key, (B, N, 3), dtype=jnp.float32)
    diff = positions[:, :, None, :] - positions[:, None, :, :]
    norms = jnp.sqrt(jnp.sum(diff * diff, axis=-1))                      # diag == 0
    atom_mask = jax.random.uniform(mask_key, (B, N)) > 0.2
    edge_mask = (atom_mask[:, :, None] & atom_mask[:, None, :]).astype(jnp.float32)

    max_sh = [2, 2]
    basis_set = (3, 3)            # (trig_basis, rpow) -> num_rad = 16, K = 32
    num_channels_out = [4, 4]
    num_levels = 2

    model = RadialFilters(max_sh, basis_set, num_channels_out, num_levels)
    out = model(norms, edge_mask)                 # list (levels) of lists (l = 0..max_sh)
    out = jax.block_until_ready(out)

    # Verify against a pure-JAX reference of the PyTorch semantics.
    for level in range(num_levels):
        rf = model.rad_funcs[level]
        ref = _reference_rad_poly_trig(norms, edge_mask, rf.scales, rf.phases,
                                       rf.rpow, rf.num_rad)
        assert len(out[level]) == max_sh[level] + 1
        for arr in out[level]:
            assert arr.shape == norms.shape + (rf.num_rad, 2)
            np.testing.assert_allclose(np.asarray(arr), np.asarray(ref),
                                       rtol=2e-5, atol=1e-5)

    print("KERNEL_OK")
</pallas_src>

<mosaic_0001>
module attributes {stable_mosaic.version = 11 : i64} {
  func.func @_rad_prod_edge_major_kernel(%arg0: i32, %arg1: memref<1x256xf32, #tpu.memory_space<vmem>>, %arg2: memref<1x256xf32, #tpu.memory_space<vmem>>, %arg3: memref<256x32xf32, #tpu.memory_space<vmem>>) attributes {dimension_semantics = [#tpu.dimension_semantics<parallel>], iteration_bounds = array<i64: 1>, scalar_prefetch = 0 : i64, scratch_operands = 0 : i64, tpu.core_type = #tpu.core_type<tc>, window_params = [{transform_indices = @transform_0, window_bounds = array<i64: 1, 256>}, {transform_indices = @transform_1, window_bounds = array<i64: 1, 256>}, {transform_indices = @transform_2, window_bounds = array<i64: 256, 32>}]} {
    %c0 = arith.constant 0 : index
    %c0_0 = arith.constant 0 : index
    %0 = vector.load %arg1[%c0, %c0_0] : memref<1x256xf32, #tpu.memory_space<vmem>>, vector<1x256xf32>
    %c0_1 = arith.constant 0 : index
    %c0_2 = arith.constant 0 : index
    %1 = vector.load %arg2[%c0_1, %c0_2] : memref<1x256xf32, #tpu.memory_space<vmem>>, vector<1x256xf32>
    %cst = arith.constant 0.000000e+00 : f32
    %2 = vector.broadcast %cst : f32 to vector<1x256xf32>
    %3 = arith.cmpf one, %1, %2 : vector<1x256xf32>
    %cst_3 = arith.constant 0.000000e+00 : f32
    %4 = vector.broadcast %cst_3 : f32 to vector<1x256xf32>
    %5 = arith.cmpf ogt, %0, %4 : vector<1x256xf32>
    %6 = arith.andi %3, %5 : vector<1x256xi1>
    %cst_4 = arith.constant 1.000000e+00 : f32
    %7 = vector.broadcast %cst_4 : f32 to vector<1x256xf32>
    %8 = arith.select %6, %0, %7 : vector<1x256xi1>, vector<1x256xf32>
    %cst_5 = arith.constant 1.000000e+00 : f32
    %9 = vector.broadcast %cst_5 : f32 to vector<1x256xf32>
    %10 = arith.divf %9, %8 : vector<1x256xf32>
    %11 = tpu.iota {dimensions = array<i32: 0>} : vector<8x1xi32>
    %c4_i32 = arith.constant 4 : i32
    %12 = vector.broadcast %c4_i32 : i32 to vector<8x1xi32>
    %13 = arith.cmpi slt, %11, %12 : vector<8x1xi32>
    %c4_i32_6 = arith.constant 4 : i32
    %14 = vector.broadcast %c4_i32_6 : i32 to vector<8x1xi32>
    %15 = arith.subi %11, %14 : vector<8x1xi32>
    %16 = arith.select %13, %11, %15 : vector<8x1xi1>, vector<8x1xi32>
    %17 = arith.sitofp %16 : vector<8x1xi32> to vector<8x1xf32>
    %c0_i32 = arith.constant 0 : i32
    %18 = vector.broadcast %c0_i32 : i32 to vector<8x1xi32>
    %19 = arith.cmpi eq, %11, %18 : vector<8x1xi32>
    %c4_i32_7 = arith.constant 4 : i32
    %20 = vector.broadcast %c4_i32_7 : i32 to vector<8x1xi32>
    %21 = arith.cmpi sge, %11, %20 : vector<8x1xi32>
    %22 = arith.ori %19, %21 : vector<8x1xi1>
    %cst_8 = arith.constant 1.57079637 : f32
    %cst_9 = arith.constant 0.000000e+00 : f32
    %23 = vector.broadcast %cst_8 : f32 to vector<8x1xf32>
    %24 = vector.broadcast %cst_9 : f32 to vector<8x1xf32>
    %25 = arith.select %22, %23, %24 : vector<8x1xi1>, vector<8x1xf32>
    %26 = vector.shape_cast %0 : vector<1x256xf32> to vector<1x256xf32>
    %27 = vector.broadcast %26 : vector<1x256xf32> to vector<8x256xf32>
    %28 = vector.shape_cast %6 : vector<1x256xi1> to vector<1x256xi1>
    %29 = vector.broadcast %28 : vector<1x256xi1> to vector<8x256xi1>
    %cst_10 = arith.constant 6.28318548 : f32
    %30 = vector.broadcast %cst_10 : f32 to vector<8x1xf32>
    %31 = arith.mulf %30, %17 : vector<8x1xf32>
    %32 = vector.broadcast %31 : vector<8x1xf32> to vector<8x256xf32>
    %33 = arith.mulf %32, %27 : vector<8x256xf32>
    %34 = vector.broadcast %25 : vector<8x1xf32> to vector<8x256xf32>
    %35 = arith.addf %33, %34 : vector<8x256xf32>
    %36 = math.sin %35 : vector<8x256xf32>
    %cst_11 = arith.constant 0.000000e+00 : f32
    %37 = vector.broadcast %cst_11 : f32 to vector<8x256xf32>
    %38 = arith.select %29, %36, %37 : vector<8x256xi1>, vector<8x256xf32>
    %39 = tpu.iota {dimensions = array<i32: 0>} : vector<4x256xi32>
    %40 = vector.shape_cast %10 : vector<1x256xf32> to vector<1x256xf32>
    %41 = vector.broadcast %40 : vector<1x256xf32> to vector<4x256xf32>
    %cst_12 = arith.constant 1.000000e+00 : f32
    %42 = vector.broadcast %cst_12 : f32 to vector<4x256xf32>
    %c1_i32 = arith.constant 1 : i32
    %43 = vector.broadcast %c1_i32 : i32 to vector<4x256xi32>
    %44 = arith.cmpi sge, %39, %43 : vector<4x256xi32>
    %cst_13 = arith.constant 1.000000e+00 : f32
    %45 = vector.broadcast %cst_13 : f32 to vector<4x256xf32>
    %46 = arith.select %44, %41, %45 : vector<4x256xi1>, vector<4x256xf32>
    %47 = arith.mulf %42, %46 : vector<4x256xf32>
    %c2_i32 = arith.constant 2 : i32
    %48 = vector.broadcast %c2_i32 : i32 to vector<4x256xi32>
    %49 = arith.cmpi sge, %39, %48 : vector<4x256xi32>
    %cst_14 = arith.constant 1.000000e+00 : f32
    %50 = vector.broadcast %cst_14 : f32 to vector<4x256xf32>
    %51 = arith.select %49, %41, %50 : vector<4x256xi1>, vector<4x256xf32>
    %52 = arith.mulf %47, %51 : vector<4x256xf32>
    %c3_i32 = arith.constant 3 : i32
    %53 = vector.broadcast %c3_i32 : i32 to vector<4x256xi32>
    %54 = arith.cmpi sge, %39, %53 : vector<4x256xi32>
    %cst_15 = arith.constant 1.000000e+00 : f32
    %55 = vector.broadcast %cst_15 : f32 to vector<4x256xf32>
    %56 = arith.select %54, %41, %55 : vector<4x256xi1>, vector<4x256xf32>
    %57 = arith.mulf %52, %56 : vector<4x256xf32>
    %58 = tpu.iota {dimensions = array<i32: 0>} : vector<8x32xi32>
    %59 = tpu.iota {dimensions = array<i32: 1>} : vector<8x32xi32>
    %c4_i32_16 = arith.constant 4 : i32
    %60 = vector.broadcast %c4_i32_16 : i32 to vector<8x32xi32>
    %61 = arith.muli %58, %60 : vector<8x32xi32>
    %62 = arith.cmpi sge, %59, %61 : vector<8x32xi32>
    %c1_i32_17 = arith.constant 1 : i32
    %63 = vector.broadcast %c1_i32_17 : i32 to vector<8x32xi32>
    %64 = arith.addi %58, %63 : vector<8x32xi32>
    %c4_i32_18 = arith.constant 4 : i32
    %65 = vector.broadcast %c4_i32_18 : i32 to vector<8x32xi32>
    %66 = arith.muli %64, %65 : vector<8x32xi32>
    %67 = arith.cmpi slt, %59, %66 : vector<8x32xi32>
    %68 = arith.andi %62, %67 : vector<8x32xi1>
    %69 = arith.extui %68 : vector<8x32xi1> to vector<8x32xi32>
    %70 = arith.sitofp %69 : vector<8x32xi32> to vector<8x32xf32>
    %71 = tpu.iota {dimensions = array<i32: 0>} : vector<4x32xi32>
    %72 = tpu.iota {dimensions = array<i32: 1>} : vector<4x32xi32>
    %cst_19 = arith.constant 0.000000e+00 : f32
    %73 = vector.broadcast %cst_19 : f32 to vector<4x32xf32>
    %c0_i32_20 = arith.constant 0 : i32
    %74 = vector.broadcast %c0_i32_20 : i32 to vector<4x32xi32>
    %75 = arith.addi %74, %71 : vector<4x32xi32>
    %76 = arith.cmpi eq, %72, %75 : vector<4x32xi32>
    %77 = arith.extui %76 : vector<4x32xi1> to vector<4x32xi32>
    %78 = arith.sitofp %77 : vector<4x32xi32> to vector<4x32xf32>
    %79 = arith.addf %73, %78 : vector<4x32xf32>
    %c4_i32_21 = arith.constant 4 : i32
    %80 = vector.broadcast %c4_i32_21 : i32 to vector<4x32xi32>
    %81 = arith.addi %80, %71 : vector<4x32xi32>
    %82 = arith.cmpi eq, %72, %81 : vector<4x32xi32>
    %83 = arith.extui %82 : vector<4x32xi1> to vector<4x32xi32>
    %84 = arith.sitofp %83 : vector<4x32xi32> to vector<4x32xf32>
    %85 = arith.addf %79, %84 : vector<4x32xf32>
    %c8_i32 = arith.constant 8 : i32
    %86 = vector.broadcast %c8_i32 : i32 to vector<4x32xi32>
    %87 = arith.addi %86, %71 : vector<4x32xi32>
    %88 = arith.cmpi eq, %72, %87 : vector<4x32xi32>
    %89 = arith.extui %88 : vector<4x32xi1> to vector<4x32xi32>
    %90 = arith.sitofp %89 : vector<4x32xi32> to vector<4x32xf32>
    %91 = arith.addf %85, %90 : vector<4x32xf32>
    %c12_i32 = arith.constant 12 : i32
    %92 = vector.broadcast %c12_i32 : i32 to vector<4x32xi32>
    %93 = arith.addi %92, %71 : vector<4x32xi32>
    %94 = arith.cmpi eq, %72, %93 : vector<4x32xi32>
    %95 = arith.extui %94 : vector<4x32xi1> to vector<4x32xi32>
    %96 = arith.sitofp %95 : vector<4x32xi32> to vector<4x32xf32>
    %97 = arith.addf %91, %96 : vector<4x32xf32>
    %c16_i32 = arith.constant 16 : i32
    %98 = vector.broadcast %c16_i32 : i32 to vector<4x32xi32>
    %99 = arith.addi %98, %71 : vector<4x32xi32>
    %100 = arith.cmpi eq, %72, %99 : vector<4x32xi32>
    %101 = arith.extui %100 : vector<4x32xi1> to vector<4x32xi32>
    %102 = arith.sitofp %101 : vector<4x32xi32> to vector<4x32xf32>
    %103 = arith.addf %97, %102 : vector<4x32xf32>
    %c20_i32 = arith.constant 20 : i32
    %104 = vector.broadcast %c20_i32 : i32 to vector<4x32xi32>
    %105 = arith.addi %104, %71 : vector<4x32xi32>
    %106 = arith.cmpi eq, %72, %105 : vector<4x32xi32>
    %107 = arith.extui %106 : vector<4x32xi1> to vector<4x32xi32>
    %108 = arith.sitofp %107 : vector<4x32xi32> to vector<4x32xf32>
    %109 = arith.addf %103, %108 : vector<4x32xf32>
    %c24_i32 = arith.constant 24 : i32
    %110 = vector.broadcast %c24_i32 : i32 to vector<4x32xi32>
    %111 = arith.addi %110, %71 : vector<4x32xi32>
    %112 = arith.cmpi eq, %72, %111 : vector<4x32xi32>
    %113 = arith.extui %112 : vector<4x32xi1> to vector<4x32xi32>
    %114 = arith.sitofp %113 : vector<4x32xi32> to vector<4x32xf32>
    %115 = arith.addf %109, %114 : vector<4x32xf32>
    %c28_i32 = arith.constant 28 : i32
    %116 = vector.broadcast %c28_i32 : i32 to vector<4x32xi32>
    %117 = arith.addi %116, %71 : vector<4x32xi32>
    %118 = arith.cmpi eq, %72, %117 : vector<4x32xi32>
    %119 = arith.extui %118 : vector<4x32xi1> to vector<4x32xi32>
    %120 = arith.sitofp %119 : vector<4x32xi32> to vector<4x32xf32>
    %121 = arith.addf %115, %120 : vector<4x32xf32>
    %cst_22 = arith.constant dense<0.000000e+00> : vector<256x32xf32>
    %122 = tpu.matmul %38, %70, %cst_22 {dimension_numbers = #tpu.dot_dimension_numbers<[0], [0], [1], [1], [0, 1, 1, 1], [], []>, precision = #tpu.contract_precision<fp32>} : vector<8x256xf32>, vector<8x32xf32>, vector<256x32xf32> -> vector<256x32xf32>
    %cst_23 = arith.constant dense<0.000000e+00> : vector<256x32xf32>
    %123 = tpu.matmul %57, %121, %cst_23 {dimension_numbers = #tpu.dot_dimension_numbers<[0], [0], [1], [1], [0, 1, 1, 1], [], []>, precision = #tpu.contract_precision<fp32>} : vector<4x256xf32>, vector<4x32xf32>, vector<256x32xf32> -> vector<256x32xf32>
    %124 = arith.mulf %122, %123 : vector<256x32xf32>
    %c0_24 = arith.constant 0 : index
    %c0_25 = arith.constant 0 : index
    %125 = vector.load %arg3[%c0_24, %c0_25] : memref<256x32xf32, #tpu.memory_space<vmem>>, vector<256x32xf32>
    tpu.vector_store %arg3[%c0_24, %c0_25], %124 {strides = array<i32>} : memref<256x32xf32, #tpu.memory_space<vmem>>, vector<256x32xf32>,
    return
  }
  func.func @transform_0(%arg0: i32) -> (i32, i32) {
    %c0_i32 = arith.constant 0 : i32
    %c0_i32_0 = arith.constant 0 : i32
    return %c0_i32, %arg0 : i32, i32
  }
  func.func @transform_1(%arg0: i32) -> (i32, i32) {
    %c0_i32 = arith.constant 0 : i32
    %c0_i32_0 = arith.constant 0 : i32
    return %c0_i32, %arg0 : i32, i32
  }
  func.func @transform_2(%arg0: i32) -> (i32, i32) {
    %c0_i32 = arith.constant 0 : i32
    %c0_i32_0 = arith.constant 0 : i32
    return %arg0, %c0_i32 : i32, i32
  }
}

module attributes {stable_mosaic.version = 11 : i64} {
  func.func @_rad_prod_basis_major_kernel(%arg0: i32, %arg1: memref<32x1xf32, #tpu.memory_space<vmem>>, %arg2: memref<32x1xf32, #tpu.memory_space<vmem>>, %arg3: memref<32x1xf32, #tpu.memory_space<vmem>>, %arg4: memref<1x128xf32, #tpu.memory_space<vmem>>, %arg5: memref<1x128xf32, #tpu.memory_space<vmem>>, %arg6: memref<32x128xf32, #tpu.memory_space<vmem>>) attributes {dimension_semantics = [#tpu.dimension_semantics<parallel>], iteration_bounds = array<i64: 1>, scalar_prefetch = 0 : i64, scratch_operands = 0 : i64, tpu.core_type = #tpu.core_type<tc>, window_params = [{pipeline_mode = #tpu.pipeline_mode<synchronous>, transform_indices = @transform_0, window_bounds = array<i64: 32, 1>}, {pipeline_mode = #tpu.pipeline_mode<synchronous>, transform_indices = @transform_1, window_bounds = array<i64: 32, 1>}, {pipeline_mode = #tpu.pipeline_mode<synchronous>, transform_indices = @transform_2, window_bounds = array<i64: 32, 1>}, {transform_indices = @transform_3, window_bounds = array<i64: 1, 128>}, {transform_indices = @transform_4, window_bounds = array<i64: 1, 128>}, {transform_indices = @transform_5, window_bounds = array<i64: 32, 128>}]} {
    %c0 = arith.constant 0 : index
    %c0_0 = arith.constant 0 : index
    %0 = vector.load %arg4[%c0, %c0_0] : memref<1x128xf32, #tpu.memory_space<vmem>>, vector<1x128xf32>
    %c0_1 = arith.constant 0 : index
    %c0_2 = arith.constant 0 : index
    %1 = vector.load %arg5[%c0_1, %c0_2] : memref<1x128xf32, #tpu.memory_space<vmem>>, vector<1x128xf32>
    %cst = arith.constant 0.000000e+00 : f32
    %2 = vector.broadcast %cst : f32 to vector<1x128xf32>
    %3 = arith.cmpf one, %1, %2 : vector<1x128xf32>
    %cst_3 = arith.constant 0.000000e+00 : f32
    %4 = vector.broadcast %cst_3 : f32 to vector<1x128xf32>
    %5 = arith.cmpf ogt, %0, %4 : vector<1x128xf32>
    %6 = arith.andi %3, %5 : vector<1x128xi1>
    %7 = vector.shape_cast %0 : vector<1x128xf32> to vector<1x128xf32>
    %8 = vector.broadcast %7 : vector<1x128xf32> to vector<32x128xf32>
    %9 = vector.shape_cast %6 : vector<1x128xi1> to vector<1x128xi1>
    %10 = vector.broadcast %9 : vector<1x128xi1> to vector<32x128xi1>
    %c0_4 = arith.constant 0 : index
    %c0_5 = arith.constant 0 : index
    %11 = vector.load %arg1[%c0_4, %c0_5] : memref<32x1xf32, #tpu.memory_space<vmem>>, vector<32x1xf32>
    %cst_6 = arith.constant 6.28318548 : f32
    %12 = vector.broadcast %cst_6 : f32 to vector<32x1xf32>
    %13 = arith.mulf %12, %11 : vector<32x1xf32>
    %14 = vector.broadcast %13 : vector<32x1xf32> to vector<32x128xf32>
    %15 = arith.mulf %14, %8 : vector<32x128xf32>
    %c0_7 = arith.constant 0 : index
    %c0_8 = arith.constant 0 : index
    %16 = vector.load %arg2[%c0_7, %c0_8] : memref<32x1xf32, #tpu.memory_space<vmem>>, vector<32x1xf32>
    %17 = vector.broadcast %16 : vector<32x1xf32> to vector<32x128xf32>
    %18 = arith.addf %15, %17 : vector<32x128xf32>
    %19 = math.sin %18 : vector<32x128xf32>
    %cst_9 = arith.constant 1.000000e+00 : f32
    %20 = vector.broadcast %cst_9 : f32 to vector<32x128xf32>
    %21 = arith.select %10, %8, %20 : vector<32x128xi1>, vector<32x128xf32>
    %c0_10 = arith.constant 0 : index
    %c0_11 = arith.constant 0 : index
    %22 = vector.load %arg3[%c0_10, %c0_11] : memref<32x1xf32, #tpu.memory_space<vmem>>, vector<32x1xf32>
    %23 = math.log %21 : vector<32x128xf32>
    %24 = vector.broadcast %22 : vector<32x1xf32> to vector<32x128xf32>
    %25 = arith.mulf %24, %23 : vector<32x128xf32>
    %26 = math.exp %25 : vector<32x128xf32>
    %27 = arith.mulf %19, %26 : vector<32x128xf32>
    %cst_12 = arith.constant 0.000000e+00 : f32
    %28 = vector.broadcast %cst_12 : f32 to vector<32x128xf32>
    %29 = arith.select %10, %27, %28 : vector<32x128xi1>, vector<32x128xf32>
    %c0_13 = arith.constant 0 : index
    %c0_14 = arith.constant 0 : index
    %30 = vector.load %arg6[%c0_13, %c0_14] : memref<32x128xf32, #tpu.memory_space<vmem>>, vector<32x128xf32>
    tpu.vector_store %arg6[%c0_13, %c0_14], %29 {strides = array<i32>} : memref<32x128xf32, #tpu.memory_space<vmem>>, vector<32x128xf32>,
    return
  }
  func.func @transform_0(%arg0: i32) -> (i32, i32) {
    %c0_i32 = arith.constant 0 : i32
    %c0_i32_0 = arith.constant 0 : i32
    %c0_i32_1 = arith.constant 0 : i32
    return %c0_i32, %c0_i32_0 : i32, i32
  }
  func.func @transform_1(%arg0: i32) -> (i32, i32) {
    %c0_i32 = arith.constant 0 : i32
    %c0_i32_0 = arith.constant 0 : i32
    %c0_i32_1 = arith.constant 0 : i32
    return %c0_i32, %c0_i32_0 : i32, i32
  }
  func.func @transform_2(%arg0: i32) -> (i32, i32) {
    %c0_i32 = arith.constant 0 : i32
    %c0_i32_0 = arith.constant 0 : i32
    %c0_i32_1 = arith.constant 0 : i32
    return %c0_i32, %c0_i32_0 : i32, i32
  }
  func.func @transform_3(%arg0: i32) -> (i32, i32) {
    %c0_i32 = arith.constant 0 : i32
    %c0_i32_0 = arith.constant 0 : i32
    return %c0_i32, %arg0 : i32, i32
  }
  func.func @transform_4(%arg0: i32) -> (i32, i32) {
    %c0_i32 = arith.constant 0 : i32
    %c0_i32_0 = arith.constant 0 : i32
    return %c0_i32, %arg0 : i32, i32
  }
  func.func @transform_5(%arg0: i32) -> (i32, i32) {
    %c0_i32 = arith.constant 0 : i32
    %c0_i32_0 = arith.constant 0 : i32
    return %c0_i32, %arg0 : i32, i32
  }
}

</mosaic_0001>

<bundles_post_ra>
// kernel: tpu_custom_call.1
= control target key start
LH: loop header
LB: loop body
LE: loop exit
PB: predicated region body
PF: predicated region fallthrough
CT: control target
= control target key end

     0   :  { %7 = vsyncpa [#allocation3], 0  ;;  %s7488_s0 = inlined_call_operand.hbm [shape: f32[1,256], index: 0, kind: input, shape index: {}]   ;;  %s7489_s1 = inlined_call_operand.hbm [shape: f32[1,256], index: 1, kind: input, shape index: {}]   ;;  %s7490_s2 = inlined_call_operand.vmem [shape: f32[256,32], index: 2, kind: output, shape index: {}]  }
   0x1   :  { %8 = vsyncpa [#allocation5], 0  ;;  %s5408_s9 = smov [#allocation2]   ;;  %s5409_s11 = smov [#allocation4]  }
   0x2   :  { %s15_s10 = sshll.u32 %s5408_s9, 4  ;;  %s25_s12 = sshll.u32 %s5409_s11, 4  ;;  %s16_s10 = int_to_ptr.vmem [resolvable:$true] %s15_s10  ;;  %s26_s12 = int_to_ptr.vmem [resolvable:$true] %s25_s12 }
   0x3   :  { %s5372_s13 = scalar_lea.vmem %s16_s10, 32  ;;  %p5377_p1 = scmp.lt.s32.totalorder %s16_s10, %s16_s10 }
   0x4   :  { %p5373_p0 = scmp.ne.s32.totalorder %s16_s10, %s5372_s13  ;;  %p5378_p2 = scmp.lt.s32.totalorder %s5372_s13, %s5372_s13 }
   0x6   :  { %p5379_p3 = por %p5378_p2, %p5377_p1 }
   0x8   :  { %p5380_p4 = pnand %p5379_p3, %p5373_p0 }
   0xa   :  { %5383 = shalt.err (!%p5380_p4)
}
   0xb   :  { %18 = dma.hbm_to_vmem [thread:$0]  %s7488_s0, 32, %s16_s10, [#allocation3]  }
   0xc   :  { %s5392_s16 = scalar_lea.vmem %s26_s12, 32  ;;  %p5397_p6 = scmp.lt.s32.totalorder %s26_s12, %s26_s12 }
   0xd   :  { %p5393_p5 = scmp.ne.s32.totalorder %s26_s12, %s5392_s16  ;;  %p5398_p7 = scmp.lt.s32.totalorder %s5392_s16, %s5392_s16 }
   0xf   :  { %p5399_p8 = por %p5398_p7, %p5397_p6 }
  0x11   :  { %p5400_p9 = pnand %p5399_p8, %p5393_p5 }
  0x13   :  { %5403 = shalt.err (!%p5400_p9)
}
  0x14   :  { %28 = dma.hbm_to_vmem [thread:$0]  %s7489_s1, 32, %s26_s12, [#allocation5]  }
  0x15   :  { %5404 = dma.done.wait [#allocation3], 32  }
  0x16   :  { %5405 = vsyncadd [#allocation3], 4294967264 }
  0x17   :  { %5406 = dma.done.wait [#allocation5], 32  }
  0x18   :  { %5407 = vsyncadd [#allocation5], 4294967264  ;;  %v43_v0 = vlaneseq  ;;  %v5454_v6 = vld [vmem:[#allocation2] sm:$0x3]  ;;  %v5410_v11 = vmov 0.0  }
  0x19   :  { %v5411_v39 = vmov 683565275   ;;  %v5412_v41 = vmov 2475754826   ;;  %v5413_v43 = vmov 2131351028  }
  0x1a   :  { %v5441_v1 = vshrl.u32 %v43_v0, 7  ;;  %v5414_v45 = vmov 2102212464   ;;  %v5415_v47 = vmov 920167782  }
  0x1b   :  { %v5416_v55 = vmov 1326507024  }
  0x1c   :  { %vm45_vm0 = vcmp.lt.s32.totalorder %v5441_v1, 4  ;;  %v4318_v2 = vadd.s32 4294967292, %v5441_v1  ;;  %vm49_vm1 = vcmp.eq.s32.totalorder %v5441_v1, 0  ;;  %vm50_vm2 = vcmp.ge.s32.totalorder %v5441_v1, 4 }
  0x1d   :  { %v5448_v3 = vsub.s32 0, %v5441_v1  ;;  %v5451_v4 = vsub.s32 1, %v5441_v1  ;;  %vm51_vm3 = vmor %vm49_vm1, %vm50_vm2 }
  0x1e   :  { %v47_v5 = vsel %vm45_vm0, %v5441_v1, %v4318_v2  ;;  %v52_v12 = vsel %vm51_vm3, 1.5707964, %v5410_v11 }
  0x1f   :  { %v48_v7 = vcvt.s32.f32 %v47_v5  ;;  %v57_v8 = vrot.slane %v5454_v6, %v5448_v3  ;;  %v61_v9 = vrot.slane %v5454_v6, %v5451_v4 }
  0x21   :  { %v75_v10 = vmul.f32 6.2831855, %v48_v7 }
  0x23   :  { %v76_v13 = vmul.f32 %v75_v10, %v57_v8  ;;  %v77_v14 = vmul.f32 %v75_v10, %v61_v9 }
  0x25   :  { %v5461_v15 = vadd.f32 %v76_v13, %v52_v12  ;;  %v5463_v16 = vadd.f32 %v77_v14, %v52_v12 }
  0x27   :  { %v80_v17 = vand.u32 2147483647, %v5461_v15  ;;  %v83_v18 = vand.u32 2139095040, %v5461_v15  ;;  %v184_v19 = vand.u32 2147483647, %v5463_v16  ;;  %v187_v20 = vand.u32 2139095040, %v5463_v16 }
  0x28   :  { %vm82_vm2 = vcmp.lt.s32.totalorder %v5461_v15, 0 }
  0x29   :  { %v84_v21 = vshrl.u32 %v83_v18, 23  ;;  %v87_v22 = vand.u32 8388607, %v80_v17  ;;  %v188_v23 = vshrl.u32 %v187_v20, 23  ;;  %v191_v24 = vand.u32 8388607, %v184_v19 }
  0x2a   :  { %vm5524_vm3 = vcmp.le.f32.partialorder %v80_v17, 0.7853982 }
  0x2b   :  { %v4319_v25 = vadd.s32 4294967169, %v84_v21  ;;  %v4323_v26 = vadd.s32 4294967169, %v188_v23  ;;  %v88_v28 = vor.u32 8388608, %v87_v22  ;;  %v192_v29 = vor.u32 8388608, %v191_v24 }
  0x2d   :  { %v90_v27 = vadd.s32 1, %v4319_v25  ;;  %v194_v30 = vadd.s32 1, %v4323_v26  ;;  %v5473_v35 = vshll.u32 %v88_v28, 8  ;;  %v5475_v37 = vshll.u32 %v192_v29, 8 }
  0x2f   :  { %vm91_vm4 = vcmp.gt.s32.totalorder %v90_v27, 0  ;;  %vm195_vm5 = vcmp.gt.s32.totalorder %v194_v30, 0 }
  0x30   :  { %v92_v31 = vsel %vm91_vm4, %v90_v27, 0  ;;  %v196_v34 = vsel %vm195_vm5, %v194_v30, 0  ;;  %vm38_vm5 = vcmp.gt.f32.partialorder %v5454_v6, 0.0 }
  0x31   :  { %v93_v32 = vshrl.u32 %v92_v31, 5  ;;  %v94_v33 = vand.u32 31, %v92_v31  ;;  %v198_v36 = vand.u32 31, %v196_v34  ;;  %v5477_v49 = vshrl.u32 %v196_v34, 5 }
  0x33   :  { %v95_v38 = vsub.s32 32, %v94_v33  ;;  %v97_v40 = vshll.u32 %v5411_v39, %v94_v33  ;;  %v100_v42 = vshll.u32 %v5412_v41, %v94_v33  ;;  %v103_v44 = vshll.u32 %v5413_v43, %v94_v33 }
  0x34   :  { %v106_v46 = vshll.u32 %v5414_v45, %v94_v33  ;;  %v109_v48 = vshll.u32 %v5415_v47, %v94_v33  ;;  %vm112_vm6 = vcmp.lt.s32.totalorder %v93_v32, 1  ;;  %vm113_vm7 = vcmp.lt.s32.totalorder %v93_v32, 2 }
  0x35   :  { %v96_v50 = vshrl.u32 %v5411_v39, %v95_v38  ;;  %v98_v51 = vshrl.u32 %v5412_v41, %v95_v38  ;;  %v101_v52 = vshrl.u32 %v5413_v43, %v95_v38  ;;  %v104_v53 = vshrl.u32 %v5414_v45, %v95_v38 }
  0x36   :  { %v107_v54 = vshrl.u32 %v5415_v47, %v95_v38  ;;  %v110_v56 = vshrl.u32 %v5416_v55, %v95_v38  ;;  %vm115_vm8 = vcmp.lt.s32.totalorder %v93_v32, 4  ;;  %v199_v60 = vsub.s32 32, %v198_v36 }
  0x37   :  { %v99_v57 = vor.u32 %v98_v51, %v97_v40  ;;  %v102_v58 = vor.u32 %v101_v52, %v100_v42  ;;  %v105_v59 = vor.u32 %v104_v53, %v103_v44  ;;  %vm114_vm9 = vcmp.lt.s32.totalorder %v93_v32, 3 }
  0x38   :  { %v108_v61 = vor.u32 %v107_v54, %v106_v46  ;;  %v111_v62 = vor.u32 %v110_v56, %v109_v48  ;;  %v201_v63 = vshll.u32 %v5411_v39, %v198_v36  ;;  %v204_v13 = vshll.u32 %v5412_v41, %v198_v36 }
  0x39   :  { %v116_v2 = vsel %vm112_vm6, %v96_v50, %v99_v57  ;;  %v117_v5 = vsel %vm115_vm8, %v105_v59, 2102212464  ;;  %v120_v7 = vsel %vm112_vm6, %v99_v57, %v102_v58  ;;  %v124_v8 = vsel %vm112_vm6, %v102_v58, %v105_v59 }
  0x3a   :  { %v118_v9 = vsel %vm114_vm9, %v102_v58, %v117_v5  ;;  %v121_v10 = vsel %vm115_vm8, %v108_v61, 920167782  ;;  %v125_v12 = vsel %vm115_vm8, %v111_v62, 1326507024  ;;  %v200_v20 = vshrl.u32 %v5411_v39, %v199_v60 }
  0x3b   :  { %v122_v14 = vsel %vm114_vm9, %v105_v59, %v121_v10  ;;  %v126_v18 = vsel %vm114_vm9, %v108_v61, %v125_v12  ;;  %v202_v21 = vshrl.u32 %v5412_v41, %v199_v60  ;;  %v119_v22 = vsel %vm113_vm7, %v116_v2, %v118_v9 }
  0x3c   :  { %v123_v23 = vsel %vm113_vm7, %v120_v7, %v122_v14  ;;  %v127_v24 = vsel %vm113_vm7, %v124_v8, %v126_v18  ;;  %v205_v25 = vshrl.u32 %v5413_v43, %v199_v60  ;;  %v207_v33 = vshll.u32 %v5413_v43, %v198_v36 }
  0x3d   :  { %v5486_v26 = vmul.u32.u64.low %v5473_v35, %v127_v24  ;;  %v5487_v27 = vmul.u32.u64.high %v5473_v35, %v127_v24, %v5486_v26  ;;  %v5490_v28 = vmul.u32.u64.low %v5473_v35, %v123_v23  ;;  %v5491_v29 = vmul.u32.u64.high %v5473_v35, %v123_v23, %v5490_v28 }
  0x3e   :  { %v203_v30 = vor.u32 %v202_v21, %v201_v63  ;;  %v206_v31 = vor.u32 %v205_v25, %v204_v13  ;;  %v208_v34 = vshrl.u32 %v5414_v45, %v199_v60  ;;  %v210_v38 = vshll.u32 %v5414_v45, %v198_v36 }
  0x3f   :  { %v211_v39 = vshrl.u32 %v5415_v47, %v199_v60  ;;  %v213_v40 = vshll.u32 %v5415_v47, %v198_v36  ;;  %v214_v41 = vshrl.u32 %v5416_v55, %v199_v60  ;;  %v135_v32 = vmul.u32 %v5473_v35, %v119_v22 }
  0x40   :  { %v209_v42 = vor.u32 %v208_v34, %v207_v33  ;;  %vm216_vm10 = vcmp.lt.s32.totalorder %v5477_v49, 1  ;;  %vm217_vm11 = vcmp.lt.s32.totalorder %v5477_v49, 2  ;;  %vm137_vm12 = vc.u32 %v5487_v27, %v5490_v28 }
  0x41   :  { %v138_v44 = vadd.s32 1, %v5491_v29  ;;  %v212_v46 = vor.u32 %v211_v39, %v210_v38  ;;  %vm218_vm13 = vcmp.lt.s32.totalorder %v5477_v49, 3  ;;  %v215_v43 = vor.u32 %v214_v41, %v213_v40 }
  0x42   :  { %vm219_vm14 = vcmp.lt.s32.totalorder %v5477_v49, 4  ;;  %v220_v45 = vsel %vm216_vm10, %v200_v20, %v203_v30  ;;  %v224_v36 = vsel %vm216_vm10, %v203_v30, %v206_v31  ;;  %v228_v50 = vsel %vm216_vm10, %v206_v31, %v209_v42 }
  0x43   :  { %v139_v47 = vsel %vm137_vm12, %v138_v44, %v5491_v29  ;;  %v221_v35 = vsel %vm219_vm14, %v209_v42, 2102212464  ;;  %v225_v48 = vsel %vm219_vm14, %v212_v46, 920167782  ;;  %v229_v54 = vsel %vm219_vm14, %v215_v43, 1326507024 }
  0x44   :  { %v140_v51 = vadd.s32 %v139_v47, %v135_v32  ;;  %v222_v52 = vsel %vm218_vm13, %v206_v31, %v221_v35  ;;  %v226_v53 = vsel %vm218_vm13, %v209_v42, %v225_v48  ;;  %v230_v57 = vsel %vm218_vm13, %v212_v46, %v229_v54 }
  0x45   :  { %v223_v55 = vsel %vm217_vm11, %v220_v45, %v222_v52  ;;  %v227_v56 = vsel %vm217_vm11, %v224_v36, %v226_v53  ;;  %v231_v59 = vsel %vm217_vm11, %v228_v50, %v230_v57  ;;  %v136_v24 = vadd.s32 %v5490_v28, %v5487_v27 }
  0x46   :  { %v141_v58 = vadd.s32 536870912, %v140_v51  ;;  %v5508_v60 = vmul.u32.u64.low %v5475_v37, %v227_v56  ;;  %v5509_v61 = vmul.u32.u64.high %v5475_v37, %v227_v56, %v5508_v60  ;;  %v239_v5 = vmul.u32 %v5475_v37, %v223_v55 }
  0x47   :  { %v5512_v62 = vmul.u32.u64.low %v5475_v37, %v231_v59  ;;  %v5513_v63 = vmul.u32.u64.high %v5475_v37, %v231_v59, %v5512_v62  ;;  %v36_v59 = vld [vmem:[#allocation4] sm:$0x3]  ;;  %vm186_vm6 = vcmp.lt.s32.totalorder %v5463_v16, 0  ;;  %vm5537_vm7 = vcmp.le.f32.partialorder %v184_v19, 0.7853982 }
  0x48   :  { %v142_v2 = vshrl.u32 %v141_v58, 30  ;;  %v242_v8 = vadd.s32 1, %v5509_v61  ;;  %vm37_vm4 = vcmp.ne.f32.partialorder %v36_v59, 0.0  ;;  %v7508_v50 = vmov 1.0  }
  0x49   :  { %vm241_vm15 = vc.u32 %v5513_v63, %v5508_v60  ;;  %v240_v44 = vadd.s32 %v5508_v60, %v5513_v63  ;;  %vm5541_vm8 = vmand %vm37_vm4, %vm38_vm5  ;;  %vm276_vm4 = vweird.f32 %v5463_v16 }
  0x4a   :  { %v143_v7 = vshll.u32 %v142_v2, 30  ;;  %v243_v49 = vsel %vm241_vm15, %v242_v8, %v5509_v61  ;;  %v166_v47 = vsub.s32 4, %v142_v2  ;;  %vm172_vm15 = vweird.f32 %v5461_v15 }
  0x4b   :  { %v244_v10 = vadd.s32 %v243_v49, %v239_v5 }
  0x4c   :  { %v144_v9 = vsub.s32 %v140_v51, %v143_v7  ;;  %v167_v55 = vsel %vm82_vm2, %v166_v47, %v142_v2 }
  0x4d   :  { %v245_v13 = vadd.s32 536870912, %v244_v10  ;;  %v169_v17 = vsel %vm5524_vm3, 0, %v167_v55 }
  0x4e   :  { %v146_v12 = vsub.s32 0, %v144_v9  ;;  %v173_v63 = vadd.s32 3, %v169_v17 }
  0x4f   :  { %v246_v18 = vshrl.u32 %v245_v13, 30 }
  0x50   :  { %v4320_v14 = vmin.u32 %v146_v12, %v144_v9  ;;  %v5417_v12 = vmov 0   ;;  %v174_v13 = vand.u32 3, %v173_v63 }
  0x51   :  { %v247_v21 = vshll.u32 %v246_v18, 30  ;;  %v270_v62 = vsub.s32 4, %v246_v18  ;;  %v64_v19 = vsel %vm5541_vm8, 1, %v5417_v12 }
  0x52   :  { %v148_v20 = vclz %v4320_v14  ;;  %v5552_v14 = vand.u32 127, %v43_v0  ;;  %vm179_vm11 = vcmp.eq.s32.totalorder %v174_v13, 2  ;;  %vm176_vm13 = vcmp.eq.s32.totalorder %v174_v13, 0 }
  0x53   :  { %v248_v23 = vsub.s32 %v244_v10, %v247_v21  ;;  %v318_v10 = vadd.s32 1, %v5441_v1  ;;  %vm175_vm14 = vcmp.lt.s32.totalorder %v174_v13, 2 }
  0x54   :  { %v4321_v22 = vadd.s32 4294967294, %v148_v20  ;;  %v316_v20 = vmul.u32 4, %v5441_v1 }
  0x55   :  { %v250_v25 = vsub.s32 0, %v248_v23  ;;  %v319_v21 = vmul.u32 4, %v318_v10 }
  0x56   :  { %vm4322_vm0 = vcmp.lt.s32.totalorder %v4321_v22, 0  ;;  %vm317_vm9 = vcmp.ge.s32.totalorder %v5552_v14, %v316_v20 }
  0x57   :  { %v151_v37 = vsel %vm4322_vm0, 0, %v4321_v22  ;;  %v4324_v31 = vmin.u32 %v250_v25, %v248_v23  ;;  %vm320_vm10 = vcmp.lt.s32.totalorder %v5552_v14, %v319_v21 }
  0x58   :  { %v152_v26 = vsub.s32 32, %v151_v37  ;;  %v153_v29 = vshll.u32 %v144_v9, %v151_v37  ;;  %v156_v30 = vsub.s32 4294967266, %v151_v37  ;;  %v271_v9 = vsel %vm186_vm6, %v270_v62, %v246_v18  ;;  %vm5560_vm12 = vmand %vm317_vm9, %vm320_vm10 }
  0x59   :  { %v252_v38 = vclz %v4324_v31  ;;  %v273_v18 = vsel %vm5537_vm7, 0, %v271_v9  ;;  %4735 = vmatprep.subr.msk.mxu0 %vm5560_vm12, %v7508_v50  ;;  %vm309_vm9 = vcmp.ge.s32.totalorder %v5441_v1, 3  ;;  %vm324_vm10 = vcmp.eq.s32.totalorder %v5552_v14, %v5441_v1 }
  0x5a   :  { %v154_v33 = vshrl.u32 %v136_v24, %v152_v26  ;;  %v157_v34 = vadd.s32 127, %v156_v30  ;;  %v277_v25 = vadd.s32 3, %v273_v18  ;;  %v4327_v26 = vsel %vm5560_vm12, 1.0, %v5410_v11  ;;  %4736 = vmatpush3.msk.msra.mxu0 %vm5560_vm12, %v7508_v50 }
  0x5b   :  { %v4325_v41 = vadd.s32 4294967294, %v252_v38  ;;  %v5567_v30 = vsub.f32 %v4327_v26, %v4327_v26 }
  0x5c   :  { %v155_v39 = vor.u32 %v154_v33, %v153_v29  ;;  %v158_v40 = vshll.u32 %v157_v34, 23 }
  0x5d   :  { %vm4326_vm1 = vcmp.lt.s32.totalorder %v4325_v41, 0  ;;  %v5571_v34 = vand.u32 4294901760, %v5567_v30  ;;  %4835 = vmatprep.subr.mxu0 %v5567_v30 }
  0x5e   :  { %v159_v32 = vor.u32 4788187, %v158_v40  ;;  %v162_v42 = vcvt.s32.f32 %v155_v39  ;;  %v255_v27 = vsel %vm4326_vm1, 0, %v4325_v41  ;;  %v278_v39 = vand.u32 3, %v277_v25 }
  0x5f   :  { %v256_v28 = vsub.s32 32, %v255_v27  ;;  %v257_v43 = vshll.u32 %v248_v23, %v255_v27  ;;  %v260_v45 = vsub.s32 4294967266, %v255_v27  ;;  %v68_v23 = vrot.slane %v64_v19, %v5448_v3 }
  0x60   :  { %v160_v46 = vand.u32 2147483647, %v159_v32  ;;  %v944_v41 = vsub.f32 %v5567_v30, %v5571_v34  ;;  %vm283_vm1 = vcmp.eq.s32.totalorder %v278_v39, 2 }
  0x61   :  { %v258_v35 = vshrl.u32 %v240_v44, %v256_v28  ;;  %v261_v48 = vadd.s32 127, %v260_v45  ;;  %vm73_vm0 = vcmp.eq.s32.totalorder %v68_v23, 1 }
  0x62   :  { %v163_v36 = vmul.f32 %v162_v42, %v160_v46  ;;  %v945_v42 = vand.u32 4294901760, %v944_v41  ;;  %v72_v46 = vrot.slane %v64_v19, %v5451_v4 }
  0x63   :  { %v259_v52 = vor.u32 %v258_v35, %v257_v43  ;;  %v262_v53 = vshll.u32 %v261_v48, 23 }
  0x64   :  { %v164_v51 = vxor.u32 2147483648, %v163_v36  ;;  %4785 = vmatprep.subr.mxu1 %v945_v42  ;;  %vm5577_vm5 = vcmp.eq.s32.totalorder %v72_v46, 1 }
  0x65   :  { %v263_v57 = vor.u32 4788187, %v262_v53  ;;  %v266_v58 = vcvt.s32.f32 %v259_v52  ;;  %4786 = vmatpush3.msra.mxu1 %v945_v42 }
  0x66   :  { %v165_v54 = vsel %vm82_vm2, %v164_v51, %v163_v36  ;;  %vm280_vm2 = vcmp.eq.s32.totalorder %v278_v39, 0  ;;  %4885 = vmatprep.subr.msk.mxu1 %vm5560_vm12, %v7508_v50 }
  0x67   :  { %v168_v56 = vsel %vm5524_vm3, %v5461_v15, %v165_v54  ;;  %v264_v60 = vand.u32 2147483647, %v263_v57  ;;  %vm279_vm3 = vcmp.lt.s32.totalorder %v278_v39, 2 }
  0x68   :  { %5354 = vcosq.f32 %v168_v56 }
  0x69   :  { %5356 = vsinq.f32 %v168_v56  ;;  %v267_v61 = vmul.f32 %v266_v58, %v264_v60 }
  0x6b   :  { %v268_v5 = vxor.u32 2147483648, %v267_v61 }
  0x6d   :  { %v269_v8 = vsel %vm186_vm6, %v268_v5, %v267_v61  ;;  %vm301_vm6 = vcmp.ge.s32.totalorder %v5441_v1, 1 }
  0x6e   :  { %v272_v49 = vsel %vm5537_vm7, %v5463_v16, %v269_v8  ;;  %v40_v16 = vsel %vm5541_vm8, %v5454_v6, 1.0  ;;  %vm304_vm7 = vcmp.ge.s32.totalorder %v5441_v1, 2  ;;  %vm427_vm8 = vcmask 64512  }
  0x6f   :  { %5358 = vcosq.f32 %v272_v49 }
  0x70   :  { %5360 = vsinq.f32 %v272_v49 }
  0x71   :  { %5362 = vrcp.f32 %v40_v16 }
  0x75   :  { %v5355_v22 = vpop.eup %5354 }
  0x76   :  { %v5357_v0 = vpop.eup %5356  ;;  %v180_v37 = vxor.u32 2147483648, %v5355_v22 }
  0x77   :  { %v177_v29 = vxor.u32 2147483648, %v5357_v0 }
  0x78   :  { %v181_v31 = vsel %vm179_vm11, %v180_v37, %v5357_v0 }
  0x79   :  { %v178_v33 = vsel %vm176_vm13, %v5355_v22, %v177_v29 }
  0x7a   :  { %v182_v38 = vsel %vm175_vm14, %v178_v33, %v181_v31 }
  0x7b   :  { %v183_v40 = vsel %vm172_vm15, nan, %v182_v38 }
  0x7c   :  { %v288_v32 = vsel %vm73_vm0, %v183_v40, 0.0  ;;  %v5359_v44 = vpop.eup %5358 }
  0x7d   :  { %363 = vxpose.xlu0.b32.start.end [1/1] (short) %v288_v32, 128  ;;  %v5361_v15 = vpop.eup %5360  ;;  %v284_v27 = vxor.u32 2147483648, %v5359_v44 }
  0x7e   :  { %v281_v28 = vxor.u32 2147483648, %v5361_v15  ;;  %v5363_v51 = vpop.eup %5362 }
  0x7f   :  { %v285_v43 = vsel %vm283_vm1, %v284_v27, %v5361_v15  ;;  %v294_v52 = vrot.slane %v5363_v51, %v5448_v3  ;;  %v298_v58 = vrot.slane %v5363_v51, %v5451_v4 }
  0x80   :  { %v282_v36 = vsel %vm280_vm2, %v5359_v44, %v281_v28 }
  0x81   :  { %v286_v47 = vsel %vm279_vm3, %v282_v36, %v285_v43  ;;  %v302_v53 = vsel %vm301_vm6, %v294_v52, 1.0  ;;  %v305_v54 = vsel %vm304_vm7, %v294_v52, 1.0  ;;  %v310_v56 = vsel %vm309_vm9, %v294_v52, 1.0 }
  0x82   :  { %v287_v35 = vsel %vm276_vm4, nan, %v286_v47  ;;  %v307_v55 = vmul.f32 %v305_v54, %v302_v53  ;;  %v303_v6 = vsel %vm301_vm6, %v298_v58, 1.0  ;;  %v306_v59 = vsel %vm304_vm7, %v298_v58, 1.0 }
  0x83   :  { %v289_v48 = vsel %vm5577_vm5, %v287_v35, 0.0  ;;  %v308_v60 = vmul.f32 %v306_v59, %v303_v6  ;;  %v311_v17 = vsel %vm309_vm9, %v298_v58, 1.0  ;;  %vm2464_vm3 = vcmask 1043456  }
  0x84   :  { %v312_v57 = vmul.f32 %v310_v56, %v307_v55  ;;  %vm4279_vm4 = vcmask 261120  }
  0x85   :  { %v313_v3 = vmul.f32 %v311_v17, %v308_v60 }
  0x86   :  { %2303 = vxpose.xlu1.b32.start.end [1/1] (short) %v312_v57, 128 }
  0xba   :  { %395 = vxpose.xlu0.b32.start.end [1/1] (short) %v289_v48, 128 }
  0xc3   :  { %2335 = vxpose.xlu1.b32.start.end [1/1] (short) %v313_v3, 128 }
  0xf9   :  { %v379_v61 = vpop.trf.xlu0 }
  0xfa   :  { %v429_v62 = vsel %vm427_vm8, %v379_v61, 0 }
  0xfb   :  { %v5602_v63 = vand.u32 4294901760, %v429_v62 }
  0xfd   :  { %v5605_v2 = vsub.f32 %v429_v62, %v5602_v63  ;;  %4787 = vmatprep.mubr.f32.mxu1 %v5602_v63  ;;  %v380_v5 = vpop.trf.xlu0 }
  0xfe   :  { %v432_v4 = vsel %vm427_vm8, %v380_v5, 0 }
  0xff   :  { %v5609_v7 = vand.u32 4294901760, %v432_v4  ;;  %v7512_v8 = vand.u32 4294901760, %v5605_v2 }
 0x101   :  { %v5613_v9 = vsub.f32 %v432_v4, %v5609_v7  ;;  %4788 = vmatmul.mubr.f32.vlgmr.msra.gmra.mxu1 %v5609_v7  ;;  %v381_v49 = vpop.trf.xlu0  ;;  %v593_v10 = vsub.f32 %v5605_v2, %v7512_v8 }
 0x102   :  { %v435_v12 = vsel %vm427_vm8, %v381_v49, 0  ;;  %4886 = vmatpush3.msk.msra.mxu1 %vm5560_vm12, %v7508_v50 }
 0x103   :  { %v7511_v19 = vand.u32 4294901760, %v5613_v9  ;;  %v5624_v13 = vand.u32 4294901760, %v435_v12  ;;  %v594_v20 = vand.u32 4294901760, %v593_v10  ;;  %4985 = vmatprep.subr.msk.mxu1 %vm5560_vm12, %v7508_v50 }
 0x105   :  { %v5630_v21 = vsub.f32 %v435_v12, %v5624_v13  ;;  %4737 = vmatprep.mubr.f32.mxu0 %v594_v20  ;;  %4790 = vmatprep.mubr.f32.mxu1 %v5624_v13  ;;  %v382_v18 = vpop.trf.xlu0  ;;  %v603_v22 = vsub.f32 %v5613_v9, %v7511_v19 }
 0x106   :  { %v438_v23 = vsel %vm427_vm8, %v382_v18, 0 }
 0x107   :  { %v7509_v0 = vand.u32 4294901760, %v5630_v21  ;;  %v5638_v37 = vand.u32 4294901760, %v438_v23  ;;  %v604_v25 = vand.u32 4294901760, %v603_v22 }
 0x109   :  { %v5641_v26 = vsub.f32 %v438_v23, %v5638_v37  ;;  %4738 = vmatmul.mubr.f32.vlgmr.msra.gmra.mxu0 %v604_v25  ;;  %4791 = vmatmul.mubr.f32.gmra.mxu1 %v5638_v37  ;;  %v383_v29 = vpop.trf.xlu0  ;;  %v613_v31 = vsub.f32 %v5630_v21, %v7509_v0 }
 0x10a   :  { %v441_v33 = vsel %vm427_vm8, %v383_v29, 0  ;;  %4836 = vmatpush3.msra.mxu0 %v5567_v30 }
 0x10b   :  { %v7506_v38 = vand.u32 4294901760, %v5641_v26  ;;  %v5650_v39 = vand.u32 4294901760, %v441_v33  ;;  %v614_v40 = vand.u32 4294901760, %v613_v31  ;;  %4935 = vmatprep.subr.mxu0 %v5571_v34 }
 0x10d   :  { %v5654_v41 = vsub.f32 %v441_v33, %v5650_v39  ;;  %4740 = vmatprep.mubr.f32.mxu0 %v614_v40  ;;  %4793 = vmatprep.mubr.f32.mxu1 %v5650_v39  ;;  %v384_v32 = vpop.trf.xlu0  ;;  %v623_v42 = vsub.f32 %v5641_v26, %v7506_v38 }
 0x10e   :  { %v444_v30 = vsel %vm427_vm8, %v384_v32, 0 }
 0x10f   :  { %v7505_v44 = vand.u32 4294901760, %v5654_v41  ;;  %v5662_v46 = vand.u32 4294901760, %v444_v30  ;;  %v624_v15 = vand.u32 4294901760, %v623_v42 }
 0x111   :  { %v5665_v27 = vsub.f32 %v444_v30, %v5662_v46  ;;  %4741 = vmatmul.mubr.f32.gmra.mxu0 %v624_v15  ;;  %4794 = vmatmul.mubr.f32.gmra.mxu1 %v5662_v46  ;;  %v385_v28 = vpop.trf.xlu0  ;;  %v633_v43 = vsub.f32 %v5654_v41, %v7505_v44 }
 0x112   :  { %v447_v45 = vsel %vm427_vm8, %v385_v28, 0 }
 0x113   :  { %v7503_v36 = vand.u32 4294901760, %v5665_v27  ;;  %v5673_v47 = vand.u32 4294901760, %v447_v45  ;;  %v634_v35 = vand.u32 4294901760, %v633_v43 }
 0x115   :  { %v5676_v48 = vsub.f32 %v447_v45, %v5673_v47  ;;  %4743 = vmatprep.mubr.f32.mxu0 %v634_v35  ;;  %4796 = vmatprep.mubr.f32.mxu1 %v5673_v47  ;;  %v386_v16 = vpop.trf.xlu0  ;;  %v643_v51 = vsub.f32 %v5665_v27, %v7503_v36 }
 0x116   :  { %v450_v52 = vsel %vm427_vm8, %v386_v16, 0 }
 0x117   :  { %v7502_v53 = vand.u32 4294901760, %v5676_v48  ;;  %v5684_v54 = vand.u32 4294901760, %v450_v52  ;;  %v644_v55 = vand.u32 4294901760, %v643_v51 }
 0x119   :  { %v5687_v56 = vsub.f32 %v450_v52, %v5684_v54  ;;  %4744 = vmatmul.mubr.f32.gmra.mxu0 %v644_v55  ;;  %4797 = vmatmul.mubr.f32.gmra.mxu1 %v5684_v54  ;;  %v387_v57 = vpop.trf.xlu0  ;;  %v653_v58 = vsub.f32 %v5676_v48, %v7502_v53 }
 0x11a   :  { %v453_v6 = vsel %vm427_vm8, %v387_v57, 0 }
 0x11b   :  { %v7501_v59 = vand.u32 4294901760, %v5687_v56  ;;  %v5695_v60 = vand.u32 4294901760, %v453_v6  ;;  %v654_v17 = vand.u32 4294901760, %v653_v58 }
 0x11d   :  { %v5698_v3 = vsub.f32 %v453_v6, %v5695_v60  ;;  %4746 = vmatprep.mubr.f32.mxu0 %v654_v17  ;;  %4799 = vmatprep.mubr.f32.mxu1 %v5695_v60  ;;  %v388_v61 = vpop.trf.xlu0  ;;  %v663_v62 = vsub.f32 %v5687_v56, %v7501_v59 }
 0x11e   :  { %v456_v5 = vsel %vm427_vm8, %v388_v61, 0 }
 0x11f   :  { %v7500_v4 = vand.u32 4294901760, %v5698_v3  ;;  %v5706_v49 = vand.u32 4294901760, %v456_v5  ;;  %v664_v10 = vand.u32 4294901760, %v663_v62 }
 0x121   :  { %v5709_v12 = vsub.f32 %v456_v5, %v5706_v49  ;;  %4747 = vmatmul.mubr.f32.gmra.mxu0 %v664_v10  ;;  %4800 = vmatmul.mubr.f32.gmra.mxu1 %v5706_v49  ;;  %v389_v20 = vpop.trf.xlu0  ;;  %v673_v18 = vsub.f32 %v5698_v3, %v7500_v4 }
 0x122   :  { %v459_v22 = vsel %vm427_vm8, %v389_v20, 0 }
 0x123   :  { %v7499_v23 = vand.u32 4294901760, %v5709_v12  ;;  %v5717_v25 = vand.u32 4294901760, %v459_v22  ;;  %v674_v29 = vand.u32 4294901760, %v673_v18 }
 0x125   :  { %v5720_v31 = vsub.f32 %v459_v22, %v5717_v25  ;;  %4749 = vmatprep.mubr.f32.mxu0 %v674_v29  ;;  %4802 = vmatprep.mubr.f32.mxu1 %v5717_v25  ;;  %v390_v33 = vpop.trf.xlu0  ;;  %v683_v40 = vsub.f32 %v5709_v12, %v7499_v23 }
 0x126   :  { %v462_v32 = vsel %vm427_vm8, %v390_v33, 0 }
 0x127   :  { %v7497_v42 = vand.u32 4294901760, %v5720_v31  ;;  %v5728_v30 = vand.u32 4294901760, %v462_v32  ;;  %v684_v15 = vand.u32 4294901760, %v683_v40 }
 0x129   :  { %v5731_v28 = vsub.f32 %v462_v32, %v5728_v30  ;;  %4750 = vmatmul.mubr.f32.gmra.mxu0 %v684_v15  ;;  %4803 = vmatmul.mubr.f32.gmra.mxu1 %v5728_v30  ;;  %v391_v43 = vpop.trf.xlu0  ;;  %v693_v45 = vsub.f32 %v5720_v31, %v7497_v42 }
 0x12a   :  { %v465_v35 = vsel %vm427_vm8, %v391_v43, 0 }
 0x12b   :  { %v7496_v16 = vand.u32 4294901760, %v5731_v28  ;;  %v5739_v51 = vand.u32 4294901760, %v465_v35  ;;  %v694_v52 = vand.u32 4294901760, %v693_v45 }
 0x12d   :  { %v5742_v55 = vsub.f32 %v465_v35, %v5739_v51  ;;  %4752 = vmatprep.mubr.f32.mxu0 %v694_v52  ;;  %4805 = vmatprep.mubr.f32.mxu1 %v5739_v51  ;;  %v392_v57 = vpop.trf.xlu0  ;;  %v703_v58 = vsub.f32 %v5731_v28, %v7496_v16 }
 0x12e   :  { %v468_v6 = vsel %vm427_vm8, %v392_v57, 0 }
 0x12f   :  { %v7494_v17 = vand.u32 4294901760, %v5742_v55  ;;  %v5750_v61 = vand.u32 4294901760, %v468_v6  ;;  %v704_v62 = vand.u32 4294901760, %v703_v58 }
 0x131   :  { %v5753_v5 = vsub.f32 %v468_v6, %v5750_v61  ;;  %4753 = vmatmul.mubr.f32.gmra.mxu0 %v704_v62  ;;  %4806 = vmatmul.mubr.f32.gmra.mxu1 %v5750_v61  ;;  %v393_v10 = vpop.trf.xlu0  ;;  %v713_v20 = vsub.f32 %v5742_v55, %v7494_v17 }
 0x132   :  { %v471_v18 = vsel %vm427_vm8, %v393_v10, 0 }
 0x133   :  { %v7493_v22 = vand.u32 4294901760, %v5753_v5  ;;  %v5761_v29 = vand.u32 4294901760, %v471_v18  ;;  %v714_v33 = vand.u32 4294901760, %v713_v20 }
 0x135   :  { %v5764_v40 = vsub.f32 %v471_v18, %v5761_v29  ;;  %4755 = vmatprep.mubr.f32.mxu0 %v714_v33  ;;  %4808 = vmatprep.mubr.f32.mxu1 %v5761_v29  ;;  %v394_v32 = vpop.trf.xlu0  ;;  %v723_v15 = vsub.f32 %v5753_v5, %v7493_v22 }
 0x136   :  { %v474_v43 = vsel %vm427_vm8, %v394_v32, 0 }
 0x137   :  { %v7491_v45 = vand.u32 4294901760, %v5764_v40  ;;  %v5772_v35 = vand.u32 4294901760, %v474_v43  ;;  %v724_v52 = vand.u32 4294901760, %v723_v15 }
 0x139   :  { %v5775_v57 = vsub.f32 %v474_v43, %v5772_v35  ;;  %4756 = vmatmul.mubr.f32.gmra.mxu0 %v724_v52  ;;  %4809 = vmatmul.mubr.f32.gmra.mxu1 %v5772_v35  ;;  %v411_v58 = vpop.trf.xlu0  ;;  %v733_v6 = vsub.f32 %v5764_v40, %v7491_v45 }
 0x13a   :  { %v477_v62 = vsel %vm427_vm8, %v411_v58, 0 }
 0x13b   :  { %v7492_v10 = vand.u32 4294901760, %v5775_v57  ;;  %v5783_v20 = vand.u32 4294901760, %v477_v62  ;;  %v734_v18 = vand.u32 4294901760, %v733_v6 }
 0x13d   :  { %7644 = vst [vmem:[#allocation8_spill] sm:$0xff] %v5783_v20  ;;  %v5786_v33 = vsub.f32 %v477_v62, %v5783_v20  ;;  %4758 = vmatprep.mubr.f32.mxu0 %v734_v18  ;;  %4811 = vmatprep.mubr.f32.mxu1 %v5783_v20  ;;  %v412_v32 = vpop.trf.xlu0  ;;  %v743_v15 = vsub.f32 %v5775_v57, %v7492_v10 }
 0x13e   :  { %v480_v43 = vsel %vm427_vm8, %v412_v32, 0 }
 0x13f   :  { %v7495_v52 = vand.u32 4294901760, %v5786_v33  ;;  %v5794_v58 = vand.u32 4294901760, %v480_v43  ;;  %v744_v45 = vand.u32 4294901760, %v743_v15  ;;  %v328_v15 = vadd.s32 4, %v5441_v1 }
 0x141   :  { %7645 = vst [vmem:[#allocation9_spill] sm:$0xff] %v5794_v58  ;;  %v5797_v6 = vsub.f32 %v480_v43, %v5794_v58  ;;  %4759 = vmatmul.mubr.f32.gmra.mxu0 %v744_v45  ;;  %4812 = vmatmul.mubr.f32.gmra.mxu1 %v5794_v58  ;;  %v413_v62 = vpop.trf.xlu0  ;;  %v753_v18 = vsub.f32 %v5786_v33, %v7495_v52 }
 0x142   :  { %v483_v10 = vsel %vm427_vm8, %v413_v62, 0  ;;  %vm329_vm11 = vcmp.eq.s32.totalorder %v5552_v14, %v328_v15  ;;  %v4328_v15 = vsel %vm324_vm10, 1.0, %v5410_v11 }
 0x143   :  { %v7498_v32 = vand.u32 4294901760, %v5797_v6  ;;  %v5805_v22 = vand.u32 4294901760, %v483_v10  ;;  %v754_v17 = vand.u32 4294901760, %v753_v18  ;;  %v333_v18 = vadd.s32 8, %v5441_v1 }
 0x144   :  { %v4329_v23 = vsel %vm329_vm11, 1.0, %v5410_v11 }
 0x145   :  { %7646 = vst [vmem:[#allocation10_spill] sm:$0xff] %v5805_v22  ;;  %v5809_v43 = vsub.f32 %v483_v10, %v5805_v22  ;;  %4761 = vmatprep.mubr.f32.mxu0 %v754_v17  ;;  %4814 = vmatprep.mubr.f32.mxu1 %v5805_v22  ;;  %v414_v45 = vpop.trf.xlu0  ;;  %v763_v52 = vsub.f32 %v5797_v6, %v7498_v32 }
 0x146   :  { %v486_v62 = vsel %vm427_vm8, %v414_v45, 0  ;;  %vm334_vm13 = vcmp.eq.s32.totalorder %v5552_v14, %v333_v18  ;;  %v332_v53 = vadd.f32 %v4329_v23, %v4328_v15 }
 0x147   :  { %v7504_v10 = vand.u32 4294901760, %v5809_v43  ;;  %v5821_v16 = vand.u32 4294901760, %v486_v62  ;;  %v764_v17 = vand.u32 4294901760, %v763_v52  ;;  %v338_v52 = vadd.s32 12, %v5441_v1 }
 0x148   :  { %v4330_v18 = vsel %vm334_vm13, 1.0, %v5410_v11 }
 0x149   :  { %7647 = vst [vmem:[#allocation11_spill] sm:$0xff] %v5821_v16  ;;  %v5824_v42 = vsub.f32 %v486_v62, %v5821_v16  ;;  %4762 = vmatmul.mubr.f32.gmra.mxu0 %v764_v17  ;;  %4815 = vmatmul.mubr.f32.gmra.mxu1 %v5821_v16  ;;  %v415_v32 = vpop.trf.xlu0  ;;  %v773_v45 = vsub.f32 %v5809_v43, %v7504_v10 }
 0x14a   :  { %v489_v4 = vsel %vm427_vm8, %v415_v32, 0  ;;  %vm339_vm14 = vcmp.eq.s32.totalorder %v5552_v14, %v338_v52  ;;  %v337_v15 = vadd.f32 %v4330_v18, %v332_v53 }
 0x14b   :  { %v7507_v62 = vand.u32 4294901760, %v5824_v42  ;;  %v5836_v17 = vand.u32 4294901760, %v489_v4  ;;  %v774_v59 = vand.u32 4294901760, %v773_v45  ;;  %v343_v45 = vadd.s32 16, %v5441_v1 }
 0x14c   :  { %v4331_v52 = vsel %vm339_vm14, 1.0, %v5410_v11 }
 0x14d   :  { %7648 = vst [vmem:[#allocation12_spill] sm:$0xff] %v5836_v17  ;;  %v5839_v36 = vsub.f32 %v489_v4, %v5836_v17  ;;  %4764 = vmatprep.mubr.f32.mxu0 %v774_v59  ;;  %4817 = vmatprep.mubr.f32.mxu1 %v5836_v17  ;;  %v416_v10 = vpop.trf.xlu0  ;;  %v783_v32 = vsub.f32 %v5824_v42, %v7507_v62 }
 0x14e   :  { %v492_v44 = vsel %vm427_vm8, %v416_v10, 0  ;;  %vm344_vm15 = vcmp.eq.s32.totalorder %v5552_v14, %v343_v45 }
 0x14f   :  { %v7510_v23 = vand.u32 4294901760, %v5839_v36  ;;  %v5850_v4 = vand.u32 4294901760, %v492_v44  ;;  %v784_v59 = vand.u32 4294901760, %v783_v32  ;;  %v348_v32 = vadd.s32 20, %v5441_v1 }
 0x150   :  { %v4332_v45 = vsel %vm344_vm15, 1.0, %v5410_v11 }
 0x151   :  { %7649 = vst [vmem:[#allocation13_spill] sm:$0xff] %v5850_v4  ;;  %v5853_v38 = vsub.f32 %v492_v44, %v5850_v4  ;;  %4765 = vmatmul.mubr.f32.gmra.mxu0 %v784_v59  ;;  %4818 = vmatmul.mubr.f32.gmra.mxu1 %v5850_v4  ;;  %v417_v62 = vpop.trf.xlu0  ;;  %v793_v10 = vsub.f32 %v5839_v36, %v7510_v23 }
 0x152   :  { %v495_v50 = vsel %vm427_vm8, %v417_v62, 0  ;;  %v342_v59 = vadd.f32 %v4331_v52, %v337_v15  ;;  %vm349_vm0 = vcmp.eq.s32.totalorder %v5552_v14, %v348_v32 }
 0x153   :  { %v7513_v53 = vand.u32 4294901760, %v5853_v38  ;;  %v5864_v44 = vand.u32 4294901760, %v495_v50  ;;  %v794_v18 = vand.u32 4294901760, %v793_v10  ;;  %v353_v10 = vadd.s32 24, %v5441_v1 }
 0x154   :  { %v4333_v32 = vsel %vm349_vm0, 1.0, %v5410_v11 }
 0x155   :  { %7650 = vst [vmem:[#allocation14_spill] sm:$0xff] %v5864_v44  ;;  %v5867_v0 = vsub.f32 %v495_v50, %v5864_v44  ;;  %4767 = vmatprep.mubr.f32.mxu0 %v794_v18  ;;  %4820 = vmatprep.mubr.f32.mxu1 %v5864_v44  ;;  %v418_v23 = vpop.trf.xlu0  ;;  %v803_v62 = vsub.f32 %v5853_v38, %v7513_v53 }
 0x156   :  { %v498_v19 = vsel %vm427_vm8, %v418_v23, 0  ;;  %v347_v18 = vadd.f32 %v4332_v45, %v342_v59  ;;  %vm354_vm1 = vcmp.eq.s32.totalorder %v5552_v14, %v353_v10 }
 0x157   :  { %v7518_v15 = vand.u32 4294901760, %v5867_v0  ;;  %v5878_v50 = vand.u32 4294901760, %v498_v19  ;;  %v804_v52 = vand.u32 4294901760, %v803_v62  ;;  %v358_v62 = vadd.s32 28, %v5441_v1 }
 0x158   :  { %v4334_v10 = vsel %vm354_vm1, 1.0, %v5410_v11 }
 0x159   :  { %7651 = vst [vmem:[#allocation15_spill] sm:$0xff] %v5878_v50  ;;  %v5881_v8 = vsub.f32 %v498_v19, %v5878_v50  ;;  %4768 = vmatmul.mubr.f32.gmra.mxu0 %v804_v52  ;;  %4821 = vmatmul.mubr.f32.gmra.mxu1 %v5878_v50  ;;  %v419_v53 = vpop.trf.xlu0  ;;  %v813_v23 = vsub.f32 %v5867_v0, %v7518_v15 }
 0x15a   :  { %v501_v44 = vsel %vm427_vm8, %v419_v53, 0  ;;  %v352_v52 = vadd.f32 %v4333_v32, %v347_v18  ;;  %vm359_vm2 = vcmp.eq.s32.totalorder %v5552_v14, %v358_v62 }
 0x15b   :  { %v7521_v59 = vand.u32 4294901760, %v5881_v8  ;;  %v5892_v19 = vand.u32 4294901760, %v501_v44  ;;  %v814_v45 = vand.u32 4294901760, %v813_v23 }
 0x15c   :  { %v357_v32 = vadd.f32 %v4334_v10, %v352_v52 }
 0x15d   :  { %7652 = vst [vmem:[#allocation16_spill] sm:$0xff] %v5892_v19  ;;  %v5895_v50 = vsub.f32 %v501_v44, %v5892_v19  ;;  %4770 = vmatprep.mubr.f32.mxu0 %v814_v45  ;;  %4823 = vmatprep.mubr.f32.mxu1 %v5892_v19  ;;  %v420_v15 = vpop.trf.xlu0  ;;  %v823_v53 = vsub.f32 %v5881_v8, %v7521_v59 }
 0x15e   :  { %v504_v1 = vsel %vm427_vm8, %v420_v15, 0  ;;  %v4335_v15 = vsel %vm359_vm2, 1.0, %v5410_v11 }
 0x15f   :  { %v7524_v23 = vand.u32 4294901760, %v5895_v50  ;;  %v5905_v18 = vand.u32 4294901760, %v504_v1  ;;  %v824_v44 = vand.u32 4294901760, %v823_v53  ;;  %v362_v53 = vadd.f32 %v4335_v15, %v357_v32 }
 0x161   :  { %7653 = vst [vmem:[#allocation17_spill] sm:$0xff] %v5905_v18  ;;  %v5908_v45 = vsub.f32 %v504_v1, %v5905_v18  ;;  %4771 = vmatmul.mubr.f32.gmra.mxu0 %v824_v44  ;;  %4824 = vmatmul.mubr.f32.gmra.mxu1 %v5905_v18  ;;  %v421_v19 = vpop.trf.xlu0  ;;  %v833_v59 = vsub.f32 %v5895_v50, %v7524_v23  ;;  %v2466_v32 = vsel %vm2464_vm3, %v362_v53, 0 }
 0x162   :  { %v507_v14 = vsel %vm427_vm8, %v421_v19, 0 }
 0x163   :  { %v7525_v62 = vand.u32 4294901760, %v5908_v45  ;;  %v5917_v4 = vand.u32 4294901760, %v507_v14  ;;  %v834_v52 = vand.u32 4294901760, %v833_v59 }
 0x165   :  { %7654 = vst [vmem:[#allocation18_spill] sm:$0xff] %v5917_v4  ;;  %v5920_v10 = vsub.f32 %v507_v14, %v5917_v4  ;;  %4773 = vmatprep.mubr.f32.mxu0 %v834_v52  ;;  %4826 = vmatprep.mubr.f32.mxu1 %v5917_v4  ;;  %v422_v1 = vpop.trf.xlu0  ;;  %v843_v44 = vsub.f32 %v5908_v45, %v7525_v62 }
 0x166   :  { %v510_v11 = vsel %vm427_vm8, %v422_v1, 0 }
 0x167   :  { %v7530_v19 = vand.u32 4294901760, %v5920_v10  ;;  %v5928_v23 = vand.u32 4294901760, %v510_v11  ;;  %v844_v59 = vand.u32 4294901760, %v843_v44  ;;  %v5941_v44 = vand.u32 4294901760, %v2466_v32 }
 0x169   :  { %7655 = vst [vmem:[#allocation19_spill] sm:$0xff] %v5928_v23  ;;  %v5931_v15 = vsub.f32 %v510_v11, %v5928_v23  ;;  %4774 = vmatmul.mubr.f32.gmra.mxu0 %v844_v59  ;;  %4827 = vmatmul.mubr.f32.gmra.mxu1 %v5928_v23  ;;  %v423_v14 = vpop.trf.xlu0  ;;  %v853_v52 = vsub.f32 %v5920_v10, %v7530_v19  ;;  %v5951_v19 = vpop.trf.xlu1 }
 0x16a   :  { %v513_v62 = vsel %vm427_vm8, %v423_v14, 0  ;;  %7657 = vst [vmem:[#allocation21_spill] sm:$0xff] %v5951_v19 }
 0x16b   :  { %v7537_v1 = vand.u32 4294901760, %v5931_v15  ;;  %v5939_v4 = vand.u32 4294901760, %v513_v62  ;;  %v854_v18 = vand.u32 4294901760, %v853_v52 }
 0x16d   :  { %7656 = vst [vmem:[#allocation20_spill] sm:$0xff] %v5939_v4  ;;  %v5944_v53 = vsub.f32 %v513_v62, %v5939_v4  ;;  %4776 = vmatprep.mubr.f32.mxu0 %v854_v18  ;;  %4829 = vmatprep.mubr.f32.mxu1 %v5939_v4  ;;  %v424_v11 = vpop.trf.xlu0  ;;  %v863_v59 = vsub.f32 %v5931_v15, %v7537_v1 }
 0x16e   :  { %v516_v14 = vsel %vm427_vm8, %v424_v11, 0  ;;  %v5957_v62 = vsub.f32 %v2466_v32, %v5941_v44 }
 0x16f   :  { %v7542_v23 = vand.u32 4294901760, %v5944_v53  ;;  %v5954_v52 = vand.u32 4294901760, %v516_v14  ;;  %v864_v17 = vand.u32 4294901760, %v863_v59 }
 0x170   :  { %v5971_v32 = vand.u32 4294901760, %v5957_v62 }
 0x171   :  { %7658 = vst [vmem:[#allocation22_spill] sm:$0xff] %v5954_v52  ;;  %v5960_v18 = vsub.f32 %v516_v14, %v5954_v52  ;;  %4777 = vmatmul.mubr.f32.gmra.mxu0 %v864_v17  ;;  %4830 = vmatmul.mubr.f32.gmra.mxu1 %v5954_v52  ;;  %v425_v4 = vpop.trf.xlu0  ;;  %v873_v11 = vsub.f32 %v5944_v53, %v7542_v23  ;;  %v5973_v14 = vpop.trf.xlu1 }
 0x172   :  { %v519_v1 = vsel %vm427_vm8, %v425_v4, 0  ;;  %7660 = vst [vmem:[#allocation24_spill] sm:$0xff] %v5971_v32  ;;  %7661 = vst [vmem:[#allocation25_spill] sm:$0xff] %v5973_v14  ;;  %v2888_v14 = vsub.f32 %v5957_v62, %v5971_v32  ;;  %v7665_v32 = vmov 1.0  }
 0x173   :  { %v7547_v19 = vand.u32 4294901760, %v5960_v18  ;;  %v5968_v16 = vand.u32 4294901760, %v519_v1  ;;  %v874_v59 = vand.u32 4294901760, %v873_v11 }
 0x174   :  { %v6000_v20 = vand.u32 4294901760, %v2888_v14 }
 0x175   :  { %7659 = vst [vmem:[#allocation23_spill] sm:$0xff] %v5968_v16  ;;  %v5976_v17 = vsub.f32 %v519_v1, %v5968_v16  ;;  %4779 = vmatprep.mubr.f32.mxu0 %v874_v59  ;;  %4832 = vmatprep.mubr.f32.mxu1 %v5968_v16  ;;  %v426_v52 = vpop.trf.xlu0  ;;  %v883_v4 = vsub.f32 %v5960_v18, %v7547_v19  ;;  %v5997_v19 = vpop.trf.xlu1 }
 0x176   :  { %v522_v23 = vsel %vm427_vm8, %v426_v52, 0  ;;  %v7662_v52 = vand.u32 4294901760, %v5605_v2 }
 0x177   :  { %v7552_v11 = vand.u32 4294901760, %v5976_v17  ;;  %v5984_v22 = vand.u32 4294901760, %v522_v23  ;;  %v884_v58 = vand.u32 4294901760, %v883_v4 }
 0x179   :  { %v5989_v1 = vsub.f32 %v522_v23, %v5984_v22  ;;  %4780 = vmatmul.mubr.f32.gmra.mxu0 %v884_v58  ;;  %4833 = vmatmul.mubr.f32.gmra.mxu1 %v5984_v22  ;;  %v893_v59 = vsub.f32 %v5976_v17, %v7552_v11  ;;  %v7663_v23 = vand.u32 4294901760, %v5613_v9  ;;  %v7664_v11 = vand.u32 4294901760, %v5630_v21  ;;  %v6013_v14 = vpop.trf.xlu1 }
 0x17a   :  { %4887 = vmatprep.mubr.f32.mxu1 %v7662_v52 }
 0x17b   :  { %v902_v4 = vand.u32 4294901760, %v5989_v1  ;;  %v894_v16 = vand.u32 4294901760, %v893_v59  ;;  %v7667_v59 = vand.u32 4294901760, %v5654_v41 }
 0x17d   :  { %4782 = vmatprep.mubr.f32.mxu0 %v894_v16  ;;  %4888 = vmatmul.mubr.f32.vlgmr.msra.gmra.mxu1 %v7663_v23  ;;  %v903_v58 = vsub.f32 %v5989_v1, %v902_v4  ;;  %v7666_v16 = vand.u32 4294901760, %v5641_v26  ;;  %v6025_v24 = vpop.trf.xlu1  ;;  %v7673_v23 = vand.u32 4294901760, %v5720_v31 }
 0x17e   :  { %4890 = vmatprep.mubr.f32.mxu1 %v7664_v11  ;;  %4986 = vmatpush3.msk.msra.mxu1 %vm5560_vm12, %v7665_v32  ;;  %v7668_v11 = vand.u32 4294901760, %v5665_v27  ;;  %v7669_v32 = vand.u32 4294901760, %v5676_v48  ;;  %vm2367_vm12 = vcmask 31744  }
 0x17f   :  { %v904_v52 = vand.u32 4294901760, %v903_v58  ;;  %5085 = vmatprep.subr.mxu1 %v6000_v20 }
 0x181   :  { %4783 = vmatmul.mubr.f32.gmra.mxu0 %v904_v52  ;;  %4891 = vmatmul.mubr.f32.gmra.mxu1 %v7666_v16  ;;  %v7679_v52 = vand.u32 4294901760, %v5786_v33 }
 0x182   :  { %4837 = vmatprep.mubr.f32.mxu0 %v5605_v2  ;;  %4893 = vmatprep.mubr.f32.mxu1 %v7667_v59  ;;  %v7670_v2 = vand.u32 4294901760, %v5687_v56  ;;  %v7685_v59 = vand.u32 4294901760, %v5867_v0 }
 0x185   :  { %4838 = vmatmul.mubr.f32.vlgmr.msra.gmra.mxu0 %v5613_v9  ;;  %4894 = vmatmul.mubr.f32.gmra.mxu1 %v7668_v11  ;;  %v7671_v9 = vand.u32 4294901760, %v5698_v3 }
 0x186   :  { %4936 = vmatpush3.msra.mxu0 %v5571_v34  ;;  %4840 = vmatprep.mubr.f32.mxu0 %v5630_v21  ;;  %v6036_v34 = vpop.trf.xlu1  ;;  %v7672_v21 = vand.u32 4294901760, %v5709_v12 }
 0x187   :  { %4896 = vmatprep.mubr.f32.mxu1 %v7669_v32  ;;  %5035 = vmatprep.subr.mxu0 %v5941_v44  ;;  %v7691_v32 = vand.u32 4294901760, %v5944_v53 }
 0x189   :  { %4841 = vmatmul.mubr.f32.gmra.mxu0 %v5641_v26  ;;  %4897 = vmatmul.mubr.f32.gmra.mxu1 %v7670_v2  ;;  %v7674_v26 = vand.u32 4294901760, %v5731_v28 }
 0x18a   :  { %4843 = vmatprep.mubr.f32.mxu0 %v5654_v41  ;;  %4899 = vmatprep.mubr.f32.mxu1 %v7671_v9  ;;  %v7675_v41 = vand.u32 4294901760, %v5742_v55  ;;  %v6050_v58 = vpop.trf.xlu1 }
 0x18d   :  { %4844 = vmatmul.mubr.f32.gmra.mxu0 %v5665_v27  ;;  %4900 = vmatmul.mubr.f32.gmra.mxu1 %v7672_v21  ;;  %v7676_v27 = vand.u32 4294901760, %v5753_v5 }
 0x18e   :  { %4846 = vmatprep.mubr.f32.mxu0 %v5676_v48  ;;  %4902 = vmatprep.mubr.f32.mxu1 %v7673_v23  ;;  %v7677_v48 = vand.u32 4294901760, %v5764_v40 }
 0x191   :  { %4847 = vmatmul.mubr.f32.gmra.mxu0 %v5687_v56  ;;  %4903 = vmatmul.mubr.f32.gmra.mxu1 %v7674_v26  ;;  %v6058_v56 = vpop.trf.xlu1  ;;  %v7697_v26 = vld [vmem:[#allocation11_spill] sm:$0xff] }
 0x192   :  { %4849 = vmatprep.mubr.f32.mxu0 %v5698_v3  ;;  %4905 = vmatprep.mubr.f32.mxu1 %v7675_v41  ;;  %v7678_v3 = vand.u32 4294901760, %v5775_v57 }
 0x195   :  { %4850 = vmatmul.mubr.f32.gmra.mxu0 %v5709_v12  ;;  %4906 = vmatmul.mubr.f32.gmra.mxu1 %v7676_v27  ;;  %v7680_v12 = vand.u32 4294901760, %v5797_v6  ;;  %v6072_v16 = vpop.trf.xlu1  ;;  %v7700_v27 = vld [vmem:[#allocation14_spill] sm:$0xff] }
 0x196   :  { %4852 = vmatprep.mubr.f32.mxu0 %v5720_v31  ;;  %4908 = vmatprep.mubr.f32.mxu1 %v7677_v48  ;;  %v7681_v31 = vand.u32 4294901760, %v5809_v43 }
 0x199   :  { %4853 = vmatmul.mubr.f32.gmra.mxu0 %v5731_v28  ;;  %4909 = vmatmul.mubr.f32.gmra.mxu1 %v7678_v3  ;;  %v7682_v28 = vand.u32 4294901760, %v5824_v42 }
 0x19a   :  { %4855 = vmatprep.mubr.f32.mxu0 %v5742_v55  ;;  %4911 = vmatprep.mubr.f32.mxu1 %v7679_v52  ;;  %v7683_v55 = vand.u32 4294901760, %v5839_v36 }
 0x19d   :  { %4856 = vmatmul.mubr.f32.gmra.mxu0 %v5753_v5  ;;  %4912 = vmatmul.mubr.f32.gmra.mxu1 %v7680_v12  ;;  %v6080_v5 = vpop.trf.xlu1 }
 0x19e   :  { %4858 = vmatprep.mubr.f32.mxu0 %v5764_v40  ;;  %4914 = vmatprep.mubr.f32.mxu1 %v7681_v31  ;;  %v7684_v40 = vand.u32 4294901760, %v5853_v38  ;;  %v7701_v31 = vld [vmem:[#allocation15_spill] sm:$0xff] }
 0x1a1   :  { %4859 = vmatmul.mubr.f32.gmra.mxu0 %v5775_v57  ;;  %4915 = vmatmul.mubr.f32.gmra.mxu1 %v7682_v28  ;;  %v7686_v57 = vand.u32 4294901760, %v5881_v8  ;;  %v6094_v11 = vpop.trf.xlu1 }
 0x1a2   :  { %4861 = vmatprep.mubr.f32.mxu0 %v5786_v33  ;;  %4917 = vmatprep.mubr.f32.mxu1 %v7683_v55  ;;  %v7687_v33 = vand.u32 4294901760, %v5895_v50  ;;  %v7703_v55 = vld [vmem:[#allocation16_spill] sm:$0xff] }
 0x1a5   :  { %4862 = vmatmul.mubr.f32.gmra.mxu0 %v5797_v6  ;;  %4918 = vmatmul.mubr.f32.gmra.mxu1 %v7684_v40  ;;  %v7688_v6 = vand.u32 4294901760, %v5908_v45 }
 0x1a6   :  { %4864 = vmatprep.mubr.f32.mxu0 %v5809_v43  ;;  %4920 = vmatprep.mubr.f32.mxu1 %v7685_v59  ;;  %v7689_v43 = vand.u32 4294901760, %v5920_v10  ;;  %v7704_v59 = vld [vmem:[#allocation21_spill] sm:$0xff] }
 0x1a9   :  { %4865 = vmatmul.mubr.f32.gmra.mxu0 %v5824_v42  ;;  %4921 = vmatmul.mubr.f32.gmra.mxu1 %v7686_v57  ;;  %v6102_v42 = vpop.trf.xlu1  ;;  %v2369_v57 = vsel %vm2367_vm12, %v7704_v59, 0 }
 0x1aa   :  { %4867 = vmatprep.mubr.f32.mxu0 %v5839_v36  ;;  %4923 = vmatprep.mubr.f32.mxu1 %v7687_v33  ;;  %v7690_v36 = vand.u32 4294901760, %v5931_v15  ;;  %v7705_v33 = vld [vmem:[#allocation17_spill] sm:$0xff] }
 0x1ad   :  { %4868 = vmatmul.mubr.f32.gmra.mxu0 %v5853_v38  ;;  %4924 = vmatmul.mubr.f32.gmra.mxu1 %v7688_v6  ;;  %v7692_v38 = vand.u32 4294901760, %v5960_v18  ;;  %v6116_v2 = vpop.trf.xlu1  ;;  %v7706_v6 = vld [vmem:[#allocation25_spill] sm:$0xff] }
 0x1ae   :  { %4870 = vmatprep.mubr.f32.mxu0 %v5867_v0  ;;  %4926 = vmatprep.mubr.f32.mxu1 %v7689_v43  ;;  %v7693_v0 = vand.u32 4294901760, %v5976_v17  ;;  %v2372_v43 = vsel %vm2367_vm12, %v7706_v6, 0 }
 0x1b1   :  { %4871 = vmatmul.mubr.f32.gmra.mxu0 %v5881_v8  ;;  %4927 = vmatmul.mubr.f32.gmra.mxu1 %v7690_v36  ;;  %v6123_v8 = vpop.trf.xlu1  ;;  %v7707_v36 = vld [vmem:[#allocation18_spill] sm:$0xff] }
 0x1b2   :  { %4873 = vmatprep.mubr.f32.mxu0 %v5895_v50  ;;  %4929 = vmatprep.mubr.f32.mxu1 %v7691_v32 }
 0x1b5   :  { %4874 = vmatmul.mubr.f32.gmra.mxu0 %v5908_v45  ;;  %4930 = vmatmul.mubr.f32.gmra.mxu1 %v7692_v38  ;;  %v6135_v50 = vpop.trf.xlu1 }
 0x1b6   :  { %4876 = vmatprep.mubr.f32.mxu0 %v5920_v10  ;;  %4932 = vmatprep.mubr.f32.mxu1 %v7693_v0  ;;  %v6231_v0 = vand.u32 4294901760, %v2369_v57 }
 0x1b9   :  { %4877 = vmatmul.mubr.f32.gmra.mxu0 %v5931_v15  ;;  %4933 = vmatmul.mubr.f32.gmra.mxu1 %v902_v4  ;;  %v7696_v4 = vld [vmem:[#allocation10_spill] sm:$0xff] }
 0x1ba   :  { %4879 = vmatprep.mubr.f32.mxu0 %v5944_v53  ;;  %4987 = vmatprep.mubr.f32.mxu1 %v5602_v63 }
 0x1bd   :  { %4880 = vmatmul.mubr.f32.gmra.mxu0 %v5960_v18  ;;  %4988 = vmatmul.mubr.f32.vlgmr.msra.gmra.mxu1 %v5609_v7 }
 0x1be   :  { %4882 = vmatprep.mubr.f32.mxu0 %v5976_v17  ;;  %4990 = vmatprep.mubr.f32.mxu1 %v5624_v13 }
 0x1bf   :  { %5086 = vmatpush3.msra.mxu1 %v6000_v20  ;;  %v6143_v20 = vpop.trf.xlu1 }
 0x1c0   :  { %5185 = vmatprep.subr.mxu1 %v5941_v44 }
 0x1c1   :  { %4883 = vmatmul.mubr.f32.gmra.mxu0 %v5989_v1  ;;  %4991 = vmatmul.mubr.f32.gmra.mxu1 %v5638_v37  ;;  %v4789_v45 = vpop.f32.mrf.mxu1 }
 0x1c2   :  { %4937 = vmatprep.mubr.f32.mxu0 %v5602_v63  ;;  %4993 = vmatprep.mubr.f32.mxu1 %v5650_v39 }
 0x1c5   :  { %4938 = vmatmul.mubr.f32.vlgmr.msra.gmra.mxu0 %v5609_v7  ;;  %4994 = vmatmul.mubr.f32.gmra.mxu1 %v5662_v46  ;;  %v6155_v7 = vpop.trf.xlu1 }
 0x1c6   :  { %5036 = vmatpush3.msra.mxu0 %v5941_v44  ;;  %4940 = vmatprep.mubr.f32.mxu0 %v5624_v13  ;;  %v6157_v13 = vpop.f32.mrf.mxu1 }
 0x1c7   :  { %4996 = vmatprep.mubr.f32.mxu1 %v5673_v47  ;;  %5135 = vmatprep.subr.mxu0 %v5957_v62 }
 0x1c9   :  { %v4739_v63 = vpop.f32.mrf.mxu0  ;;  %4941 = vmatmul.mubr.f32.gmra.mxu0 %v5638_v37  ;;  %4997 = vmatmul.mubr.f32.gmra.mxu1 %v5684_v54  ;;  %v4792_v15 = vpop.f32.mrf.mxu1 }
 0x1ca   :  { %v6147_v10 = vadd.f32 %v4789_v45, %v4739_v63  ;;  %4943 = vmatprep.mubr.f32.mxu0 %v5650_v39  ;;  %4999 = vmatprep.mubr.f32.mxu1 %v5695_v60  ;;  %v2375_v45 = vsel %vm2367_vm12, %v5997_v19, 0  ;;  %v6235_v63 = vand.u32 4294901760, %v2372_v43  ;;  %v2378_v19 = vsel %vm2367_vm12, %v6013_v14, 0  ;;  %v7716_v14 = vld [vmem:[#allocation23_spill] sm:$0xff] }
 0x1cb   :  { %v6159_v37 = vpop.f32.mrf.mxu0 }
 0x1cc   :  { %7709 = vst [vmem:[#allocation10_spill] sm:$0xff] %v6235_v63 }
 0x1cd   :  { %4944 = vmatmul.mubr.f32.gmra.mxu0 %v5662_v46  ;;  %5000 = vmatmul.mubr.f32.gmra.mxu1 %v5706_v49  ;;  %v6167_v46 = vpop.trf.xlu1 }
 0x1ce   :  { %4946 = vmatprep.mubr.f32.mxu0 %v5673_v47  ;;  %5002 = vmatprep.mubr.f32.mxu1 %v5717_v25  ;;  %v6173_v47 = vpop.f32.mrf.mxu1 }
 0x1d1   :  { %v4742_v53 = vpop.f32.mrf.mxu0  ;;  %4947 = vmatmul.mubr.f32.gmra.mxu0 %v5684_v54  ;;  %5003 = vmatmul.mubr.f32.gmra.mxu1 %v5728_v30  ;;  %v4795_v18 = vpop.f32.mrf.mxu1 }
 0x1d2   :  { %v6163_v39 = vadd.f32 %v4792_v15, %v4742_v53  ;;  %4949 = vmatprep.mubr.f32.mxu0 %v5695_v60  ;;  %5005 = vmatprep.mubr.f32.mxu1 %v5739_v51  ;;  %v6183_v1 = vpop.trf.xlu1 }
 0x1d3   :  { %v6175_v54 = vpop.f32.mrf.mxu0  ;;  %v6189_v9 = vpop.f32.mrf.mxu1 }
 0x1d5   :  { %4950 = vmatmul.mubr.f32.gmra.mxu0 %v5706_v49  ;;  %5006 = vmatmul.mubr.f32.gmra.mxu1 %v5750_v61  ;;  %v7694_v49 = vld [vmem:[#allocation8_spill] sm:$0xff] }
 0x1d6   :  { %4952 = vmatprep.mubr.f32.mxu0 %v5717_v25  ;;  %5008 = vmatprep.mubr.f32.mxu1 %v5761_v29  ;;  %v7695_v25 = vld [vmem:[#allocation9_spill] sm:$0xff]  ;;  %v6193_v21 = vpop.trf.xlu1 }
 0x1d7   :  { %7708 = vst [vmem:[#allocation9_spill] sm:$0xff] %v6231_v0 }
 0x1d9   :  { %v4745_v17 = vpop.f32.mrf.mxu0  ;;  %4953 = vmatmul.mubr.f32.gmra.mxu0 %v5728_v30  ;;  %5009 = vmatmul.mubr.f32.gmra.mxu1 %v5772_v35  ;;  %v4798_v23 = vpop.f32.mrf.mxu1 }
 0x1da   :  { %v6179_v60 = vadd.f32 %v4795_v18, %v4745_v17  ;;  %4955 = vmatprep.mubr.f32.mxu0 %v5739_v51  ;;  %5011 = vmatprep.mubr.f32.mxu1 %v7694_v49  ;;  %v6205_v48 = vpop.trf.xlu1  ;;  %v7710_v18 = vld [vmem:[#allocation19_spill] sm:$0xff] }
 0x1db   :  { %v6191_v30 = vpop.f32.mrf.mxu0  ;;  %v6207_v3 = vpop.f32.mrf.mxu1 }
 0x1dd   :  { %4956 = vmatmul.mubr.f32.gmra.mxu0 %v5750_v61  ;;  %5012 = vmatmul.mubr.f32.gmra.mxu1 %v7695_v25  ;;  %v7698_v61 = vld [vmem:[#allocation12_spill] sm:$0xff] }
 0x1de   :  { %4958 = vmatprep.mubr.f32.mxu0 %v5761_v29  ;;  %5014 = vmatprep.mubr.f32.mxu1 %v7696_v4  ;;  %v7699_v29 = vld [vmem:[#allocation13_spill] sm:$0xff]  ;;  %v6217_v40 = vpop.trf.xlu1 }
 0x1e1   :  { %v4748_v51 = vpop.f32.mrf.mxu0  ;;  %4959 = vmatmul.mubr.f32.gmra.mxu0 %v5772_v35  ;;  %5015 = vmatmul.mubr.f32.gmra.mxu1 %v7697_v26  ;;  %v4801_v52 = vpop.f32.mrf.mxu1 }
 0x1e2   :  { %v6197_v41 = vadd.f32 %v4798_v23, %v4748_v51  ;;  %4961 = vmatprep.mubr.f32.mxu0 %v7694_v49  ;;  %5017 = vmatprep.mubr.f32.mxu1 %v7698_v61  ;;  %v7712_v49 = vld [vmem:[#allocation20_spill] sm:$0xff]  ;;  %v6250_v23 = vsub.f32 %v2369_v57, %v6231_v0  ;;  %v6253_v51 = vsub.f32 %v2372_v43, %v6235_v63 }
 0x1e3   :  { %v6209_v35 = vpop.f32.mrf.mxu0  ;;  %v6227_v32 = vpop.f32.mrf.mxu1 }
 0x1e5   :  { %4962 = vmatmul.mubr.f32.gmra.mxu0 %v7695_v25  ;;  %5018 = vmatmul.mubr.f32.gmra.mxu1 %v7699_v29  ;;  %v6243_v25 = vpop.trf.xlu1 }
 0x1e6   :  { %4964 = vmatprep.mubr.f32.mxu0 %v7696_v4  ;;  %5020 = vmatprep.mubr.f32.mxu1 %v7700_v27  ;;  %v6245_v4 = vand.u32 4294901760, %v2375_v45 }
 0x1e8   :  { %7713 = vst [vmem:[#allocation12_spill] sm:$0xff] %v6245_v4 }
 0x1e9   :  { %v4751_v12 = vpop.f32.mrf.mxu0  ;;  %4965 = vmatmul.mubr.f32.gmra.mxu0 %v7697_v26  ;;  %5021 = vmatmul.mubr.f32.gmra.mxu1 %v7701_v31  ;;  %v4804_v15 = vpop.f32.mrf.mxu1  ;;  %v2381_v26 = vsel %vm2367_vm12, %v6025_v24, 0 }
 0x1ea   :  { %v6213_v28 = vadd.f32 %v4801_v52, %v4751_v12  ;;  %4967 = vmatprep.mubr.f32.mxu0 %v7698_v61  ;;  %5023 = vmatprep.mubr.f32.mxu1 %v7703_v55  ;;  %v7714_v61 = vld [vmem:[#allocation22_spill] sm:$0xff]  ;;  %v6266_v52 = vsub.f32 %v2375_v45, %v6245_v4  ;;  %v2387_v12 = vsel %vm2367_vm12, %v6050_v58, 0  ;;  %v6275_v59 = vand.u32 4294901760, %v2381_v26  ;;  %v6277_v57 = vpop.trf.xlu1 }
 0x1eb   :  { %v6229_v38 = vpop.f32.mrf.mxu0  ;;  %v6270_v24 = vpop.f32.mrf.mxu1 }
 0x1ec   :  { %7702 = vst [vmem:[#allocation8_spill] sm:$0xff] %v6213_v28  ;;  %7717 = vst [vmem:[#allocation14_spill] sm:$0xff] %v6270_v24  ;;  %v2402_v24 = vsel %vm2367_vm12, %v6102_v42, 0  ;;  %v7737_v42 = vld [vmem:[#allocation24_spill] sm:$0xff] }
 0x1ed   :  { %4968 = vmatmul.mubr.f32.gmra.mxu0 %v7699_v29  ;;  %5024 = vmatmul.mubr.f32.gmra.mxu1 %v7705_v33  ;;  %v6259_v29 = vand.u32 4294901760, %v2378_v19  ;;  %7719 = vst [vmem:[#allocation16_spill] sm:$0xff] %v6275_v59 }
 0x1ee   :  { %4970 = vmatprep.mubr.f32.mxu0 %v7700_v27  ;;  %5026 = vmatprep.mubr.f32.mxu1 %v7707_v36  ;;  %v2384_v27 = vsel %vm2367_vm12, %v6036_v34, 0  ;;  %v7555_v34 = vand.u32 4294901760, %v6253_v51 }
 0x1ef   :  { %7715 = vst [vmem:[#allocation13_spill] sm:$0xff] %v6259_v29  ;;  %v6285_v58 = vsub.f32 %v2378_v19, %v6259_v29  ;;  %v2393_v19 = vsel %vm2367_vm12, %v6072_v16, 0 }
 0x1f1   :  { %v4754_v53 = vpop.f32.mrf.mxu0  ;;  %4971 = vmatmul.mubr.f32.gmra.mxu0 %v7701_v31  ;;  %5027 = vmatmul.mubr.f32.gmra.mxu1 %v7710_v18  ;;  %v4807_v6 = vpop.f32.mrf.mxu1 }
 0x1f2   :  { %v6239_v17 = vadd.f32 %v4804_v15, %v4754_v53  ;;  %4973 = vmatprep.mubr.f32.mxu0 %v7703_v55  ;;  %5029 = vmatprep.mubr.f32.mxu1 %v7712_v49  ;;  %v7556_v55 = vand.u32 4294901760, %v6250_v23  ;;  %v2390_v53 = vsel %vm2367_vm12, %v6058_v56, 0 }
 0x1f3   :  { %v6272_v31 = vpop.f32.mrf.mxu0  ;;  %v6310_v15 = vpop.f32.mrf.mxu1 }
 0x1f4   :  { %7711 = vst [vmem:[#allocation11_spill] sm:$0xff] %v6239_v17  ;;  %7718 = vst [vmem:[#allocation15_spill] sm:$0xff] %v6272_v31 }
 0x1f5   :  { %4974 = vmatmul.mubr.f32.gmra.mxu0 %v7705_v33  ;;  %5030 = vmatmul.mubr.f32.gmra.mxu1 %v7714_v61  ;;  %v6280_v33 = vand.u32 4294901760, %v2384_v27  ;;  %7723 = vst [vmem:[#allocation18_spill] sm:$0xff] %v6310_v15 }
 0x1f6   :  { %4976 = vmatprep.mubr.f32.mxu0 %v7707_v36  ;;  %5032 = vmatprep.mubr.f32.mxu1 %v7716_v14  ;;  %v6287_v36 = vand.u32 4294901760, %v2387_v12 }
 0x1f7   :  { %7720 = vst [vmem:[#allocation21_spill] sm:$0xff] %v6280_v33 }
 0x1f8   :  { %7721 = vst [vmem:[#allocation17_spill] sm:$0xff] %v6287_v36  ;;  %v6316_v16 = vsub.f32 %v2387_v12, %v6287_v36  ;;  %v7727_v12 = vand.u32 4294901760, %v6266_v52 }
 0x1f9   :  { %v4757_v43 = vpop.f32.mrf.mxu0  ;;  %4977 = vmatmul.mubr.f32.gmra.mxu0 %v7710_v18  ;;  %5033 = vmatmul.mubr.f32.gmra.mxu1 %v5984_v22  ;;  %v6297_v18 = vsub.f32 %v2381_v26, %v6275_v59  ;;  %v6318_v26 = vand.u32 4294901760, %v2390_v53  ;;  %v4810_v56 = vpop.f32.mrf.mxu1 }
 0x1fa   :  { %v6289_v45 = vadd.f32 %v4807_v6, %v4757_v43  ;;  %4979 = vmatprep.mubr.f32.mxu0 %v7712_v49  ;;  %5087 = vmatprep.mubr.f32.mxu1 %v6231_v0  ;;  %v2537_v6 = vsub.f32 %v6250_v23, %v7556_v55  ;;  %v2547_v49 = vsub.f32 %v6253_v51, %v7555_v34  ;;  %v6322_v34 = vpop.trf.xlu1  ;;  %v2399_v55 = vsel %vm2367_vm12, %v6094_v11, 0 }
 0x1fb   :  { %v6308_v43 = vsub.f32 %v2384_v27, %v6280_v33  ;;  %7724 = vst [vmem:[#allocation19_spill] sm:$0xff] %v6318_v26  ;;  %v6324_v27 = vand.u32 4294901760, %v2393_v19  ;;  %v2557_v0 = vsub.f32 %v6266_v52, %v7727_v12  ;;  %v6342_v11 = vsub.f32 %v2390_v53, %v6318_v26 }
 0x1fc   :  { %7722 = vst [vmem:[#allocation25_spill] sm:$0xff] %v6289_v45  ;;  %v2548_v45 = vand.u32 4294901760, %v2547_v49  ;;  %v6346_v12 = vand.u32 4294901760, %v2399_v55  ;;  %v7731_v53 = vand.u32 4294901760, %v6285_v58 }
 0x1fd   :  { %4980 = vmatmul.mubr.f32.gmra.mxu0 %v7714_v61  ;;  %5088 = vmatmul.mubr.f32.vlgmr.msra.gmra.mxu1 %v6235_v63  ;;  %7725 = vst [vmem:[#allocation20_spill] sm:$0xff] %v6324_v27  ;;  %v2396_v61 = vsel %vm2367_vm12, %v6080_v5, 0  ;;  %v6330_v63 = vpop.f32.mrf.mxu0  ;;  %v6353_v49 = vsub.f32 %v2393_v19, %v6324_v27 }
 0x1fe   :  { %4982 = vmatprep.mubr.f32.mxu0 %v7716_v14  ;;  %5090 = vmatprep.mubr.f32.mxu1 %v6245_v4  ;;  %7726 = vst [vmem:[#allocation22_spill] sm:$0xff] %v6330_v63  ;;  %v2538_v4 = vand.u32 4294901760, %v2537_v6  ;;  %v6344_v63 = vand.u32 4294901760, %v2396_v61  ;;  %7729 = vst [vmem:[#allocation26_spill] sm:$0xff] %v6346_v12  ;;  %v2558_v14 = vand.u32 4294901760, %v2557_v0  ;;  %v6367_v6 = vpop.trf.xlu1  ;;  %v7734_v0 = vand.u32 4294901760, %v6308_v43 }
 0x1ff   :  { %5186 = vmatpush3.msra.mxu1 %v5941_v44 }
 0x200   :  { %5285 = vmatprep.subr.mxu1 %v5941_v44  ;;  %7728 = vst [vmem:[#allocation23_spill] sm:$0xff] %v6344_v63 }
 0x201   :  { %v4760_v15 = vpop.f32.mrf.mxu0  ;;  %4983 = vmatmul.mubr.f32.gmra.mxu0 %v5984_v22  ;;  %5091 = vmatmul.mubr.f32.gmra.mxu1 %v6259_v29  ;;  %v1066_v22 = vpop.f32.mrf.mxu1  ;;  %v2567_v29 = vsub.f32 %v6285_v58, %v7731_v53  ;;  %v2587_v53 = vsub.f32 %v6308_v43, %v7734_v0 }
 0x202   :  { %v6348_v17 = vadd.f32 %v4810_v56, %v4760_v15  ;;  %5037 = vmatprep.mubr.f32.mxu0 %v2538_v4  ;;  %5093 = vmatprep.mubr.f32.mxu1 %v6275_v59  ;;  %v2405_v4 = vsel %vm2367_vm12, %v6116_v2, 0  ;;  %v7733_v56 = vand.u32 4294901760, %v6297_v18  ;;  %v6375_v59 = vsub.f32 %v2396_v61, %v6344_v63  ;;  %v6406_v31 = vpop.trf.xlu1 }
 0x203   :  { %v736_v5 = vpop.f32.mrf.mxu0  ;;  %v6378_v2 = vsub.f32 %v2399_v55, %v6346_v12  ;;  %v2568_v0 = vand.u32 4294901760, %v2567_v29 }
 0x204   :  { %7730 = vst [vmem:[#allocation27_spill] sm:$0xff] %v6348_v17  ;;  %v6362_v15 = vadd.f32 %v1066_v22, %v736_v5  ;;  %v2577_v19 = vsub.f32 %v6297_v18, %v7733_v56  ;;  %v2408_v5 = vsel %vm2367_vm12, %v6123_v8, 0  ;;  %v6385_v22 = vand.u32 4294901760, %v2405_v4  ;;  %v4813_v56 = vpop.f32.mrf.mxu1 }
 0x205   :  { %5038 = vmatmul.mubr.f32.vlgmr.msra.gmra.mxu0 %v2548_v45  ;;  %5094 = vmatmul.mubr.f32.gmra.mxu1 %v6280_v33  ;;  %v6383_v45 = vand.u32 4294901760, %v2402_v24  ;;  %v7738_v33 = vand.u32 4294901760, %v6316_v16 }
 0x206   :  { %7732 = vst [vmem:[#allocation28_spill] sm:$0xff] %v6362_v15  ;;  %5136 = vmatpush3.msra.mxu0 %v5957_v62  ;;  %5040 = vmatprep.mubr.f32.mxu0 %v2558_v14  ;;  %7736 = vst [vmem:[#allocation30_spill] sm:$0xff] %v6385_v22  ;;  %v2578_v55 = vand.u32 4294901760, %v2577_v19  ;;  %v6393_v15 = vand.u32 4294901760, %v2408_v5  ;;  %v2411_v62 = vsel %vm2367_vm12, %v6135_v50, 0 }
 0x207   :  { %7735 = vst [vmem:[#allocation29_spill] sm:$0xff] %v6383_v45  ;;  %5096 = vmatprep.mubr.f32.mxu1 %v6287_v36  ;;  %5235 = vmatprep.subr.mxu0 %v7737_v42  ;;  %v2597_v8 = vsub.f32 %v6316_v16, %v7738_v33  ;;  %v2588_v36 = vand.u32 4294901760, %v2587_v53  ;;  %v7741_v33 = vand.u32 4294901760, %v6342_v11  ;;  %v6409_v50 = vsub.f32 %v2402_v24, %v6383_v45 }
 0x208   :  { %7739 = vst [vmem:[#allocation24_spill] sm:$0xff] %v6393_v15  ;;  %v6412_v53 = vsub.f32 %v2405_v4, %v6385_v22  ;;  %v6418_v17 = vand.u32 4294901760, %v2411_v62  ;;  %v6426_v4 = vsub.f32 %v2408_v5, %v6393_v15 }
 0x209   :  { %v4763_v14 = vpop.f32.mrf.mxu0  ;;  %5041 = vmatmul.mubr.f32.gmra.mxu0 %v2568_v0  ;;  %5097 = vmatmul.mubr.f32.gmra.mxu1 %v6318_v26  ;;  %v2607_v19 = vsub.f32 %v6342_v11, %v7741_v33  ;;  %v2414_v0 = vsel %vm2367_vm12, %v6143_v20, 0  ;;  %v2598_v33 = vand.u32 4294901760, %v2597_v8 }
 0x20a   :  { %v6400_v61 = vadd.f32 %v4813_v56, %v4763_v14  ;;  %5043 = vmatprep.mubr.f32.mxu0 %v2578_v55  ;;  %5099 = vmatprep.mubr.f32.mxu1 %v6324_v27  ;;  %v2417_v56 = vsel %vm2367_vm12, %v6155_v7, 0  ;;  %v1078_v55 = vpop.f32.mrf.mxu1  ;;  %7742 = vst [vmem:[#allocation32_spill] sm:$0xff] %v6418_v17  ;;  %v7744_v27 = vand.u32 4294901760, %v6353_v49  ;;  %v6429_v20 = vand.u32 4294901760, %v2414_v0 }
 0x20b   :  { %v756_v14 = vpop.f32.mrf.mxu0  ;;  %v6431_v7 = vand.u32 4294901760, %v2417_v56  ;;  %v2608_v26 = vand.u32 4294901760, %v2607_v19 }
 0x20c   :  { %7740 = vst [vmem:[#allocation31_spill] sm:$0xff] %v6400_v61  ;;  %v6420_v29 = vadd.f32 %v1078_v55, %v756_v14  ;;  %v2617_v24 = vsub.f32 %v6353_v49, %v7744_v27  ;;  %7745 = vst [vmem:[#allocation34_spill] sm:$0xff] %v6429_v20  ;;  %v7747_v55 = vand.u32 4294901760, %v6375_v59  ;;  %v4816_v5 = vpop.f32.mrf.mxu1  ;;  %v6447_v61 = vpop.trf.xlu1  ;;  %v2423_v27 = vsel %vm2367_vm12, %v6183_v1, 0 }
 0x20d   :  { %5044 = vmatmul.mubr.f32.gmra.mxu0 %v2588_v36  ;;  %5100 = vmatmul.mubr.f32.gmra.mxu1 %v6344_v63  ;;  %7746 = vst [vmem:[#allocation35_spill] sm:$0xff] %v6431_v7  ;;  %v7748_v36 = vand.u32 4294901760, %v6378_v2  ;;  %v6454_v19 = vsub.f32 %v2414_v0, %v6429_v20  ;;  %v7754_v0 = vand.u32 4294901760, %v6412_v53 }
 0x20e   :  { %7743 = vst [vmem:[#allocation33_spill] sm:$0xff] %v6420_v29  ;;  %5046 = vmatprep.mubr.f32.mxu0 %v2598_v33  ;;  %5102 = vmatprep.mubr.f32.mxu1 %v6346_v12  ;;  %v2627_v8 = vsub.f32 %v6375_v59, %v7747_v55  ;;  %v6443_v29 = vsub.f32 %v2411_v62, %v6418_v17  ;;  %v2420_v33 = vsel %vm2367_vm12, %v6167_v46, 0  ;;  %v2618_v12 = vand.u32 4294901760, %v2617_v24  ;;  %v1090_v55 = vpop.f32.mrf.mxu1 }
 0x20f   :  { %v2637_v63 = vsub.f32 %v6378_v2, %v7748_v36  ;;  %v6457_v62 = vsub.f32 %v2417_v56, %v6431_v7  ;;  %v6462_v24 = vand.u32 4294901760, %v2420_v33  ;;  %v2657_v56 = vsub.f32 %v6412_v53, %v7754_v0 }
 0x210   :  { %7749 = vst [vmem:[#allocation36_spill] sm:$0xff] %v6443_v29  ;;  %v2628_v46 = vand.u32 4294901760, %v2627_v8 }
 0x211   :  { %v4766_v14 = vpop.f32.mrf.mxu0  ;;  %5047 = vmatmul.mubr.f32.gmra.mxu0 %v2608_v26  ;;  %5103 = vmatmul.mubr.f32.gmra.mxu1 %v6383_v45  ;;  %7750 = vst [vmem:[#allocation37_spill] sm:$0xff] %v6457_v62  ;;  %7752 = vst [vmem:[#allocation39_spill] sm:$0xff] %v6462_v24  ;;  %v2638_v28 = vand.u32 4294901760, %v2637_v63  ;;  %v7753_v26 = vand.u32 4294901760, %v6409_v50  ;;  %v2429_v63 = vsel %vm2367_vm12, %v6205_v48, 0  ;;  %v6491_v48 = vsub.f32 %v2420_v33, %v6462_v24 }
 0x212   :  { %v6459_v36 = vadd.f32 %v4816_v5, %v4766_v14  ;;  %5049 = vmatprep.mubr.f32.mxu0 %v2618_v12  ;;  %5105 = vmatprep.mubr.f32.mxu1 %v6385_v22  ;;  %v6471_v5 = vand.u32 4294901760, %v2423_v27  ;;  %v2426_v12 = vsel %vm2367_vm12, %v6193_v21, 0  ;;  %v6488_v21 = vpop.trf.xlu1  ;;  %v6500_v0 = vand.u32 4294901760, %v2429_v63 }
 0x213   :  { %v776_v1 = vpop.f32.mrf.mxu0  ;;  %v2647_v45 = vsub.f32 %v6409_v50, %v7753_v26  ;;  %v7757_v26 = vand.u32 4294901760, %v6426_v4 }
 0x214   :  { %7751 = vst [vmem:[#allocation38_spill] sm:$0xff] %v6459_v36  ;;  %7755 = vst [vmem:[#allocation40_spill] sm:$0xff] %v6471_v5  ;;  %v6475_v8 = vadd.f32 %v1090_v55, %v776_v1  ;;  %v2432_v36 = vsel %vm2367_vm12, %v6217_v40, 0  ;;  %v6493_v55 = vand.u32 4294901760, %v2426_v12  ;;  %v4819_v1 = vpop.f32.mrf.mxu1  ;;  %v6498_v14 = vsub.f32 %v2423_v27, %v6471_v5 }
 0x215   :  { %5050 = vmatmul.mubr.f32.gmra.mxu0 %v2628_v46  ;;  %5106 = vmatmul.mubr.f32.gmra.mxu1 %v6393_v15  ;;  %v2667_v22 = vsub.f32 %v6426_v4, %v7757_v26  ;;  %v2435_v46 = vsel %vm2367_vm12, %v6243_v25, 0  ;;  %v2648_v26 = vand.u32 4294901760, %v2647_v45  ;;  %7759 = vst [vmem:[#allocation43_spill] sm:$0xff] %v6500_v0  ;;  %v7760_v40 = vand.u32 4294901760, %v6443_v29 }
 0x216   :  { %7756 = vst [vmem:[#allocation41_spill] sm:$0xff] %v6475_v8  ;;  %5052 = vmatprep.mubr.f32.mxu0 %v2638_v28  ;;  %5108 = vmatprep.mubr.f32.mxu1 %v6418_v17  ;;  %7758 = vst [vmem:[#allocation42_spill] sm:$0xff] %v6493_v55  ;;  %v2658_v28 = vand.u32 4294901760, %v2657_v56  ;;  %v6505_v15 = vand.u32 4294901760, %v2432_v36  ;;  %v6508_v25 = vand.u32 4294901760, %v2435_v46  ;;  %v7764_v27 = vand.u32 4294901760, %v6454_v19 }
 0x217   :  { %v2677_v17 = vsub.f32 %v6443_v29, %v7760_v40  ;;  %v2668_v8 = vand.u32 4294901760, %v2667_v22  ;;  %v7765_v40 = vand.u32 4294901760, %v6457_v62  ;;  %v2438_v22 = vsel %vm2367_vm12, %v6277_v57, 0 }
 0x218   :  { %7761 = vst [vmem:[#allocation44_spill] sm:$0xff] %v6505_v15  ;;  %7762 = vst [vmem:[#allocation45_spill] sm:$0xff] %v6508_v25  ;;  %v2687_v56 = vsub.f32 %v6454_v19, %v7764_v27  ;;  %v6529_v27 = vsub.f32 %v2429_v63, %v6500_v0  ;;  %v6538_v57 = vsub.f32 %v2435_v46, %v6508_v25  ;;  %v7772_v63 = vand.u32 4294901760, %v6491_v48 }
 0x219   :  { %v4769_v33 = vpop.f32.mrf.mxu0  ;;  %5053 = vmatmul.mubr.f32.gmra.mxu0 %v2648_v26  ;;  %5109 = vmatmul.mubr.f32.gmra.mxu1 %v6429_v20  ;;  %v2697_v29 = vsub.f32 %v6457_v62, %v7765_v40  ;;  %v6521_v20 = vsub.f32 %v2426_v12, %v6493_v55  ;;  %v2678_v40 = vand.u32 4294901760, %v2677_v17  ;;  %v2364_v26 = vpop.trf.xlu1  ;;  %v6534_v12 = vsub.f32 %v2432_v36, %v6505_v15 }
 0x21a   :  { %v6510_v45 = vadd.f32 %v4819_v1, %v4769_v33  ;;  %5055 = vmatprep.mubr.f32.mxu0 %v2658_v28  ;;  %5111 = vmatprep.mubr.f32.mxu1 %v6431_v7  ;;  %v1102_v1 = vpop.f32.mrf.mxu1  ;;  %v2441_v28 = vsel %vm2367_vm12, %v6322_v34, 0  ;;  %7769 = vst [vmem:[#allocation50_spill] sm:$0xff] %v6538_v57  ;;  %v6540_v34 = vand.u32 4294901760, %v2438_v22  ;;  %v2707_v17 = vsub.f32 %v6491_v48, %v7772_v63 }
 0x21b   :  { %7766 = vst [vmem:[#allocation47_spill] sm:$0xff] %v6521_v20  ;;  %v796_v33 = vpop.f32.mrf.mxu0  ;;  %7768 = vst [vmem:[#allocation49_spill] sm:$0xff] %v6534_v12  ;;  %v6542_v62 = vand.u32 4294901760, %v2441_v28  ;;  %v7603_v36 = vand.u32 4294901760, %v6521_v20  ;;  %v2444_v46 = vsel %vm2367_vm12, %v6367_v6, 0 }
 0x21c   :  { %7763 = vst [vmem:[#allocation46_spill] sm:$0xff] %v6510_v45  ;;  %v6531_v45 = vadd.f32 %v1102_v1, %v796_v33  ;;  %7770 = vst [vmem:[#allocation51_spill] sm:$0xff] %v6540_v34  ;;  %v4822_v1 = vpop.f32.mrf.mxu1  ;;  %v2698_v33 = vand.u32 4294901760, %v2697_v29 }
 0x21d   :  { %5056 = vmatmul.mubr.f32.gmra.mxu0 %v2668_v8  ;;  %5112 = vmatmul.mubr.f32.gmra.mxu1 %v6462_v24  ;;  %7771 = vst [vmem:[#allocation52_spill] sm:$0xff] %v6542_v62  ;;  %v2688_v8 = vand.u32 4294901760, %v2687_v56  ;;  %v2447_v24 = vsel %vm2367_vm12, %v6406_v31, 0  ;;  %v6561_v56 = vsub.f32 %v2438_v22, %v6540_v34  ;;  %v6564_v6 = vsub.f32 %v2441_v28, %v6542_v62  ;;  %v2365_v31 = vpop.trf.xlu1 }
 0x21e   :  { %7767 = vst [vmem:[#allocation48_spill] sm:$0xff] %v6531_v45  ;;  %5058 = vmatprep.mubr.f32.mxu0 %v2678_v40  ;;  %5114 = vmatprep.mubr.f32.mxu1 %v6471_v5  ;;  %v7773_v40 = vand.u32 4294901760, %v6498_v14  ;;  %v6572_v45 = vand.u32 4294901760, %v2444_v46  ;;  %v1114_v29 = vpop.f32.mrf.mxu1  ;;  %v2450_v28 = vsel %vm2367_vm12, %v6447_v61, 0 }
 0x220   :  { %v2717_v5 = vsub.f32 %v6498_v14, %v7773_v40  ;;  %v2708_v40 = vand.u32 4294901760, %v2707_v17  ;;  %7775 = vst [vmem:[#allocation54_spill] sm:$0xff] %v6572_v45 }
 0x221   :  { %v4772_v63 = vpop.f32.mrf.mxu0  ;;  %5059 = vmatmul.mubr.f32.gmra.mxu0 %v2688_v8  ;;  %5115 = vmatmul.mubr.f32.gmra.mxu1 %v6493_v55  ;;  %v2727_v8 = vsub.f32 %v6521_v20, %v7603_v36  ;;  %v6574_v55 = vand.u32 4294901760, %v2447_v24 }
 0x222   :  { %v6566_v7 = vadd.f32 %v4822_v1, %v4772_v63  ;;  %5061 = vmatprep.mubr.f32.mxu0 %v2698_v33  ;;  %5117 = vmatprep.mubr.f32.mxu1 %v6500_v0  ;;  %v2718_v33 = vand.u32 4294901760, %v2717_v5  ;;  %v7778_v63 = vand.u32 4294901760, %v6529_v27  ;;  %v7779_v0 = vand.u32 4294901760, %v6534_v12 }
 0x223   :  { %7776 = vst [vmem:[#allocation55_spill] sm:$0xff] %v6574_v55  ;;  %v816_v22 = vpop.f32.mrf.mxu0  ;;  %v7780_v5 = vand.u32 4294901760, %v6538_v57 }
 0x224   :  { %7774 = vst [vmem:[#allocation53_spill] sm:$0xff] %v6566_v7  ;;  %v6578_v1 = vadd.f32 %v1114_v29, %v816_v22  ;;  %v2737_v17 = vsub.f32 %v6529_v27, %v7778_v63  ;;  %v2747_v36 = vsub.f32 %v6534_v12, %v7779_v0  ;;  %v2453_v7 = vsel %vm2367_vm12, %v6488_v21, 0  ;;  %v4825_v63 = vpop.f32.mrf.mxu1 }
 0x225   :  { %5062 = vmatmul.mubr.f32.gmra.mxu0 %v2708_v40  ;;  %5118 = vmatmul.mubr.f32.gmra.mxu1 %v6505_v15  ;;  %v2757_v29 = vsub.f32 %v6538_v57, %v7780_v5  ;;  %v2728_v22 = vand.u32 4294901760, %v2727_v8  ;;  %v6596_v0 = vsub.f32 %v2444_v46, %v6572_v45  ;;  %v6599_v40 = vsub.f32 %v2447_v24, %v6574_v55  ;;  %v2366_v46 = vpop.trf.xlu1 }
 0x226   :  { %7777 = vst [vmem:[#allocation56_spill] sm:$0xff] %v6578_v1  ;;  %5064 = vmatprep.mubr.f32.mxu0 %v2718_v33  ;;  %5120 = vmatprep.mubr.f32.mxu1 %v6508_v25  ;;  %v6601_v21 = vand.u32 4294901760, %v2450_v28  ;;  %v6603_v20 = vand.u32 4294901760, %v2453_v7  ;;  %v2456_v33 = vsel %vm2367_vm12, %v2364_v26, 0  ;;  %v2738_v61 = vand.u32 4294901760, %v2737_v17 }
 0x227   :  { %v2748_v25 = vand.u32 4294901760, %v2747_v36  ;;  %v2459_v8 = vsel %vm2367_vm12, %v2365_v31, 0  ;;  %v7783_v5 = vand.u32 4294901760, %v6561_v56  ;;  %v2758_v57 = vand.u32 4294901760, %v2757_v29 }
 0x228   :  { %7781 = vst [vmem:[#allocation57_spill] sm:$0xff] %v6601_v21  ;;  %7782 = vst [vmem:[#allocation58_spill] sm:$0xff] %v6603_v20  ;;  %v7784_v26 = vand.u32 4294901760, %v6564_v6  ;;  %v7622_v17 = vand.u32 4294901760, %v6596_v0  ;;  %v6620_v31 = vsub.f32 %v2450_v28, %v6601_v21  ;;  %v6622_v12 = vand.u32 4294901760, %v2456_v33 }
 0x229   :  { %v4775_v15 = vpop.f32.mrf.mxu0  ;;  %5065 = vmatmul.mubr.f32.gmra.mxu0 %v2728_v22  ;;  %5121 = vmatmul.mubr.f32.gmra.mxu1 %v6540_v34  ;;  %v2767_v24 = vsub.f32 %v6561_v56, %v7783_v5  ;;  %v1126_v34 = vpop.f32.mrf.mxu1  ;;  %v6629_v29 = vand.u32 4294901760, %v2459_v8  ;;  %v2462_v5 = vsel %vm2367_vm12, %v2366_v46, 0 }
 0x22a   :  { %v6611_v1 = vadd.f32 %v4825_v63, %v4775_v15  ;;  %5067 = vmatprep.mubr.f32.mxu0 %v2738_v61  ;;  %5123 = vmatprep.mubr.f32.mxu1 %v6542_v62  ;;  %v2777_v36 = vsub.f32 %v6564_v6, %v7784_v26  ;;  %7785 = vst [vmem:[#allocation59_spill] sm:$0xff] %v6622_v12 }
 0x22b   :  { %v836_v15 = vpop.f32.mrf.mxu0  ;;  %v6625_v61 = vsub.f32 %v2453_v7, %v6603_v20  ;;  %7787 = vst [vmem:[#allocation61_spill] sm:$0xff] %v6629_v29  ;;  %v4828_v26 = vpop.f32.mrf.mxu1  ;;  %v2768_v22 = vand.u32 4294901760, %v2767_v24  ;;  %v2787_v28 = vsub.f32 %v6596_v0, %v7622_v17  ;;  %v7625_v7 = vand.u32 4294901760, %v6620_v31 }
 0x22c   :  { %v6627_v63 = vadd.f32 %v1126_v34, %v836_v15  ;;  %v6639_v34 = vsub.f32 %v2456_v33, %v6622_v12  ;;  %v6641_v15 = vand.u32 4294901760, %v2462_v5  ;;  %v2778_v24 = vand.u32 4294901760, %v2777_v36 }
 0x22d   :  { %5068 = vmatmul.mubr.f32.gmra.mxu0 %v2748_v25  ;;  %5124 = vmatmul.mubr.f32.gmra.mxu1 %v6572_v45  ;;  %v6645_v25 = vsub.f32 %v2459_v8, %v6629_v29  ;;  %v1138_v45 = vpop.f32.mrf.mxu1  ;;  %v2788_v33 = vand.u32 4294901760, %v2787_v28  ;;  %v2807_v8 = vsub.f32 %v6620_v31, %v7625_v7 }
 0x22e   :  { %7786 = vst [vmem:[#allocation60_spill] sm:$0xff] %v6627_v63  ;;  %5070 = vmatprep.mubr.f32.mxu0 %v2758_v57  ;;  %5126 = vmatprep.mubr.f32.mxu1 %v6574_v55  ;;  %v7788_v57 = vand.u32 4294901760, %v6599_v40  ;;  %v7626_v36 = vand.u32 4294901760, %v6639_v34 }
 0x230   :  { %v2797_v55 = vsub.f32 %v6599_v40, %v7788_v57  ;;  %v6659_v57 = vsub.f32 %v2462_v5, %v6641_v15  ;;  %v2827_v5 = vsub.f32 %v6639_v34, %v7626_v36 }
 0x231   :  { %v4778_v62 = vpop.f32.mrf.mxu0  ;;  %5071 = vmatmul.mubr.f32.gmra.mxu0 %v2768_v22  ;;  %5127 = vmatmul.mubr.f32.gmra.mxu1 %v6601_v21  ;;  %v4831_v46 = vpop.f32.mrf.mxu1  ;;  %v7633_v22 = vand.u32 4294901760, %v6645_v25 }
 0x232   :  { %v6651_v17 = vadd.f32 %v4828_v26, %v4778_v62  ;;  %5073 = vmatprep.mubr.f32.mxu0 %v2778_v24  ;;  %5129 = vmatprep.mubr.f32.mxu1 %v6603_v20  ;;  %v2798_v62 = vand.u32 4294901760, %v2797_v55  ;;  %v7790_v26 = vand.u32 4294901760, %v6625_v61  ;;  %v2808_v24 = vand.u32 4294901760, %v2807_v8 }
 0x233   :  { %v856_v63 = vpop.f32.mrf.mxu0  ;;  %v2846_v7 = vand.u32 4294901760, %v6659_v57  ;;  %v2837_v55 = vsub.f32 %v6645_v25, %v7633_v22  ;;  %v7791_v8 = vand.u32 4294901760, %v6250_v23  ;;  %v2828_v36 = vand.u32 4294901760, %v2827_v5 }
 0x234   :  { %v6662_v21 = vadd.f32 %v1138_v45, %v856_v63  ;;  %v2817_v28 = vsub.f32 %v6625_v61, %v7790_v26  ;;  %v1150_v45 = vpop.f32.mrf.mxu1 }
 0x235   :  { %5074 = vmatmul.mubr.f32.gmra.mxu0 %v2788_v33  ;;  %5130 = vmatmul.mubr.f32.gmra.mxu1 %v6622_v12  ;;  %v2838_v22 = vand.u32 4294901760, %v2837_v55 }
 0x236   :  { %7789 = vst [vmem:[#allocation62_spill] sm:$0xff] %v6662_v21  ;;  %5076 = vmatprep.mubr.f32.mxu0 %v2798_v62  ;;  %5132 = vmatprep.mubr.f32.mxu1 %v6629_v29  ;;  %v2818_v63 = vand.u32 4294901760, %v2817_v28  ;;  %v2847_v28 = vsub.f32 %v6659_v57, %v2846_v7 }
 0x239   :  { %v4781_v26 = vpop.f32.mrf.mxu0  ;;  %v4834_v33 = vpop.f32.mrf.mxu1  ;;  %5077 = vmatmul.mubr.f32.gmra.mxu0 %v2808_v24  ;;  %5133 = vmatmul.mubr.f32.gmra.mxu1 %v6641_v15  ;;  %v7792_v24 = vand.u32 4294901760, %v6253_v51 }
 0x23a   :  { %v6677_v62 = vadd.f32 %v4831_v46, %v4781_v26  ;;  %5079 = vmatprep.mubr.f32.mxu0 %v2818_v63  ;;  %5187 = vmatprep.mubr.f32.mxu1 %v7791_v8  ;;  %v7793_v46 = vand.u32 4294901760, %v6266_v52  ;;  %v2848_v63 = vand.u32 4294901760, %v2847_v28 }
 0x23b   :  { %v876_v29 = vpop.f32.mrf.mxu0  ;;  %v1162_v12 = vpop.f32.mrf.mxu1 }
 0x23c   :  { %v6684_v20 = vadd.f32 %v1150_v45, %v876_v29  ;;  %v7794_v29 = vand.u32 4294901760, %v6285_v58 }
 0x23d   :  { %v4889_v21 = vpop.f32.mrf.mxu1  ;;  %5080 = vmatmul.mubr.f32.gmra.mxu0 %v2828_v36  ;;  %5188 = vmatmul.mubr.f32.vlgmr.msra.gmra.mxu1 %v7792_v24  ;;  %v7795_v36 = vand.u32 4294901760, %v6297_v18 }
 0x23e   :  { %5082 = vmatprep.mubr.f32.mxu0 %v2838_v22  ;;  %5190 = vmatprep.mubr.f32.mxu1 %v7793_v46 }
 0x23f   :  { %v1533_v5 = vpop.f32.mrf.mxu1  ;;  %5286 = vmatpush3.msra.mxu1 %v5941_v44  ;;  %v7796_v44 = vand.u32 4294901760, %v6308_v43 }
 0x241   :  { %v4784_v26 = vpop.f32.mrf.mxu0  ;;  %v4892_v8 = vpop.f32.mrf.mxu1  ;;  %5083 = vmatmul.mubr.f32.gmra.mxu0 %v2848_v63  ;;  %5191 = vmatmul.mubr.f32.gmra.mxu1 %v7794_v29 }
 0x242   :  { %v6693_v45 = vadd.f32 %v4834_v33, %v4784_v26  ;;  %5137 = vmatprep.mubr.f32.mxu0 %v6250_v23  ;;  %5193 = vmatprep.mubr.f32.mxu1 %v7795_v36  ;;  %v983_v33 = vadd.f32 %v6157_v13, %v6159_v37  ;;  %v7797_v23 = vand.u32 4294901760, %v6316_v16  ;;  %v7798_v13 = vand.u32 4294901760, %v6342_v11 }
 0x243   :  { %v896_v22 = vpop.f32.mrf.mxu0  ;;  %v1549_v55 = vpop.f32.mrf.mxu1 }
 0x244   :  { %v6698_v24 = vadd.f32 %v1162_v12, %v896_v22 }
 0x245   :  { %v4839_v28 = vpop.f32.mrf.mxu0  ;;  %v4895_v46 = vpop.f32.mrf.mxu1  ;;  %5138 = vmatmul.mubr.f32.vlgmr.msra.gmra.mxu0 %v6253_v51  ;;  %5194 = vmatmul.mubr.f32.gmra.mxu1 %v7796_v44 }
 0x246   :  { %v1250_v63 = vadd.f32 %v4839_v28, %v6147_v10  ;;  %5236 = vmatpush3.msra.mxu0 %v7737_v42  ;;  %5140 = vmatprep.mubr.f32.mxu0 %v6266_v52  ;;  %v995_v10 = vadd.f32 %v6173_v47, %v6175_v54  ;;  %v7799_v52 = vand.u32 4294901760, %v6353_v49  ;;  %v7800_v47 = vand.u32 4294901760, %v6375_v59 }
 0x247   :  { %5196 = vmatprep.mubr.f32.mxu1 %v7797_v23  ;;  %v1242_v12 = vpop.f32.mrf.mxu0  ;;  %v1565_v26 = vpop.f32.mrf.mxu1 }
 0x248   :  { %v1243_v29 = vadd.f32 %v1242_v12, %v983_v33  ;;  %v6710_v36 = vadd.f32 %v4889_v21, %v1250_v63 }
 0x249   :  { %v4842_v51 = vpop.f32.mrf.mxu0  ;;  %v4898_v22 = vpop.f32.mrf.mxu1  ;;  %5141 = vmatmul.mubr.f32.gmra.mxu0 %v6285_v58  ;;  %5197 = vmatmul.mubr.f32.gmra.mxu1 %v7798_v13 }
 0x24a   :  { %v1264_v37 = vadd.f32 %v4842_v51, %v6163_v39  ;;  %5143 = vmatprep.mubr.f32.mxu0 %v6297_v18  ;;  %5199 = vmatprep.mubr.f32.mxu1 %v7799_v52  ;;  %v6721_v42 = vadd.f32 %v1533_v5, %v1243_v29  ;;  %v1007_v39 = vadd.f32 %v6189_v9, %v6191_v30  ;;  %v7801_v18 = vand.u32 4294901760, %v6378_v2 }
 0x24b   :  { %v1256_v21 = vpop.f32.mrf.mxu0  ;;  %v1581_v28 = vpop.f32.mrf.mxu1  ;;  %v7802_v9 = vand.u32 4294901760, %v6409_v50 }
 0x24c   :  { %v1257_v44 = vadd.f32 %v1256_v21, %v995_v10  ;;  %v6723_v33 = vadd.f32 %v4892_v8, %v1264_v37 }
 0x24d   :  { %v4845_v58 = vpop.f32.mrf.mxu0  ;;  %v4901_v63 = vpop.f32.mrf.mxu1  ;;  %5144 = vmatmul.mubr.f32.gmra.mxu0 %v6308_v43  ;;  %5200 = vmatmul.mubr.f32.gmra.mxu1 %v7800_v47 }
 0x24e   :  { %v1278_v54 = vadd.f32 %v4845_v58, %v6179_v60  ;;  %5146 = vmatprep.mubr.f32.mxu0 %v6316_v16  ;;  %5202 = vmatprep.mubr.f32.mxu1 %v7801_v18  ;;  %v6734_v5 = vadd.f32 %v1549_v55, %v1257_v44  ;;  %v1019_v60 = vadd.f32 %v6207_v3, %v6209_v35  ;;  %v7803_v16 = vand.u32 4294901760, %v6412_v53  ;;  %v7805_v35 = vld [vmem:[#allocation8_spill] sm:$0xff]  ;;  %v7810_v18 = vld [vmem:[#allocation14_spill] sm:$0xff] }
 0x24f   :  { %v1270_v8 = vpop.f32.mrf.mxu0  ;;  %v1597_v23 = vpop.f32.mrf.mxu1  ;;  %v7804_v3 = vand.u32 4294901760, %v6426_v4 }
 0x250   :  { %v1271_v12 = vadd.f32 %v1270_v8, %v1007_v39  ;;  %v6736_v29 = vadd.f32 %v4895_v46, %v1278_v54  ;;  %v7811_v8 = vld [vmem:[#allocation11_spill] sm:$0xff] }
 0x251   :  { %v4848_v43 = vpop.f32.mrf.mxu0  ;;  %v4904_v51 = vpop.f32.mrf.mxu1  ;;  %5147 = vmatmul.mubr.f32.gmra.mxu0 %v6342_v11  ;;  %5203 = vmatmul.mubr.f32.gmra.mxu1 %v7802_v9 }
 0x252   :  { %v1292_v30 = vadd.f32 %v4848_v43, %v6197_v41  ;;  %5149 = vmatprep.mubr.f32.mxu0 %v6353_v49  ;;  %5205 = vmatprep.mubr.f32.mxu1 %v7803_v16  ;;  %v6747_v55 = vadd.f32 %v1565_v26, %v1271_v12  ;;  %v1031_v41 = vadd.f32 %v6227_v32, %v6229_v38  ;;  %v7806_v26 = vld [vmem:[#allocation36_spill] sm:$0xff]  ;;  %v7808_v32 = vand.u32 4294901760, %v6454_v19  ;;  %v7809_v38 = vld [vmem:[#allocation15_spill] sm:$0xff] }
 0x253   :  { %v1284_v46 = vpop.f32.mrf.mxu0  ;;  %v1613_v13 = vpop.f32.mrf.mxu1  ;;  %v7807_v21 = vand.u32 4294901760, %v7806_v26 }
 0x254   :  { %v1285_v10 = vadd.f32 %v1284_v46, %v1019_v60  ;;  %v6749_v37 = vadd.f32 %v4898_v22, %v1292_v30 }
 0x255   :  { %v4851_v11 = vpop.f32.mrf.mxu0  ;;  %v4907_v52 = vpop.f32.mrf.mxu1  ;;  %5150 = vmatmul.mubr.f32.gmra.mxu0 %v6375_v59  ;;  %5206 = vmatmul.mubr.f32.gmra.mxu1 %v7804_v3  ;;  %v7816_v3 = vld [vmem:[#allocation18_spill] sm:$0xff] }
 0x256   :  { %v1306_v49 = vadd.f32 %v4851_v11, %v7805_v35  ;;  %5152 = vmatprep.mubr.f32.mxu0 %v6378_v2  ;;  %5208 = vmatprep.mubr.f32.mxu1 %v7807_v21  ;;  %v6760_v44 = vadd.f32 %v1581_v28, %v1285_v10  ;;  %v1043_v2 = vadd.f32 %v7810_v18, %v7809_v38  ;;  %v7812_v28 = vld [vmem:[#allocation37_spill] sm:$0xff]  ;;  %v7814_v10 = vand.u32 4294901760, %v6491_v48  ;;  %v7815_v11 = vld [vmem:[#allocation22_spill] sm:$0xff]  ;;  %v7821_v18 = vld [vmem:[#allocation27_spill] sm:$0xff] }
 0x257   :  { %v1298_v22 = vpop.f32.mrf.mxu0  ;;  %v1629_v58 = vpop.f32.mrf.mxu1  ;;  %v7813_v43 = vand.u32 4294901760, %v7812_v28 }
 0x258   :  { %v1299_v47 = vadd.f32 %v1298_v22, %v1031_v41  ;;  %v6762_v39 = vadd.f32 %v4901_v63, %v1306_v49  ;;  %v7817_v41 = vld [vmem:[#allocation25_spill] sm:$0xff] }
 0x259   :  { %v4854_v59 = vpop.f32.mrf.mxu0  ;;  %v4910_v54 = vpop.f32.mrf.mxu1  ;;  %5153 = vmatmul.mubr.f32.gmra.mxu0 %v6409_v50  ;;  %5209 = vmatmul.mubr.f32.gmra.mxu1 %v7808_v32  ;;  %v7819_v32 = vld [vmem:[#allocation47_spill] sm:$0xff] }
 0x25a   :  { %v1320_v12 = vadd.f32 %v4854_v59, %v7811_v8  ;;  %5155 = vmatprep.mubr.f32.mxu0 %v6412_v53  ;;  %5211 = vmatprep.mubr.f32.mxu1 %v7813_v43  ;;  %v6773_v9 = vadd.f32 %v1597_v23, %v1299_v47  ;;  %v1055_v53 = vadd.f32 %v7816_v3, %v7815_v11  ;;  %v7818_v23 = vand.u32 4294901760, %v6498_v14  ;;  %v7826_v11 = vld [vmem:[#allocation31_spill] sm:$0xff]  ;;  %v7827_v3 = vld [vmem:[#allocation50_spill] sm:$0xff] }
 0x25b   :  { %v1312_v63 = vpop.f32.mrf.mxu0  ;;  %v1645_v60 = vpop.f32.mrf.mxu1  ;;  %v7820_v38 = vand.u32 4294901760, %v7819_v32 }
 0x25c   :  { %v1313_v30 = vadd.f32 %v1312_v63, %v1043_v2  ;;  %v6775_v16 = vadd.f32 %v4904_v51, %v1320_v12 }
 0x25d   :  { %v4857_v50 = vpop.f32.mrf.mxu0  ;;  %v4913_v46 = vpop.f32.mrf.mxu1  ;;  %5156 = vmatmul.mubr.f32.gmra.mxu0 %v6426_v4  ;;  %5212 = vmatmul.mubr.f32.gmra.mxu1 %v7814_v10 }
 0x25e   :  { %v1334_v35 = vadd.f32 %v4857_v50, %v7817_v41  ;;  %5158 = vmatprep.mubr.f32.mxu0 %v7806_v26  ;;  %5214 = vmatprep.mubr.f32.mxu1 %v7818_v23  ;;  %v6786_v49 = vadd.f32 %v1613_v13, %v1313_v30  ;;  %v7822_v26 = vand.u32 4294901760, %v6529_v27  ;;  %v7824_v50 = vld [vmem:[#allocation49_spill] sm:$0xff] }
 0x25f   :  { %v1326_v51 = vpop.f32.mrf.mxu0  ;;  %v1661_v21 = vpop.f32.mrf.mxu1  ;;  %v7825_v10 = vand.u32 4294901760, %v7824_v50 }
 0x260   :  { %v1327_v22 = vadd.f32 %v1326_v51, %v1055_v53  ;;  %v6788_v47 = vadd.f32 %v4907_v52, %v1334_v35  ;;  %v7823_v52 = vld [vmem:[#allocation28_spill] sm:$0xff] }
 0x261   :  { %v4860_v4 = vpop.f32.mrf.mxu0  ;;  %v4916_v59 = vpop.f32.mrf.mxu1  ;;  %5159 = vmatmul.mubr.f32.gmra.mxu0 %v6454_v19  ;;  %5215 = vmatmul.mubr.f32.gmra.mxu1 %v7820_v38  ;;  %v7831_v38 = vld [vmem:[#allocation38_spill] sm:$0xff] }
 0x262   :  { %v1348_v2 = vadd.f32 %v4860_v4, %v7821_v18  ;;  %5161 = vmatprep.mubr.f32.mxu0 %v7812_v28  ;;  %5217 = vmatprep.mubr.f32.mxu1 %v7822_v26  ;;  %v6797_v13 = vadd.f32 %v1629_v58, %v1327_v22  ;;  %v7828_v58 = vand.u32 4294901760, %v7827_v3  ;;  %v7830_v4 = vand.u32 4294901760, %v6561_v56 }
 0x263   :  { %v1340_v8 = vpop.f32.mrf.mxu0  ;;  %v1677_v12 = vpop.f32.mrf.mxu1 }
 0x264   :  { %v1341_v43 = vadd.f32 %v1340_v8, %v7823_v52  ;;  %v6800_v63 = vadd.f32 %v4910_v54, %v1348_v2  ;;  %v7829_v54 = vld [vmem:[#allocation33_spill] sm:$0xff] }
 0x265   :  { %v4863_v30 = vpop.f32.mrf.mxu0  ;;  %v4919_v19 = vpop.f32.mrf.mxu1  ;;  %5162 = vmatmul.mubr.f32.gmra.mxu0 %v6491_v48  ;;  %5218 = vmatmul.mubr.f32.gmra.mxu1 %v7825_v10  ;;  %v7835_v10 = vld [vmem:[#allocation46_spill] sm:$0xff] }
 0x266   :  { %v1362_v28 = vadd.f32 %v4863_v30, %v7826_v11  ;;  %5164 = vmatprep.mubr.f32.mxu0 %v6498_v14  ;;  %5220 = vmatprep.mubr.f32.mxu1 %v7828_v58  ;;  %v6809_v53 = vadd.f32 %v1645_v60, %v1341_v43  ;;  %v7832_v60 = vand.u32 4294901760, %v6564_v6  ;;  %v7834_v30 = vand.u32 4294901760, %v6596_v0 }
 0x267   :  { %v1354_v41 = vpop.f32.mrf.mxu0  ;;  %v1693_v35 = vpop.f32.mrf.mxu1 }
 0x268   :  { %v1355_v23 = vadd.f32 %v1354_v41, %v7829_v54  ;;  %v6812_v51 = vadd.f32 %v4913_v46, %v1362_v28  ;;  %v7833_v46 = vld [vmem:[#allocation41_spill] sm:$0xff] }
 0x269   :  { %v4866_v22 = vpop.f32.mrf.mxu0  ;;  %v4922_v48 = vpop.f32.mrf.mxu1  ;;  %5165 = vmatmul.mubr.f32.gmra.mxu0 %v7819_v32  ;;  %5221 = vmatmul.mubr.f32.gmra.mxu1 %v7830_v4  ;;  %v7839_v4 = vld [vmem:[#allocation53_spill] sm:$0xff] }
 0x26a   :  { %v1376_v14 = vadd.f32 %v4866_v22, %v7831_v38  ;;  %5167 = vmatprep.mubr.f32.mxu0 %v6529_v27  ;;  %5223 = vmatprep.mubr.f32.mxu1 %v7832_v60  ;;  %v6821_v18 = vadd.f32 %v1661_v21, %v1355_v23  ;;  %v7836_v21 = vand.u32 4294901760, %v6599_v40  ;;  %v7838_v22 = vand.u32 4294901760, %v6620_v31 }
 0x26b   :  { %v1368_v2 = vpop.f32.mrf.mxu0  ;;  %v1709_v26 = vpop.f32.mrf.mxu1 }
 0x26c   :  { %v1369_v8 = vadd.f32 %v1368_v2, %v7833_v46  ;;  %v6824_v52 = vadd.f32 %v4916_v59, %v1376_v14  ;;  %v7837_v59 = vld [vmem:[#allocation48_spill] sm:$0xff] }
 0x26d   :  { %v4869_v43 = vpop.f32.mrf.mxu0  ;;  %v4925_v32 = vpop.f32.mrf.mxu1  ;;  %5168 = vmatmul.mubr.f32.gmra.mxu0 %v7824_v50  ;;  %5224 = vmatmul.mubr.f32.gmra.mxu1 %v7834_v30 }
 0x26e   :  { %v1390_v27 = vadd.f32 %v4869_v43, %v7835_v10  ;;  %5170 = vmatprep.mubr.f32.mxu0 %v7827_v3  ;;  %5226 = vmatprep.mubr.f32.mxu1 %v7836_v21  ;;  %v6833_v11 = vadd.f32 %v1677_v12, %v1369_v8  ;;  %v7840_v12 = vand.u32 4294901760, %v6625_v61  ;;  %v7842_v43 = vand.u32 4294901760, %v6639_v34 }
 0x26f   :  { %v1382_v28 = vpop.f32.mrf.mxu0  ;;  %v1725_v58 = vpop.f32.mrf.mxu1 }
 0x270   :  { %v1383_v41 = vadd.f32 %v1382_v28, %v7837_v59  ;;  %v6836_v54 = vadd.f32 %v4919_v19, %v1390_v27  ;;  %v7841_v19 = vld [vmem:[#allocation56_spill] sm:$0xff] }
 0x271   :  { %v4872_v23 = vpop.f32.mrf.mxu0  ;;  %v4928_v50 = vpop.f32.mrf.mxu1  ;;  %5171 = vmatmul.mubr.f32.gmra.mxu0 %v6561_v56  ;;  %5227 = vmatmul.mubr.f32.gmra.mxu1 %v7838_v22  ;;  %v7846_v22 = vld [vmem:[#allocation62_spill] sm:$0xff] }
 0x272   :  { %v1404_v3 = vadd.f32 %v4872_v23, %v7839_v4  ;;  %5173 = vmatprep.mubr.f32.mxu0 %v6564_v6  ;;  %5229 = vmatprep.mubr.f32.mxu1 %v7840_v12  ;;  %v6845_v38 = vadd.f32 %v1693_v35, %v1383_v41  ;;  %v7843_v35 = vand.u32 4294901760, %v6645_v25 }
 0x273   :  { %v1396_v14 = vpop.f32.mrf.mxu0  ;;  %v1741_v60 = vpop.f32.mrf.mxu1 }
 0x274   :  { %v1397_v2 = vadd.f32 %v1396_v14, %v7841_v19  ;;  %v6848_v46 = vadd.f32 %v4922_v48, %v1404_v3  ;;  %v7844_v48 = vld [vmem:[#allocation60_spill] sm:$0xff] }
 0x275   :  { %v4875_v8 = vpop.f32.mrf.mxu0  ;;  %v4931_v56 = vpop.f32.mrf.mxu1  ;;  %5174 = vmatmul.mubr.f32.gmra.mxu0 %v6596_v0  ;;  %5230 = vmatmul.mubr.f32.gmra.mxu1 %v7842_v43 }
 0x276   :  { %v1418_v6 = vadd.f32 %v4875_v8, %v6611_v1  ;;  %5176 = vmatprep.mubr.f32.mxu0 %v6599_v40  ;;  %5232 = vmatprep.mubr.f32.mxu1 %v7843_v35  ;;  %v6857_v30 = vadd.f32 %v1709_v26, %v1397_v2  ;;  %v7845_v40 = vld [vmem:[#allocation9_spill] sm:$0xff] }
 0x277   :  { %v1410_v10 = vpop.f32.mrf.mxu0  ;;  %v1757_v27 = vpop.f32.mrf.mxu1 }
 0x278   :  { %v1411_v21 = vadd.f32 %v1410_v10, %v7844_v48  ;;  %v6860_v28 = vadd.f32 %v4925_v32, %v1418_v6  ;;  %v7852_v48 = vld [vmem:[#allocation17_spill] sm:$0xff] }
 0x279   :  { %v4878_v59 = vpop.f32.mrf.mxu0  ;;  %v4934_v0 = vpop.f32.mrf.mxu1  ;;  %5177 = vmatmul.mubr.f32.gmra.mxu0 %v6620_v31  ;;  %5233 = vmatmul.mubr.f32.gmra.mxu1 %v2846_v7  ;;  %v7847_v31 = vld [vmem:[#allocation10_spill] sm:$0xff] }
 0x27a   :  { %v1432_v1 = vadd.f32 %v4878_v59, %v6651_v17  ;;  %5179 = vmatprep.mubr.f32.mxu0 %v6625_v61  ;;  %5287 = vmatprep.mubr.f32.mxu1 %v7845_v40  ;;  %v6868_v26 = vadd.f32 %v1725_v58, %v1411_v21  ;;  %v7848_v61 = vld [vmem:[#allocation12_spill] sm:$0xff] }
 0x27b   :  { %v1424_v41 = vpop.f32.mrf.mxu0  ;;  %v1773_v23 = vpop.f32.mrf.mxu1 }
 0x27c   :  { %v1425_v32 = vadd.f32 %v1424_v41, %v7846_v22  ;;  %v6871_v4 = vadd.f32 %v4928_v50, %v1432_v1  ;;  %v7853_v41 = vld [vmem:[#allocation19_spill] sm:$0xff] }
 0x27d   :  { %v4881_v3 = vpop.f32.mrf.mxu0  ;;  %v4989_v12 = vpop.f32.mrf.mxu1  ;;  %5180 = vmatmul.mubr.f32.gmra.mxu0 %v6639_v34  ;;  %5288 = vmatmul.mubr.f32.vlgmr.msra.gmra.mxu1 %v7847_v31  ;;  %v7849_v34 = vld [vmem:[#allocation13_spill] sm:$0xff] }
 0x27e   :  { %v1446_v17 = vadd.f32 %v4881_v3, %v6677_v62  ;;  %5182 = vmatprep.mubr.f32.mxu0 %v6645_v25  ;;  %5290 = vmatprep.mubr.f32.mxu1 %v7848_v61  ;;  %v6878_v7 = vadd.f32 %v1741_v60, %v1425_v32  ;;  %v7850_v25 = vld [vmem:[#allocation16_spill] sm:$0xff] }
 0x27f   :  { %v1438_v58 = vpop.f32.mrf.mxu0  ;;  %v2113_v14 = vpop.f32.mrf.mxu1 }
 0x280   :  { %v1439_v19 = vadd.f32 %v1438_v58, %v6684_v20  ;;  %v6881_v50 = vadd.f32 %v4931_v56, %v1446_v17 }
 0x281   :  { %v4884_v2 = vpop.f32.mrf.mxu0  ;;  %v4992_v8 = vpop.f32.mrf.mxu1  ;;  %5183 = vmatmul.mubr.f32.gmra.mxu0 %v6659_v57  ;;  %5291 = vmatmul.mubr.f32.gmra.mxu1 %v7849_v34  ;;  %v7851_v57 = vld [vmem:[#allocation21_spill] sm:$0xff] }
 0x282   :  { %v1460_v62 = vadd.f32 %v4884_v2, %v6693_v45  ;;  %5237 = vmatprep.mubr.f32.mxu0 %v7845_v40  ;;  %5293 = vmatprep.mubr.f32.mxu1 %v7850_v25  ;;  %v6888_v60 = vadd.f32 %v1757_v27, %v1439_v19 }
 0x283   :  { %v1452_v43 = vpop.f32.mrf.mxu0  ;;  %v2125_v6 = vpop.f32.mrf.mxu1 }
 0x284   :  { %v1453_v20 = vadd.f32 %v1452_v43, %v6698_v24  ;;  %v6891_v56 = vadd.f32 %v4934_v0, %v1460_v62 }
 0x285   :  { %v4939_v35 = vpop.f32.mrf.mxu0  ;;  %v4995_v10 = vpop.f32.mrf.mxu1  ;;  %5238 = vmatmul.mubr.f32.vlgmr.msra.gmra.mxu0 %v7847_v31  ;;  %5294 = vmatmul.mubr.f32.gmra.mxu1 %v7851_v57 }
 0x286   :  { %v1862_v45 = vadd.f32 %v4939_v35, %v6710_v36  ;;  %5240 = vmatprep.mubr.f32.mxu0 %v7848_v61  ;;  %5296 = vmatprep.mubr.f32.mxu1 %v7852_v48  ;;  %v6898_v27 = vadd.f32 %v1773_v23, %v1453_v20  ;;  %v7854_v23 = vld [vmem:[#allocation20_spill] sm:$0xff]  ;;  %v7855_v61 = vld [vmem:[#allocation23_spill] sm:$0xff] }
 0x287   :  { %v1855_v21 = vpop.f32.mrf.mxu0  ;;  %v2137_v59 = vpop.f32.mrf.mxu1 }
 0x288   :  { %v6900_v1 = vadd.f32 %v4989_v12, %v1862_v45  ;;  %v1856_v24 = vadd.f32 %v1855_v21, %v6721_v42 }
 0x289   :  { %v4942_v0 = vpop.f32.mrf.mxu0  ;;  %v4998_v40 = vpop.f32.mrf.mxu1  ;;  %5241 = vmatmul.mubr.f32.gmra.mxu0 %v7849_v34  ;;  %5297 = vmatmul.mubr.f32.gmra.mxu1 %v7853_v41 }
 0x28a   :  { %v6905_v22 = vadd.f32 %v2113_v14, %v1856_v24  ;;  %v1874_v36 = vadd.f32 %v4942_v0, %v6723_v33  ;;  %5243 = vmatprep.mubr.f32.mxu0 %v7850_v25  ;;  %5299 = vmatprep.mubr.f32.mxu1 %v7854_v23  ;;  %v7856_v14 = vld [vmem:[#allocation26_spill] sm:$0xff]  ;;  %v7857_v25 = vld [vmem:[#allocation29_spill] sm:$0xff] }
 0x28b   :  { %v1867_v32 = vpop.f32.mrf.mxu0  ;;  %v2149_v3 = vpop.f32.mrf.mxu1 }
 0x28c   :  { %v6910_v12 = vadd.f32 %v4992_v8, %v1874_v36  ;;  %v1868_v42 = vadd.f32 %v1867_v32, %v6734_v5 }
 0x28d   :  { %v4945_v31 = vpop.f32.mrf.mxu0  ;;  %v5001_v17 = vpop.f32.mrf.mxu1  ;;  %5244 = vmatmul.mubr.f32.gmra.mxu0 %v7851_v57  ;;  %5300 = vmatmul.mubr.f32.gmra.mxu1 %v7855_v61 }
 0x28e   :  { %v6915_v58 = vadd.f32 %v2125_v6, %v1868_v42  ;;  %v1886_v33 = vadd.f32 %v4945_v31, %v6736_v29  ;;  %5246 = vmatprep.mubr.f32.mxu0 %v7852_v48  ;;  %5302 = vmatprep.mubr.f32.mxu1 %v7856_v14  ;;  %v7858_v6 = vld [vmem:[#allocation30_spill] sm:$0xff]  ;;  %v7859_v48 = vld [vmem:[#allocation24_spill] sm:$0xff] }
 0x28f   :  { %v1879_v19 = vpop.f32.mrf.mxu0  ;;  %v2161_v2 = vpop.f32.mrf.mxu1 }
 0x290   :  { %v6920_v8 = vadd.f32 %v4995_v10, %v1886_v33  ;;  %v1880_v5 = vadd.f32 %v1879_v19, %v6747_v55 }
 0x291   :  { %v4948_v34 = vpop.f32.mrf.mxu0  ;;  %v5004_v62 = vpop.f32.mrf.mxu1  ;;  %5247 = vmatmul.mubr.f32.gmra.mxu0 %v7853_v41  ;;  %5303 = vmatmul.mubr.f32.gmra.mxu1 %v7857_v25 }
 0x292   :  { %v6925_v43 = vadd.f32 %v2137_v59, %v1880_v5  ;;  %v1898_v29 = vadd.f32 %v4948_v34, %v6749_v37  ;;  %5249 = vmatprep.mubr.f32.mxu0 %v7854_v23  ;;  %5305 = vmatprep.mubr.f32.mxu1 %v7858_v6  ;;  %v7860_v59 = vld [vmem:[#allocation32_spill] sm:$0xff]  ;;  %v7861_v23 = vld [vmem:[#allocation34_spill] sm:$0xff] }
 0x293   :  { %v1891_v20 = vpop.f32.mrf.mxu0  ;;  %v2173_v35 = vpop.f32.mrf.mxu1 }
 0x294   :  { %v6930_v10 = vadd.f32 %v4998_v40, %v1898_v29  ;;  %v1892_v55 = vadd.f32 %v1891_v20, %v6760_v44 }
 0x295   :  { %v4951_v57 = vpop.f32.mrf.mxu0  ;;  %v5007_v45 = vpop.f32.mrf.mxu1  ;;  %5250 = vmatmul.mubr.f32.gmra.mxu0 %v7855_v61  ;;  %5306 = vmatmul.mubr.f32.gmra.mxu1 %v7859_v48 }
 0x296   :  { %v6935_v21 = vadd.f32 %v2149_v3, %v1892_v55  ;;  %v1910_v37 = vadd.f32 %v4951_v57, %v6762_v39  ;;  %5252 = vmatprep.mubr.f32.mxu0 %v7856_v14  ;;  %5308 = vmatprep.mubr.f32.mxu1 %v7860_v59  ;;  %v7863_v3 = vld [vmem:[#allocation35_spill] sm:$0xff] }
 0x297   :  { %v1903_v24 = vpop.f32.mrf.mxu0  ;;  %v2185_v0 = vpop.f32.mrf.mxu1  ;;  %v7865_v14 = vld [vmem:[#allocation39_spill] sm:$0xff] }
 0x298   :  { %v6940_v40 = vadd.f32 %v5001_v17, %v1910_v37  ;;  %v1904_v44 = vadd.f32 %v1903_v24, %v6773_v9 }
 0x299   :  { %v4954_v41 = vpop.f32.mrf.mxu0  ;;  %v5010_v36 = vpop.f32.mrf.mxu1  ;;  %5253 = vmatmul.mubr.f32.gmra.mxu0 %v7857_v25  ;;  %5309 = vmatmul.mubr.f32.gmra.mxu1 %v7861_v23 }
 0x29a   :  { %v6945_v32 = vadd.f32 %v2161_v2, %v1904_v44  ;;  %v1922_v39 = vadd.f32 %v4954_v41, %v6775_v16  ;;  %5255 = vmatprep.mubr.f32.mxu0 %v7858_v6  ;;  %5311 = vmatprep.mubr.f32.mxu1 %v7863_v3  ;;  %v7867_v2 = vld [vmem:[#allocation40_spill] sm:$0xff]  ;;  %v7869_v6 = vld [vmem:[#allocation42_spill] sm:$0xff] }
 0x29b   :  { %v1915_v42 = vpop.f32.mrf.mxu0  ;;  %v2197_v31 = vpop.f32.mrf.mxu1 }
 0x29c   :  { %7862 = vst [vmem:[#allocation8_spill] sm:$0xff] %v6945_v32  ;;  %v6950_v17 = vadd.f32 %v5004_v62, %v1922_v39  ;;  %v1916_v9 = vadd.f32 %v1915_v42, %v6786_v49 }
 0x29d   :  { %v4957_v61 = vpop.f32.mrf.mxu0  ;;  %v5013_v33 = vpop.f32.mrf.mxu1  ;;  %5256 = vmatmul.mubr.f32.gmra.mxu0 %v7859_v48  ;;  %5312 = vmatmul.mubr.f32.gmra.mxu1 %v7865_v14 }
 0x29e   :  { %7864 = vst [vmem:[#allocation36_spill] sm:$0xff] %v6950_v17  ;;  %v6955_v19 = vadd.f32 %v2173_v35, %v1916_v9  ;;  %v1934_v16 = vadd.f32 %v4957_v61, %v6788_v47  ;;  %5258 = vmatprep.mubr.f32.mxu0 %v7860_v59  ;;  %5314 = vmatprep.mubr.f32.mxu1 %v7867_v2  ;;  %v7871_v35 = vld [vmem:[#allocation43_spill] sm:$0xff]  ;;  %v7873_v59 = vld [vmem:[#allocation44_spill] sm:$0xff] }
 0x29f   :  { %v1927_v5 = vpop.f32.mrf.mxu0  ;;  %v2209_v34 = vpop.f32.mrf.mxu1 }
 0x2a0   :  { %7866 = vst [vmem:[#allocation15_spill] sm:$0xff] %v6955_v19  ;;  %v6960_v62 = vadd.f32 %v5007_v45, %v1934_v16  ;;  %v1928_v49 = vadd.f32 %v1927_v5, %v6797_v13 }
 0x2a1   :  { %v4960_v25 = vpop.f32.mrf.mxu0  ;;  %v5016_v29 = vpop.f32.mrf.mxu1  ;;  %5259 = vmatmul.mubr.f32.gmra.mxu0 %v7861_v23  ;;  %5315 = vmatmul.mubr.f32.gmra.mxu1 %v7869_v6 }
 0x2a2   :  { %7868 = vst [vmem:[#allocation14_spill] sm:$0xff] %v6960_v62  ;;  %v6965_v20 = vadd.f32 %v2185_v0, %v1928_v49  ;;  %v1946_v47 = vadd.f32 %v4960_v25, %v6800_v63  ;;  %5261 = vmatprep.mubr.f32.mxu0 %v7863_v3  ;;  %5317 = vmatprep.mubr.f32.mxu1 %v7871_v35  ;;  %v7875_v0 = vld [vmem:[#allocation45_spill] sm:$0xff]  ;;  %v7877_v3 = vld [vmem:[#allocation51_spill] sm:$0xff] }
 0x2a3   :  { %v1939_v55 = vpop.f32.mrf.mxu0  ;;  %v2221_v57 = vpop.f32.mrf.mxu1 }
 0x2a4   :  { %7870 = vst [vmem:[#allocation11_spill] sm:$0xff] %v6965_v20  ;;  %v6970_v45 = vadd.f32 %v5010_v36, %v1946_v47  ;;  %v1940_v13 = vadd.f32 %v1939_v55, %v6809_v53 }
 0x2a5   :  { %v4963_v48 = vpop.f32.mrf.mxu0  ;;  %v5019_v37 = vpop.f32.mrf.mxu1  ;;  %5262 = vmatmul.mubr.f32.gmra.mxu0 %v7865_v14  ;;  %5318 = vmatmul.mubr.f32.gmra.mxu1 %v7873_v59 }
 0x2a6   :  { %7872 = vst [vmem:[#allocation37_spill] sm:$0xff] %v6970_v45  ;;  %v6975_v24 = vadd.f32 %v2197_v31, %v1940_v13  ;;  %v1958_v63 = vadd.f32 %v4963_v48, %v6812_v51  ;;  %5264 = vmatprep.mubr.f32.mxu0 %v7867_v2  ;;  %5320 = vmatprep.mubr.f32.mxu1 %v7875_v0  ;;  %v7879_v31 = vld [vmem:[#allocation52_spill] sm:$0xff]  ;;  %v7881_v2 = vld [vmem:[#allocation54_spill] sm:$0xff] }
 0x2a7   :  { %v1951_v44 = vpop.f32.mrf.mxu0  ;;  %v2233_v41 = vpop.f32.mrf.mxu1 }
 0x2a8   :  { %7874 = vst [vmem:[#allocation22_spill] sm:$0xff] %v6975_v24  ;;  %v6980_v36 = vadd.f32 %v5013_v33, %v1958_v63  ;;  %v1952_v53 = vadd.f32 %v1951_v44, %v6821_v18 }
 0x2a9   :  { %v4966_v23 = vpop.f32.mrf.mxu0  ;;  %v5022_v39 = vpop.f32.mrf.mxu1  ;;  %5265 = vmatmul.mubr.f32.gmra.mxu0 %v7869_v6  ;;  %5321 = vmatmul.mubr.f32.gmra.mxu1 %v7877_v3 }
 0x2aa   :  { %7876 = vst [vmem:[#allocation18_spill] sm:$0xff] %v6980_v36  ;;  %v6985_v42 = vadd.f32 %v2209_v34, %v1952_v53  ;;  %v1970_v51 = vadd.f32 %v4966_v23, %v6824_v52  ;;  %5267 = vmatprep.mubr.f32.mxu0 %v7871_v35  ;;  %5323 = vmatprep.mubr.f32.mxu1 %v7879_v31  ;;  %v7883_v34 = vld [vmem:[#allocation55_spill] sm:$0xff]  ;;  %v7885_v35 = vld [vmem:[#allocation57_spill] sm:$0xff] }
 0x2ab   :  { %v1963_v9 = vpop.f32.mrf.mxu0  ;;  %v2245_v61 = vpop.f32.mrf.mxu1 }
 0x2ac   :  { %7878 = vst [vmem:[#allocation25_spill] sm:$0xff] %v6985_v42  ;;  %v6990_v33 = vadd.f32 %v5016_v29, %v1970_v51  ;;  %v1964_v18 = vadd.f32 %v1963_v9, %v6833_v11 }
 0x2ad   :  { %v4969_v14 = vpop.f32.mrf.mxu0  ;;  %v5025_v16 = vpop.f32.mrf.mxu1  ;;  %5268 = vmatmul.mubr.f32.gmra.mxu0 %v7873_v59  ;;  %5324 = vmatmul.mubr.f32.gmra.mxu1 %v7881_v2 }
 0x2ae   :  { %7880 = vst [vmem:[#allocation47_spill] sm:$0xff] %v6990_v33  ;;  %v6995_v5 = vadd.f32 %v2221_v57, %v1964_v18  ;;  %v1982_v52 = vadd.f32 %v4969_v14, %v6836_v54  ;;  %5270 = vmatprep.mubr.f32.mxu0 %v7875_v0  ;;  %5326 = vmatprep.mubr.f32.mxu1 %v7883_v34  ;;  %v7887_v57 = vld [vmem:[#allocation58_spill] sm:$0xff]  ;;  %v7889_v0 = vld [vmem:[#allocation59_spill] sm:$0xff] }
 0x2af   :  { %v1975_v49 = vpop.f32.mrf.mxu0  ;;  %v2257_v25 = vpop.f32.mrf.mxu1 }
 0x2b0   :  { %7882 = vst [vmem:[#allocation27_spill] sm:$0xff] %v6995_v5  ;;  %v7000_v29 = vadd.f32 %v5019_v37, %v1982_v52  ;;  %v1976_v11 = vadd.f32 %v1975_v49, %v6845_v38 }
 0x2b1   :  { %v4972_v6 = vpop.f32.mrf.mxu0  ;;  %v5028_v47 = vpop.f32.mrf.mxu1  ;;  %5271 = vmatmul.mubr.f32.gmra.mxu0 %v7877_v3  ;;  %5327 = vmatmul.mubr.f32.gmra.mxu1 %v7885_v35 }
 0x2b2   :  { %7884 = vst [vmem:[#allocation28_spill] sm:$0xff] %v7000_v29  ;;  %v7005_v55 = vadd.f32 %v2233_v41, %v1976_v11  ;;  %v1994_v54 = vadd.f32 %v4972_v6, %v6848_v46  ;;  %5273 = vmatprep.mubr.f32.mxu0 %v7879_v31  ;;  %5329 = vmatprep.mubr.f32.mxu1 %v7887_v57  ;;  %v7891_v41 = vld [vmem:[#allocation61_spill] sm:$0xff] }
 0x2b3   :  { %v1987_v13 = vpop.f32.mrf.mxu0  ;;  %v2269_v48 = vpop.f32.mrf.mxu1 }
 0x2b4   :  { %7886 = vst [vmem:[#allocation49_spill] sm:$0xff] %v7005_v55  ;;  %v7010_v37 = vadd.f32 %v5022_v39, %v1994_v54  ;;  %v1988_v38 = vadd.f32 %v1987_v13, %v6857_v30 }
 0x2b5   :  { %v4975_v59 = vpop.f32.mrf.mxu0  ;;  %v5031_v63 = vpop.f32.mrf.mxu1  ;;  %5274 = vmatmul.mubr.f32.gmra.mxu0 %v7881_v2  ;;  %5330 = vmatmul.mubr.f32.gmra.mxu1 %v7889_v0 }
 0x2b6   :  { %7888 = vst [vmem:[#allocation31_spill] sm:$0xff] %v7010_v37  ;;  %v7015_v44 = vadd.f32 %v2245_v61, %v1988_v38  ;;  %v2006_v46 = vadd.f32 %v4975_v59, %v6860_v28  ;;  %5276 = vmatprep.mubr.f32.mxu0 %v7883_v34  ;;  %5332 = vmatprep.mubr.f32.mxu1 %v7891_v41 }
 0x2b7   :  { %v1999_v53 = vpop.f32.mrf.mxu0  ;;  %v2281_v23 = vpop.f32.mrf.mxu1 }
 0x2b8   :  { %7890 = vst [vmem:[#allocation50_spill] sm:$0xff] %v7015_v44  ;;  %v7020_v39 = vadd.f32 %v5025_v16, %v2006_v46  ;;  %v2000_v30 = vadd.f32 %v1999_v53, %v6868_v26 }
 0x2b9   :  { %v4978_v3 = vpop.f32.mrf.mxu0  ;;  %v5034_v51 = vpop.f32.mrf.mxu1  ;;  %5277 = vmatmul.mubr.f32.gmra.mxu0 %v7885_v35  ;;  %5333 = vmatmul.mubr.f32.gmra.mxu1 %v6641_v15 }
 0x2ba   :  { %7892 = vst [vmem:[#allocation33_spill] sm:$0xff] %v7020_v39  ;;  %v7025_v31 = vadd.f32 %v2257_v25, %v2000_v30  ;;  %v2018_v28 = vadd.f32 %v4978_v3, %v6871_v4  ;;  %5279 = vmatprep.mubr.f32.mxu0 %v7887_v57 }
 0x2bb   :  { %v2011_v9 = vpop.f32.mrf.mxu0  ;;  %v2293_v61 = vpop.f32.mrf.mxu1 }
 0x2bc   :  { %7893 = vst [vmem:[#allocation38_spill] sm:$0xff] %v7025_v31  ;;  %v7029_v18 = vadd.f32 %v5028_v47, %v2018_v28  ;;  %v2012_v14 = vadd.f32 %v2011_v9, %v6878_v7 }
 0x2bd   :  { %v4981_v16 = vpop.f32.mrf.mxu0  ;;  %v5089_v26 = vpop.f32.mrf.mxu1  ;;  %5280 = vmatmul.mubr.f32.gmra.mxu0 %v7889_v0 }
 0x2be   :  { %7894 = vst [vmem:[#allocation41_spill] sm:$0xff] %v7029_v18  ;;  %v7033_v2 = vadd.f32 %v2269_v48, %v2012_v14  ;;  %v2030_v52 = vadd.f32 %v4981_v16, %v6881_v50  ;;  %5282 = vmatprep.mubr.f32.mxu0 %v7891_v41 }
 0x2bf   :  { %v2023_v34 = vpop.f32.mrf.mxu0  ;;  %v2926_v4 = vpop.f32.mrf.mxu1 }
 0x2c0   :  { %7895 = vst [vmem:[#allocation46_spill] sm:$0xff] %v7033_v2  ;;  %v7037_v49 = vadd.f32 %v5031_v63, %v2030_v52  ;;  %v2024_v25 = vadd.f32 %v2023_v34, %v6888_v60 }
 0x2c1   :  { %v4984_v11 = vpop.f32.mrf.mxu0  ;;  %v5092_v6 = vpop.f32.mrf.mxu1  ;;  %5283 = vmatmul.mubr.f32.gmra.mxu0 %v6641_v15 }
 0x2c2   :  { %7896 = vst [vmem:[#allocation48_spill] sm:$0xff] %v7037_v49  ;;  %v7041_v7 = vadd.f32 %v2281_v23, %v2024_v25  ;;  %v2042_v47 = vadd.f32 %v4984_v11, %v6891_v56 }
 0x2c3   :  { %v2035_v35 = vpop.f32.mrf.mxu0  ;;  %v2938_v54 = vpop.f32.mrf.mxu1 }
 0x2c4   :  { %7897 = vst [vmem:[#allocation53_spill] sm:$0xff] %v7041_v7  ;;  %v7044_v57 = vadd.f32 %v5034_v51, %v2042_v47  ;;  %v2036_v50 = vadd.f32 %v2035_v35, %v6898_v27 }
 0x2c5   :  { %v5039_v13 = vpop.f32.mrf.mxu0  ;;  %v5095_v48 = vpop.f32.mrf.mxu1 }
 0x2c6   :  { %7898 = vst [vmem:[#allocation56_spill] sm:$0xff] %v7044_v57  ;;  %v7047_v38 = vadd.f32 %v2293_v61, %v2036_v50  ;;  %v7049_v59 = vadd.f32 %v5089_v26, %v5039_v13 }
 0x2c7   :  { %v2540_v60 = vpop.f32.mrf.mxu0  ;;  %v2950_v63 = vpop.f32.mrf.mxu1 }
 0x2c8   :  { %7899 = vst [vmem:[#allocation60_spill] sm:$0xff] %v7047_v38  ;;  %v7051_v0 = vadd.f32 %v2926_v4, %v2540_v60 }
 0x2c9   :  { %v5042_v15 = vpop.f32.mrf.mxu0  ;;  %v5098_v46 = vpop.f32.mrf.mxu1 }
 0x2ca   :  { %v7053_v41 = vadd.f32 %v5092_v6, %v5042_v15 }
 0x2cb   :  { %v2560_v56 = vpop.f32.mrf.mxu0  ;;  %v2962_v53 = vpop.f32.mrf.mxu1 }
 0x2cc   :  { %v7055_v23 = vadd.f32 %v2938_v54, %v2560_v56 }
 0x2cd   :  { %v5045_v30 = vpop.f32.mrf.mxu0  ;;  %v5101_v27 = vpop.f32.mrf.mxu1 }
 0x2ce   :  { %v7057_v3 = vadd.f32 %v5095_v48, %v5045_v30 }
 0x2cf   :  { %v2580_v51 = vpop.f32.mrf.mxu0  ;;  %v2974_v28 = vpop.f32.mrf.mxu1 }
 0x2d0   :  { %v7059_v9 = vadd.f32 %v2950_v63, %v2580_v51 }
 0x2d1   :  { %v5048_v61 = vpop.f32.mrf.mxu0  ;;  %v5104_v14 = vpop.f32.mrf.mxu1 }
 0x2d2   :  { %v7061_v16 = vadd.f32 %v5098_v46, %v5048_v61 }
 0x2d3   :  { %v2600_v26 = vpop.f32.mrf.mxu0  ;;  %v2986_v52 = vpop.f32.mrf.mxu1 }
 0x2d4   :  { %v7063_v34 = vadd.f32 %v2962_v53, %v2600_v26 }
 0x2d5   :  { %v5051_v4 = vpop.f32.mrf.mxu0  ;;  %v5107_v25 = vpop.f32.mrf.mxu1 }
 0x2d6   :  { %v7065_v11 = vadd.f32 %v5101_v27, %v5051_v4 }
 0x2d7   :  { %v2620_v6 = vpop.f32.mrf.mxu0  ;;  %v2998_v47 = vpop.f32.mrf.mxu1 }
 0x2d8   :  { %v7067_v35 = vadd.f32 %v2974_v28, %v2620_v6 }
 0x2d9   :  { %v5054_v54 = vpop.f32.mrf.mxu0  ;;  %v5110_v50 = vpop.f32.mrf.mxu1 }
 0x2da   :  { %v7069_v13 = vadd.f32 %v5104_v14, %v5054_v54 }
 0x2db   :  { %v2640_v48 = vpop.f32.mrf.mxu0  ;;  %v3010_v60 = vpop.f32.mrf.mxu1 }
 0x2dc   :  { %v7071_v63 = vadd.f32 %v2986_v52, %v2640_v48 }
 0x2dd   :  { %v5057_v15 = vpop.f32.mrf.mxu0  ;;  %v5113_v46 = vpop.f32.mrf.mxu1 }
 0x2de   :  { %v7073_v56 = vadd.f32 %v5107_v25, %v5057_v15 }
 0x2df   :  { %v2660_v53 = vpop.f32.mrf.mxu0  ;;  %v3022_v30 = vpop.f32.mrf.mxu1 }
 0x2e0   :  { %v7075_v27 = vadd.f32 %v2998_v47, %v2660_v53 }
 0x2e1   :  { %v5060_v51 = vpop.f32.mrf.mxu0  ;;  %v5116_v61 = vpop.f32.mrf.mxu1 }
 0x2e2   :  { %v7077_v28 = vadd.f32 %v5110_v50, %v5060_v51 }
 0x2e3   :  { %v2680_v26 = vpop.f32.mrf.mxu0  ;;  %v3034_v4 = vpop.f32.mrf.mxu1 }
 0x2e4   :  { %7900 = vst [vmem:[#allocation9_spill] sm:$0xff] %v7077_v28  ;;  %v7079_v14 = vadd.f32 %v3010_v60, %v2680_v26 }
 0x2e5   :  { %v5063_v6 = vpop.f32.mrf.mxu0  ;;  %v5119_v54 = vpop.f32.mrf.mxu1 }
 0x2e6   :  { %7901 = vst [vmem:[#allocation62_spill] sm:$0xff] %v7079_v14  ;;  %v7081_v52 = vadd.f32 %v5113_v46, %v5063_v6 }
 0x2e7   :  { %v2700_v48 = vpop.f32.mrf.mxu0  ;;  %v3046_v38 = vpop.f32.mrf.mxu1 }
 0x2e8   :  { %7902 = vst [vmem:[#allocation10_spill] sm:$0xff] %v7081_v52  ;;  %v7083_v25 = vadd.f32 %v3022_v30, %v2700_v48 }
 0x2e9   :  { %v5066_v15 = vpop.f32.mrf.mxu0  ;;  %v5122_v57 = vpop.f32.mrf.mxu1 }
 0x2ea   :  { %7903 = vst [vmem:[#allocation12_spill] sm:$0xff] %v7083_v25  ;;  %v7085_v47 = vadd.f32 %v5116_v61, %v5066_v15 }
 0x2eb   :  { %v2720_v53 = vpop.f32.mrf.mxu0  ;;  %v3058_v7 = vpop.f32.mrf.mxu1 }
 0x2ec   :  { %7904 = vst [vmem:[#allocation13_spill] sm:$0xff] %v7085_v47  ;;  %v7087_v50 = vadd.f32 %v3034_v4, %v2720_v53 }
 0x2ed   :  { %v5069_v51 = vpop.f32.mrf.mxu0  ;;  %v5125_v49 = vpop.f32.mrf.mxu1 }
 0x2ee   :  { %7905 = vst [vmem:[#allocation16_spill] sm:$0xff] %v7087_v50  ;;  %v7089_v60 = vadd.f32 %v5119_v54, %v5069_v51 }
 0x2ef   :  { %v2740_v26 = vpop.f32.mrf.mxu0  ;;  %v3070_v2 = vpop.f32.mrf.mxu1 }
 0x2f0   :  { %7906 = vst [vmem:[#allocation21_spill] sm:$0xff] %v7089_v60  ;;  %v7091_v46 = vadd.f32 %v3046_v38, %v2740_v26 }
 0x2f1   :  { %v5072_v6 = vpop.f32.mrf.mxu0  ;;  %v5128_v18 = vpop.f32.mrf.mxu1 }
 0x2f2   :  { %7907 = vst [vmem:[#allocation17_spill] sm:$0xff] %v7091_v46  ;;  %v7093_v30 = vadd.f32 %v5122_v57, %v5072_v6 }
 0x2f3   :  { %v2760_v48 = vpop.f32.mrf.mxu0  ;;  %v3082_v31 = vpop.f32.mrf.mxu1 }
 0x2f4   :  { %7908 = vst [vmem:[#allocation19_spill] sm:$0xff] %v7093_v30  ;;  %v7095_v61 = vadd.f32 %v3058_v7, %v2760_v48 }
 0x2f5   :  { %v5075_v15 = vpop.f32.mrf.mxu0  ;;  %v5131_v39 = vpop.f32.mrf.mxu1 }
 0x2f6   :  { %7909 = vst [vmem:[#allocation20_spill] sm:$0xff] %v7095_v61  ;;  %v7097_v4 = vadd.f32 %v5125_v49, %v5075_v15 }
 0x2f7   :  { %v2780_v53 = vpop.f32.mrf.mxu0  ;;  %v3094_v44 = vpop.f32.mrf.mxu1 }
 0x2f8   :  { %7910 = vst [vmem:[#allocation23_spill] sm:$0xff] %v7097_v4  ;;  %v7099_v54 = vadd.f32 %v3070_v2, %v2780_v53 }
 0x2f9   :  { %v5078_v51 = vpop.f32.mrf.mxu0  ;;  %v5134_v37 = vpop.f32.mrf.mxu1 }
 0x2fa   :  { %7911 = vst [vmem:[#allocation26_spill] sm:$0xff] %v7099_v54  ;;  %v7101_v38 = vadd.f32 %v5128_v18, %v5078_v51 }
 0x2fb   :  { %v2800_v26 = vpop.f32.mrf.mxu0  ;;  %v3106_v55 = vpop.f32.mrf.mxu1 }
 0x2fc   :  { %7912 = vst [vmem:[#allocation29_spill] sm:$0xff] %v7101_v38  ;;  %v7103_v57 = vadd.f32 %v3082_v31, %v2800_v26 }
 0x2fd   :  { %v5081_v6 = vpop.f32.mrf.mxu0  ;;  %v7105_v29 = vpop.f32.mrf.mxu1 }
 0x2fe   :  { %7913 = vst [vmem:[#allocation30_spill] sm:$0xff] %v7103_v57  ;;  %v7107_v7 = vadd.f32 %v5131_v39, %v5081_v6 }
 0x2ff   :  { %v2820_v48 = vpop.f32.mrf.mxu0  ;;  %v7109_v49 = vpop.f32.mrf.mxu1 }
 0x300   :  { %7914 = vst [vmem:[#allocation24_spill] sm:$0xff] %v7107_v7  ;;  %v7111_v15 = vadd.f32 %v3094_v44, %v2820_v48 }
 0x301   :  { %v5084_v2 = vpop.f32.mrf.mxu0  ;;  %v7113_v53 = vpop.f32.mrf.mxu1 }
 0x302   :  { %7915 = vst [vmem:[#allocation32_spill] sm:$0xff] %v7111_v15  ;;  %v7115_v54 = vadd.f32 %v5134_v37, %v5084_v2 }
 0x303   :  { %v2840_v18 = vpop.f32.mrf.mxu0  ;;  %v7117_v51 = vpop.f32.mrf.mxu1 }
 0x304   :  { %7916 = vst [vmem:[#allocation34_spill] sm:$0xff] %v7115_v54  ;;  %v7119_v31 = vadd.f32 %v3106_v55, %v2840_v18 }
 0x305   :  { %v5139_v26 = vpop.f32.mrf.mxu0  ;;  %v7121_v57 = vpop.f32.mrf.mxu1 }
 0x306   :  { %7917 = vst [vmem:[#allocation35_spill] sm:$0xff] %v7119_v31 }
 0x307   :  { %v3186_v39 = vpop.f32.mrf.mxu0  ;;  %v7123_v6 = vpop.f32.mrf.mxu1 }
 0x309   :  { %v5142_v7 = vpop.f32.mrf.mxu0  ;;  %v7125_v38 = vpop.f32.mrf.mxu1 }
 0x30b   :  { %v7127_v44 = vpop.f32.mrf.mxu0  ;;  %v7129_v48 = vpop.f32.mrf.mxu1 }
 0x30d   :  { %v7131_v37 = vpop.f32.mrf.mxu0  ;;  %v7133_v2 = vpop.f32.mrf.mxu1 }
 0x30f   :  { %v7135_v54 = vpop.f32.mrf.mxu0  ;;  %v7137_v55 = vpop.f32.mrf.mxu1 }
 0x311   :  { %v7139_v18 = vpop.f32.mrf.mxu0  ;;  %v7141_v31 = vpop.f32.mrf.mxu1 }
 0x313   :  { %v7143_v15 = vpop.f32.mrf.mxu0  ;;  %v7145_v5 = vpop.f32.mrf.mxu1 }
 0x315   :  { %v7147_v4 = vpop.f32.mrf.mxu0  ;;  %v7149_v33 = vpop.f32.mrf.mxu1 }
 0x316   :  { %7918 = vst [vmem:[#allocation39_spill] sm:$0xff] %v7149_v33 }
 0x317   :  { %v7151_v61 = vpop.f32.mrf.mxu0  ;;  %v7153_v42 = vpop.f32.mrf.mxu1 }
 0x318   :  { %7919 = vst [vmem:[#allocation40_spill] sm:$0xff] %v7153_v42 }
 0x319   :  { %v7155_v30 = vpop.f32.mrf.mxu0  ;;  %v7157_v36 = vpop.f32.mrf.mxu1 }
 0x31a   :  { %7920 = vst [vmem:[#allocation42_spill] sm:$0xff] %v7157_v36 }
 0x31b   :  { %v7159_v46 = vpop.f32.mrf.mxu0  ;;  %v7161_v24 = vpop.f32.mrf.mxu1 }
 0x31c   :  { %7921 = vst [vmem:[#allocation43_spill] sm:$0xff] %v7161_v24 }
 0x31d   :  { %v7163_v60 = vpop.f32.mrf.mxu0  ;;  %v7165_v45 = vpop.f32.mrf.mxu1 }
 0x31e   :  { %7922 = vst [vmem:[#allocation44_spill] sm:$0xff] %v7165_v45 }
 0x31f   :  { %v7167_v50 = vpop.f32.mrf.mxu0  ;;  %v7169_v20 = vpop.f32.mrf.mxu1 }
 0x320   :  { %7923 = vst [vmem:[#allocation45_spill] sm:$0xff] %v7169_v20 }
 0x321   :  { %v7171_v47 = vpop.f32.mrf.mxu0  ;;  %v7173_v62 = vpop.f32.mrf.mxu1 }
 0x322   :  { %7924 = vst [vmem:[#allocation51_spill] sm:$0xff] %v7171_v47  ;;  %7925 = vst [vmem:[#allocation52_spill] sm:$0xff] %v7173_v62 }
 0x323   :  { %v7175_v25 = vpop.f32.mrf.mxu0  ;;  %v7177_v19 = vpop.f32.mrf.mxu1 }
 0x324   :  { %7926 = vst [vmem:[#allocation54_spill] sm:$0xff] %v7175_v25  ;;  %7927 = vst [vmem:[#allocation55_spill] sm:$0xff] %v7177_v19 }
 0x325   :  { %v7179_v36 = vpop.f32.mrf.mxu0  ;;  %v7181_v52 = vpop.f32.mrf.mxu1 }
 0x326   :  { %7928 = vst [vmem:[#allocation57_spill] sm:$0xff] %v7179_v36  ;;  %7929 = vst [vmem:[#allocation58_spill] sm:$0xff] %v7181_v52 }
 0x327   :  { %v7183_v24 = vpop.f32.mrf.mxu0  ;;  %v7185_v17 = vpop.f32.mrf.mxu1 }
 0x328   :  { %7930 = vst [vmem:[#allocation59_spill] sm:$0xff] %v7183_v24  ;;  %7931 = vst [vmem:[#allocation61_spill] sm:$0xff] %v7185_v17 }
 0x329   :  { %v7187_v45 = vpop.f32.mrf.mxu0  ;;  %v7189_v14 = vpop.f32.mrf.mxu1 }
 0x32a   :  { %7932 = vst [vmem:[#allocation63_spill] sm:$0xff] %v7187_v45  ;;  %7933 = vst [vmem:[#allocation64_spill] sm:$0xff] %v7189_v14 }
 0x32b   :  { %v7191_v20 = vpop.f32.mrf.mxu0  ;;  %v7193_v42 = vpop.f32.mrf.mxu1 }
 0x32c   :  { %7934 = vst [vmem:[#allocation65_spill] sm:$0xff] %v7191_v20  ;;  %7935 = vst [vmem:[#allocation66_spill] sm:$0xff] %v7193_v42 }
 0x32d   :  { %v7195_v62 = vpop.f32.mrf.mxu0  ;;  %v7197_v25 = vpop.f32.mrf.mxu1 }
 0x32e   :  { %7936 = vst [vmem:[#allocation67_spill] sm:$0xff] %v7195_v62  ;;  %7937 = vst [vmem:[#allocation68_spill] sm:$0xff] %v7197_v25 }
 0x32f   :  { %v7199_v19 = vpop.f32.mrf.mxu0  ;;  %v7201_v36 = vpop.f32.mrf.mxu1 }
 0x330   :  { %7938 = vst [vmem:[#allocation69_spill] sm:$0xff] %v7199_v19  ;;  %7939 = vst [vmem:[#allocation70_spill] sm:$0xff] %v7201_v36 }
 0x331   :  { %v7203_v52 = vpop.f32.mrf.mxu0  ;;  %v7205_v24 = vpop.f32.mrf.mxu1 }
 0x332   :  { %7940 = vst [vmem:[#allocation71_spill] sm:$0xff] %v7203_v52  ;;  %7941 = vst [vmem:[#allocation72_spill] sm:$0xff] %v7205_v24 }
 0x333   :  { %v7207_v17 = vpop.f32.mrf.mxu0  ;;  %v7209_v45 = vpop.f32.mrf.mxu1 }
 0x334   :  { %7942 = vst [vmem:[#allocation73_spill] sm:$0xff] %v7207_v17  ;;  %7943 = vst [vmem:[#allocation74_spill] sm:$0xff] %v7209_v45 }
 0x335   :  { %v7211_v14 = vpop.f32.mrf.mxu0  ;;  %v7213_v20 = vpop.f32.mrf.mxu1 }
 0x336   :  { %7944 = vst [vmem:[#allocation75_spill] sm:$0xff] %v7211_v14  ;;  %7945 = vst [vmem:[#allocation76_spill] sm:$0xff] %v7213_v20  ;;  %v3194_v20 = vadd.f32 %v5139_v26, %v7049_v59  ;;  %v3222_v26 = vadd.f32 %v7131_v37, %v7057_v3 }
 0x337   :  { %v7215_v42 = vpop.f32.mrf.mxu0  ;;  %v7217_v62 = vpop.f32.mrf.mxu1 }
 0x338   :  { %7946 = vst [vmem:[#allocation77_spill] sm:$0xff] %v7215_v42  ;;  %7947 = vst [vmem:[#allocation78_spill] sm:$0xff] %v7217_v62  ;;  %v3187_v62 = vadd.f32 %v3186_v39, %v7051_v0 }
 0x339   :  { %v7219_v25 = vpop.f32.mrf.mxu0  ;;  %v7221_v19 = vpop.f32.mrf.mxu1 }
 0x33a   :  { %7948 = vst [vmem:[#allocation79_spill] sm:$0xff] %v7219_v25  ;;  %7949 = vst [vmem:[#allocation80_spill] sm:$0xff] %v7221_v19  ;;  %v3478_v59 = vadd.f32 %v7109_v49, %v3187_v62  ;;  %v3518_v49 = vadd.f32 %v7121_v57, %v3222_v26  ;;  %v3257_v26 = vadd.f32 %v7159_v46, %v7071_v63 }
 0x33b   :  { %v7223_v36 = vpop.f32.mrf.mxu0  ;;  %v7225_v52 = vpop.f32.mrf.mxu1 }
 0x33c   :  { %7950 = vst [vmem:[#allocation81_spill] sm:$0xff] %v7223_v36  ;;  %7951 = vst [vmem:[#allocation82_spill] sm:$0xff] %v7225_v52  ;;  %v3208_v36 = vadd.f32 %v5142_v7, %v7053_v41  ;;  %v3486_v52 = vadd.f32 %v7105_v29, %v3194_v20  ;;  %v3215_v20 = vadd.f32 %v7135_v54, %v7059_v9 }
 0x33d   :  { %v7227_v24 = vpop.f32.mrf.mxu0  ;;  %v5289_v17 = vpop.f32.mrf.mxu1 }
 0x33e   :  { %7952 = vst [vmem:[#allocation83_spill] sm:$0xff] %v7227_v24  ;;  %v3502_v33 = vadd.f32 %v7113_v53, %v3208_v36 }
 0x33f   :  { %v7229_v45 = vpop.f32.mrf.mxu0  ;;  %v4057_v14 = vpop.f32.mrf.mxu1 }
 0x340   :  { %7953 = vst [vmem:[#allocation84_spill] sm:$0xff] %v7229_v45  ;;  %v3201_v45 = vadd.f32 %v7127_v44, %v7055_v23 }
 0x341   :  { %v7232_v32 = vpop.f32.mrf.mxu0  ;;  %v5292_v42 = vpop.f32.mrf.mxu1 }
 0x342   :  { %7954 = vst [vmem:[#allocation85_spill] sm:$0xff] %v7232_v32  ;;  %v3494_v62 = vadd.f32 %v7117_v51, %v3201_v45  ;;  %v3510_v45 = vadd.f32 %v7123_v6, %v3215_v20 }
 0x343   :  { %v7235_v25 = vpop.f32.mrf.mxu0  ;;  %v4069_v19 = vpop.f32.mrf.mxu1 }
 0x344   :  { %7955 = vst [vmem:[#allocation86_spill] sm:$0xff] %v7235_v25 }
 0x345   :  { %v5239_v47 = vpop.f32.mrf.mxu0  ;;  %v5295_v24 = vpop.f32.mrf.mxu1 }
 0x346   :  { %v3806_v28 = vadd.f32 %v5239_v47, %v3486_v52 }
 0x347   :  { %v3799_v32 = vpop.f32.mrf.mxu0  ;;  %v4081_v0 = vpop.f32.mrf.mxu1 }
 0x348   :  { %v4064_v39 = vadd.f32 %v5289_v17, %v3806_v28  ;;  %v3800_v25 = vadd.f32 %v3799_v32, %v3478_v59  ;;  %v3236_v32 = vadd.f32 %v7139_v18, %v7061_v16  ;;  %v3229_v28 = vadd.f32 %v7143_v15, %v7063_v34 }
 0x349   :  { %v5242_v29 = vpop.f32.mrf.mxu0  ;;  %v5298_v41 = vpop.f32.mrf.mxu1 }
 0x34a   :  { %v4248_v23 = vmul.f32 %v4064_v39, %v6900_v1  ;;  %v4058_v52 = vadd.f32 %v4057_v14, %v3800_v25  ;;  %v3818_v47 = vadd.f32 %v5242_v29, %v3502_v33  ;;  %v3534_v53 = vadd.f32 %v7125_v38, %v3236_v32 }
 0x34b   :  { %v3811_v7 = vpop.f32.mrf.mxu0  ;;  %v4093_v3 = vpop.f32.mrf.mxu1 }
 0x34c   :  { %4281 = vst.msk [vmem:[%s7490_s2 + $0x8] sm:$0xff] %vm4279_vm4, %v4248_v23  ;;  %v4247_v17 = vmul.f32 %v4058_v52, %v6905_v22  ;;  %v4076_v36 = vadd.f32 %v5292_v42, %v3818_v47  ;;  %v3812_v1 = vadd.f32 %v3811_v7, %v3494_v62  ;;  %v3250_v22 = vadd.f32 %v7147_v4, %v7065_v11  ;;  %v7956_v62 = vld [vmem:[#allocation39_spill] sm:$0xff]  ;;  %v7957_v7 = vld [vmem:[#allocation9_spill] sm:$0xff] }
 0x34d   :  { %v5245_v9 = vpop.f32.mrf.mxu0  ;;  %v5301_v33 = vpop.f32.mrf.mxu1 }
 0x34e   :  { %4280 = vst.msk [vmem:[%s7490_s2] sm:$0xff] %vm4279_vm4, %v4247_v17  ;;  %v4250_v16 = vmul.f32 %v4076_v36, %v6910_v12  ;;  %v4070_v14 = vadd.f32 %v4069_v19, %v3812_v1  ;;  %v3830_v25 = vadd.f32 %v5245_v9, %v3518_v49  ;;  %v3243_v12 = vadd.f32 %v7151_v61, %v7067_v35  ;;  %v7960_v1 = vld [vmem:[#allocation40_spill] sm:$0xff]  ;;  %v7961_v9 = vld [vmem:[#allocation62_spill] sm:$0xff] }
 0x34f   :  { %v3823_v42 = vpop.f32.mrf.mxu0  ;;  %v4105_v54 = vpop.f32.mrf.mxu1  ;;  %v3550_v38 = vadd.f32 %v7133_v2, %v3250_v22  ;;  %v3264_v35 = vadd.f32 %v7155_v30, %v7069_v13  ;;  %v7964_v22 = vld [vmem:[#allocation10_spill] sm:$0xff] }
 0x350   :  { %4283 = vst.msk [vmem:[%s7490_s2 + $0x18] sm:$0xff] %vm4279_vm4, %v4250_v16  ;;  %v4249_v34 = vmul.f32 %v4070_v14, %v6915_v58  ;;  %v4088_v57 = vadd.f32 %v5295_v24, %v3830_v25  ;;  %v3824_v15 = vadd.f32 %v3823_v42, %v3510_v45  ;;  %v3526_v58 = vadd.f32 %v7129_v48, %v3229_v28  ;;  %v7963_v28 = vld [vmem:[#allocation36_spill] sm:$0xff]  ;;  %v7965_v42 = vld [vmem:[#allocation57_spill] sm:$0xff] }
 0x351   :  { %v5248_v19 = vpop.f32.mrf.mxu0  ;;  %v5304_v51 = vpop.f32.mrf.mxu1  ;;  %v3542_v48 = vadd.f32 %v7137_v55, %v3243_v12  ;;  %v3566_v20 = vadd.f32 %v7141_v31, %v3264_v35 }
 0x352   :  { %4282 = vst.msk [vmem:[%s7490_s2 + $0x10] sm:$0xff] %vm4279_vm4, %v4249_v34  ;;  %v4252_v11 = vmul.f32 %v4088_v57, %v6920_v8  ;;  %v4082_v4 = vadd.f32 %v4081_v0, %v3824_v15  ;;  %v3842_v6 = vadd.f32 %v5248_v19, %v3534_v53  ;;  %v7966_v15 = vld [vmem:[#allocation15_spill] sm:$0xff] }
 0x353   :  { %v3835_v24 = vpop.f32.mrf.mxu0  ;;  %v4117_v44 = vpop.f32.mrf.mxu1 }
 0x354   :  { %4285 = vst.msk [vmem:[%s7490_s2 + $0x28] sm:$0xff] %vm4279_vm4, %v4252_v11  ;;  %v4251_v61 = vmul.f32 %v4082_v4, %v6925_v43  ;;  %v4100_v37 = vadd.f32 %v5298_v41, %v3842_v6  ;;  %v3836_v8 = vadd.f32 %v3835_v24, %v3526_v58  ;;  %v3278_v43 = vadd.f32 %v7163_v60, %v7073_v56  ;;  %v7968_v4 = vld [vmem:[#allocation12_spill] sm:$0xff]  ;;  %v7969_v6 = vld [vmem:[#allocation59_spill] sm:$0xff] }
 0x355   :  { %v5251_v18 = vpop.f32.mrf.mxu0  ;;  %v5307_v59 = vpop.f32.mrf.mxu1  ;;  %v3299_v58 = vadd.f32 %v7969_v6, %v7968_v4 }
 0x356   :  { %4284 = vst.msk [vmem:[%s7490_s2 + $0x20] sm:$0xff] %vm4279_vm4, %v4251_v61  ;;  %v4254_v13 = vmul.f32 %v4100_v37, %v6930_v10  ;;  %v4094_v30 = vadd.f32 %v4093_v3, %v3836_v8  ;;  %v3854_v2 = vadd.f32 %v5251_v18, %v3550_v38  ;;  %v3271_v10 = vadd.f32 %v7167_v50, %v7075_v27  ;;  %v7958_v3 = vld [vmem:[#allocation51_spill] sm:$0xff]  ;;  %v7959_v50 = vld [vmem:[#allocation8_spill] sm:$0xff]  ;;  %v7970_v38 = vld [vmem:[#allocation14_spill] sm:$0xff] }
 0x357   :  { %v3847_v0 = vpop.f32.mrf.mxu0  ;;  %v4129_v39 = vpop.f32.mrf.mxu1  ;;  %v3582_v31 = vadd.f32 %v7956_v62, %v3278_v43  ;;  %v3292_v27 = vadd.f32 %v7958_v3, %v7957_v7  ;;  %v7971_v8 = vld [vmem:[#allocation43_spill] sm:$0xff]  ;;  %v7980_v7 = vld [vmem:[#allocation21_spill] sm:$0xff] }
 0x358   :  { %4287 = vst.msk [vmem:[%s7490_s2 + $0x38] sm:$0xff] %vm4279_vm4, %v4254_v13  ;;  %v4253_v63 = vmul.f32 %v4094_v30, %v6935_v21  ;;  %v4112_v46 = vadd.f32 %v5301_v33, %v3854_v2  ;;  %v3848_v55 = vadd.f32 %v3847_v0, %v3542_v48  ;;  %v3558_v21 = vadd.f32 %v7145_v5, %v3257_v26  ;;  %v7962_v33 = vld [vmem:[#allocation54_spill] sm:$0xff]  ;;  %v7972_v26 = vld [vmem:[#allocation44_spill] sm:$0xff]  ;;  %v7973_v30 = vld [vmem:[#allocation13_spill] sm:$0xff] }
 0x359   :  { %v5254_v29 = vpop.f32.mrf.mxu0  ;;  %v5310_v41 = vpop.f32.mrf.mxu1  ;;  %v3574_v5 = vadd.f32 %v7960_v1, %v3271_v10  ;;  %v3285_v45 = vadd.f32 %v7962_v33, %v7961_v9  ;;  %v7974_v2 = vld [vmem:[#allocation63_spill] sm:$0xff]  ;;  %v7976_v10 = vld [vmem:[#allocation45_spill] sm:$0xff]  ;;  %v7983_v1 = vld [vmem:[#allocation52_spill] sm:$0xff] }
 0x35a   :  { %4286 = vst.msk [vmem:[%s7490_s2 + $0x30] sm:$0xff] %vm4279_vm4, %v4253_v63  ;;  %v4256_v56 = vmul.f32 %v4112_v46, %v6940_v40  ;;  %v4106_v60 = vadd.f32 %v4105_v54, %v3848_v55  ;;  %v3866_v23 = vadd.f32 %v5254_v29, %v3566_v20  ;;  %v3306_v54 = vadd.f32 %v7965_v42, %v7964_v22  ;;  %v7975_v0 = vld [vmem:[#allocation11_spill] sm:$0xff]  ;;  %v7984_v9 = vld [vmem:[#allocation17_spill] sm:$0xff] }
 0x35b   :  { %v3859_v52 = vpop.f32.mrf.mxu0  ;;  %v4141_v47 = vpop.f32.mrf.mxu1  ;;  %v3590_v18 = vadd.f32 %v7971_v8, %v3285_v45  ;;  %v3320_v43 = vadd.f32 %v7974_v2, %v7973_v30  ;;  %v3606_v29 = vadd.f32 %v7976_v10, %v3299_v58  ;;  %v7981_v3 = vld [vmem:[#allocation67_spill] sm:$0xff]  ;;  %v7985_v33 = vld [vmem:[#allocation69_spill] sm:$0xff]  ;;  %v7999_v10 = vld [vmem:[#allocation64_spill] sm:$0xff] }
 0x35c   :  { %4289 = vst.msk [vmem:[%s7490_s2 + $0x48] sm:$0xff] %vm4279_vm4, %v4256_v56  ;;  %v4255_v49 = vmul.f32 %v4106_v60, %v7959_v50  ;;  %v4124_v32 = vadd.f32 %v5304_v51, %v3866_v23  ;;  %v3860_v40 = vadd.f32 %v3859_v52, %v3558_v21  ;;  %v7967_v51 = vld [vmem:[#allocation42_spill] sm:$0xff]  ;;  %v3614_v13 = vadd.f32 %v7972_v26, %v3306_v54  ;;  %v7977_v56 = vld [vmem:[#allocation16_spill] sm:$0xff]  ;;  %v7978_v60 = vld [vmem:[#allocation65_spill] sm:$0xff] }
 0x35d   :  { %v5257_v17 = vpop.f32.mrf.mxu0  ;;  %v5313_v36 = vpop.f32.mrf.mxu1  ;;  %v3598_v11 = vadd.f32 %v7967_v51, %v3292_v27  ;;  %v3313_v23 = vadd.f32 %v7978_v60, %v7977_v56  ;;  %v7979_v21 = vld [vmem:[#allocation37_spill] sm:$0xff]  ;;  %v7987_v42 = vld [vmem:[#allocation55_spill] sm:$0xff]  ;;  %v8000_v56 = vld [vmem:[#allocation26_spill] sm:$0xff] }
 0x35e   :  { %4288 = vst.msk [vmem:[%s7490_s2 + $0x40] sm:$0xff] %vm4279_vm4, %v4255_v49  ;;  %v4258_v16 = vmul.f32 %v4124_v32, %v7963_v28  ;;  %v4118_v14 = vadd.f32 %v4117_v44, %v3860_v40  ;;  %v3878_v25 = vadd.f32 %v5257_v17, %v3582_v31  ;;  %v7982_v49 = vld [vmem:[#allocation22_spill] sm:$0xff]  ;;  %v7996_v30 = vld [vmem:[#allocation23_spill] sm:$0xff]  ;;  %v8001_v60 = vld [vmem:[#allocation77_spill] sm:$0xff] }
 0x35f   :  { %v3871_v34 = vpop.f32.mrf.mxu0  ;;  %v4153_v57 = vpop.f32.mrf.mxu1  ;;  %v3622_v54 = vadd.f32 %v7987_v42, %v3313_v23  ;;  %v7997_v2 = vld [vmem:[#allocation75_spill] sm:$0xff] }
 0x360   :  { %4291 = vst.msk [vmem:[%s7490_s2 + $0x58] sm:$0xff] %vm4279_vm4, %v4258_v16  ;;  %v4257_v53 = vmul.f32 %v4118_v14, %v7966_v15  ;;  %v4136_v12 = vadd.f32 %v5307_v59, %v3878_v25  ;;  %v3872_v19 = vadd.f32 %v3871_v34, %v3574_v5  ;;  %v3630_v5 = vadd.f32 %v7983_v1, %v3320_v43  ;;  %v7986_v16 = vld [vmem:[#allocation18_spill] sm:$0xff]  ;;  %v8007_v1 = vld [vmem:[#allocation49_spill] sm:$0xff]  ;;  %v8011_v42 = vld [vmem:[#allocation31_spill] sm:$0xff] }
 0x361   :  { %v5260_v24 = vpop.f32.mrf.mxu0  ;;  %v5316_v44 = vpop.f32.mrf.mxu1  ;;  %v7988_v15 = vld [vmem:[#allocation58_spill] sm:$0xff] }
 0x362   :  { %4290 = vst.msk [vmem:[%s7490_s2 + $0x50] sm:$0xff] %vm4279_vm4, %v4257_v53  ;;  %v4260_v35 = vmul.f32 %v4136_v12, %v7970_v38  ;;  %v4130_v61 = vadd.f32 %v4129_v39, %v3872_v19  ;;  %v3890_v37 = vadd.f32 %v5260_v24, %v3598_v11  ;;  %v7989_v12 = vld [vmem:[#allocation19_spill] sm:$0xff]  ;;  %v7991_v11 = vld [vmem:[#allocation25_spill] sm:$0xff] }
 0x363   :  { %v3883_v59 = vpop.f32.mrf.mxu0  ;;  %v4165_v48 = vpop.f32.mrf.mxu1  ;;  %v7990_v19 = vld [vmem:[#allocation71_spill] sm:$0xff]  ;;  %v7992_v38 = vld [vmem:[#allocation61_spill] sm:$0xff] }
 0x364   :  { %4293 = vst.msk [vmem:[%s7490_s2 + $0x68] sm:$0xff] %vm4279_vm4, %v4260_v35  ;;  %v4259_v63 = vmul.f32 %v4130_v61, %v7975_v0  ;;  %v4148_v46 = vadd.f32 %v5310_v41, %v3890_v37  ;;  %v3884_v55 = vadd.f32 %v3883_v59, %v3590_v18  ;;  %v3334_v41 = vadd.f32 %v7981_v3, %v7980_v7  ;;  %v7993_v61 = vld [vmem:[#allocation20_spill] sm:$0xff]  ;;  %v7994_v37 = vld [vmem:[#allocation73_spill] sm:$0xff]  ;;  %v7995_v18 = vld [vmem:[#allocation47_spill] sm:$0xff] }
 0x365   :  { %v5263_v39 = vpop.f32.mrf.mxu0  ;;  %v5319_v20 = vpop.f32.mrf.mxu1  ;;  %v3348_v51 = vadd.f32 %v7990_v19, %v7989_v12  ;;  %v3341_v8 = vadd.f32 %v7994_v37, %v7993_v61  ;;  %v8003_v3 = vld [vmem:[#allocation66_spill] sm:$0xff]  ;;  %v8013_v12 = vld [vmem:[#allocation83_spill] sm:$0xff] }
 0x366   :  { %4292 = vst.msk [vmem:[%s7490_s2 + $0x60] sm:$0xff] %vm4279_vm4, %v4259_v63  ;;  %v4262_v52 = vmul.f32 %v4148_v46, %v7979_v21  ;;  %v4142_v62 = vadd.f32 %v4141_v47, %v3884_v55  ;;  %v3902_v31 = vadd.f32 %v5263_v39, %v3614_v13  ;;  %v3327_v47 = vadd.f32 %v7985_v33, %v7984_v9  ;;  %v7998_v63 = vld [vmem:[#allocation27_spill] sm:$0xff] }
 0x367   :  { %v3895_v27 = vpop.f32.mrf.mxu0  ;;  %v4177_v50 = vpop.f32.mrf.mxu1  ;;  %v3646_v53 = vadd.f32 %v7988_v15, %v3334_v41  ;;  %v3654_v41 = vadd.f32 %v8003_v3, %v3341_v8  ;;  %v8018_v8 = vld [vmem:[#allocation33_spill] sm:$0xff] }
 0x368   :  { %4295 = vst.msk [vmem:[%s7490_s2 + $0x78] sm:$0xff] %vm4279_vm4, %v4262_v52  ;;  %v4261_v32 = vmul.f32 %v4142_v62, %v7982_v49  ;;  %v4160_v40 = vadd.f32 %v5313_v36, %v3902_v31  ;;  %v3896_v17 = vadd.f32 %v3895_v27, %v3606_v29  ;;  %v3638_v35 = vadd.f32 %v7992_v38, %v3327_v47  ;;  %v8002_v52 = vld [vmem:[#allocation28_spill] sm:$0xff] }
 0x369   :  { %v5266_v45 = vpop.f32.mrf.mxu0  ;;  %v5322_v28 = vpop.f32.mrf.mxu1  ;;  %v3662_v29 = vadd.f32 %v7999_v10, %v3348_v51  ;;  %v8004_v27 = vld [vmem:[#allocation68_spill] sm:$0xff]  ;;  %v8014_v51 = vld [vmem:[#allocation50_spill] sm:$0xff] }
 0x36a   :  { %4294 = vst.msk [vmem:[%s7490_s2 + $0x70] sm:$0xff] %vm4279_vm4, %v4261_v32  ;;  %v4264_v14 = vmul.f32 %v4160_v40, %v7986_v16  ;;  %v4154_v25 = vadd.f32 %v4153_v57, %v3896_v17  ;;  %v3914_v22 = vadd.f32 %v5266_v45, %v3630_v5  ;;  %v8005_v32 = vld [vmem:[#allocation29_spill] sm:$0xff]  ;;  %v8006_v40 = vld [vmem:[#allocation79_spill] sm:$0xff]  ;;  %v8008_v45 = vld [vmem:[#allocation70_spill] sm:$0xff] }
 0x36b   :  { %v3907_v36 = vpop.f32.mrf.mxu0  ;;  %v4189_v34 = vpop.f32.mrf.mxu1  ;;  %v3376_v17 = vadd.f32 %v8006_v40, %v8005_v32  ;;  %v8016_v38 = vld [vmem:[#allocation32_spill] sm:$0xff] }
 0x36c   :  { %4297 = vst.msk [vmem:[%s7490_s2 + $0x88] sm:$0xff] %vm4279_vm4, %v4264_v14  ;;  %v4263_v4 = vmul.f32 %v4154_v25, %v7991_v11  ;;  %v4172_v6 = vadd.f32 %v5316_v44, %v3914_v22  ;;  %v3908_v58 = vadd.f32 %v3907_v36, %v3622_v54  ;;  %v3362_v44 = vadd.f32 %v7997_v2, %v7996_v30  ;;  %v8009_v14 = vld [vmem:[#allocation30_spill] sm:$0xff]  ;;  %v8010_v25 = vld [vmem:[#allocation81_spill] sm:$0xff]  ;;  %v8020_v2 = vld [vmem:[#allocation76_spill] sm:$0xff] }
 0x36d   :  { %v5269_v57 = vpop.f32.mrf.mxu0  ;;  %v5325_v24 = vpop.f32.mrf.mxu1  ;;  %v3369_v22 = vadd.f32 %v8010_v25, %v8009_v14  ;;  %v8029_v40 = vld [vmem:[#allocation80_spill] sm:$0xff]  ;;  %v8032_v25 = vld [vmem:[#allocation53_spill] sm:$0xff] }
 0x36e   :  { %4296 = vst.msk [vmem:[%s7490_s2 + $0x80] sm:$0xff] %vm4279_vm4, %v4263_v4  ;;  %v4266_v59 = vmul.f32 %v4172_v6, %v7995_v18  ;;  %v4166_v26 = vadd.f32 %v4165_v48, %v3908_v58  ;;  %v3926_v13 = vadd.f32 %v5269_v57, %v3646_v53  ;;  %v3355_v48 = vadd.f32 %v8001_v60, %v8000_v56  ;;  %v8012_v53 = vld [vmem:[#allocation24_spill] sm:$0xff]  ;;  %v8024_v60 = vld [vmem:[#allocation78_spill] sm:$0xff] }
 0x36f   :  { %v3919_v43 = vpop.f32.mrf.mxu0  ;;  %v4201_v0 = vpop.f32.mrf.mxu1  ;;  %v3678_v49 = vadd.f32 %v8004_v27, %v3362_v44  ;;  %v8015_v58 = vld [vmem:[#allocation72_spill] sm:$0xff] }
 0x370   :  { %4299 = vst.msk [vmem:[%s7490_s2 + $0x98] sm:$0xff] %vm4279_vm4, %v4266_v59  ;;  %v4265_v46 = vmul.f32 %v4166_v26, %v7998_v63  ;;  %v4184_v55 = vadd.f32 %v5319_v20, %v3926_v13  ;;  %v3920_v39 = vadd.f32 %v3919_v43, %v3638_v35  ;;  %v3670_v16 = vadd.f32 %v8008_v45, %v3355_v48  ;;  %v8017_v35 = vld [vmem:[#allocation84_spill] sm:$0xff]  ;;  %v8019_v13 = vld [vmem:[#allocation74_spill] sm:$0xff]  ;;  %v8022_v63 = vld [vmem:[#allocation85_spill] sm:$0xff] }
 0x371   :  { %v5272_v23 = vpop.f32.mrf.mxu0  ;;  %v5328_v21 = vpop.f32.mrf.mxu1  ;;  %v3694_v57 = vadd.f32 %v8015_v58, %v3376_v17  ;;  %v3383_v61 = vadd.f32 %v8017_v35, %v8016_v38  ;;  %v3686_v30 = vadd.f32 %v8019_v13, %v3369_v22  ;;  %v8021_v43 = vld [vmem:[#allocation34_spill] sm:$0xff] }
 0x372   :  { %4298 = vst.msk [vmem:[%s7490_s2 + $0x90] sm:$0xff] %vm4279_vm4, %v4265_v46  ;;  %v4268_v62 = vmul.f32 %v4184_v55, %v8002_v52  ;;  %v4178_v31 = vadd.f32 %v4177_v50, %v3920_v39  ;;  %v3938_v7 = vadd.f32 %v5272_v23, %v3662_v29  ;;  %v3404_v46 = vadd.f32 %v8022_v63, %v8021_v43  ;;  %v8023_v55 = vld [vmem:[#allocation38_spill] sm:$0xff]  ;;  %v8025_v23 = vld [vmem:[#allocation35_spill] sm:$0xff] }
 0x373   :  { %v3931_v20 = vpop.f32.mrf.mxu0  ;;  %v4213_v47 = vpop.f32.mrf.mxu1  ;;  %v3702_v48 = vadd.f32 %v8024_v60, %v3383_v61  ;;  %v8026_v52 = vld [vmem:[#allocation86_spill] sm:$0xff] }
 0x374   :  { %4301 = vst.msk [vmem:[%s7490_s2 + $0xa8] sm:$0xff] %vm4279_vm4, %v4268_v62  ;;  %v4267_v5 = vmul.f32 %v4178_v31, %v8007_v1  ;;  %v4196_v9 = vadd.f32 %v5322_v28, %v3938_v7  ;;  %v3932_v33 = vadd.f32 %v3931_v20, %v3654_v41  ;;  %v3390_v28 = vadd.f32 %v8013_v12, %v8012_v53  ;;  %v8027_v31 = vld [vmem:[#allocation41_spill] sm:$0xff]  ;;  %v8031_v45 = vld [vmem:[#allocation82_spill] sm:$0xff] }
 0x375   :  { %v5275_v50 = vpop.f32.mrf.mxu0  ;;  %v3397_v62 = vadd.f32 %v8026_v52, %v8025_v23  ;;  %v3726_v17 = vadd.f32 %v8029_v40, %v3404_v46 }
 0x376   :  { %4300 = vst.msk [vmem:[%s7490_s2 + $0xa0] sm:$0xff] %vm4279_vm4, %v4267_v5  ;;  %v4270_v54 = vmul.f32 %v4196_v9, %v8011_v42  ;;  %v4190_v36 = vadd.f32 %v4189_v34, %v3932_v33  ;;  %v3950_v15 = vadd.f32 %v5275_v50, %v3678_v49  ;;  %v5331_v34 = vpop.f32.mrf.mxu1  ;;  %v3710_v44 = vadd.f32 %v8020_v2, %v3390_v28  ;;  %v8030_v9 = vld [vmem:[#allocation48_spill] sm:$0xff] }
 0x377   :  { %v3943_v19 = vpop.f32.mrf.mxu0  ;;  %v8034_v28 = vld [vmem:[#allocation60_spill] sm:$0xff] }
 0x378   :  { %4303 = vst.msk [vmem:[%s7490_s2 + $0xb8] sm:$0xff] %vm4279_vm4, %v4270_v54  ;;  %v4269_v11 = vmul.f32 %v4190_v36, %v8014_v51  ;;  %v4208_v4 = vadd.f32 %v5325_v24, %v3950_v15  ;;  %v3944_v6 = vadd.f32 %v3943_v19, %v3670_v16  ;;  %v4225_v56 = vpop.f32.mrf.mxu1  ;;  %v3718_v16 = vadd.f32 %v8031_v45, %v3397_v62  ;;  %v8033_v15 = vld [vmem:[#allocation56_spill] sm:$0xff] }
 0x379   :  { %v5278_v37 = vpop.f32.mrf.mxu0 }
 0x37a   :  { %4302 = vst.msk [vmem:[%s7490_s2 + $0xb0] sm:$0xff] %vm4279_vm4, %v4269_v11  ;;  %v4272_v18 = vmul.f32 %v4208_v4, %v8018_v8  ;;  %v4202_v59 = vadd.f32 %v4201_v0, %v3944_v6  ;;  %v3962_v26 = vadd.f32 %v5278_v37, %v3694_v57  ;;  %v5334_v1 = vpop.f32.mrf.mxu1 }
 0x37b   :  { %v3955_v24 = vpop.f32.mrf.mxu0 }
 0x37c   :  { %4305 = vst.msk [vmem:[%s7490_s2 + $0xc8] sm:$0xff] %vm4279_vm4, %v4272_v18  ;;  %v4271_v39 = vmul.f32 %v4202_v59, %v8023_v55  ;;  %v4220_v10 = vadd.f32 %v5328_v21, %v3962_v26  ;;  %v3956_v29 = vadd.f32 %v3955_v24, %v3686_v30  ;;  %v8028_v21 = vld [vmem:[#allocation46_spill] sm:$0xff]  ;;  %v4237_v36 = vpop.f32.mrf.mxu1 }
 0x37d   :  { %v5281_v0 = vpop.f32.mrf.mxu0 }
 0x37e   :  { %4304 = vst.msk [vmem:[%s7490_s2 + $0xc0] sm:$0xff] %vm4279_vm4, %v4271_v39  ;;  %v4274_v7 = vmul.f32 %v4220_v10, %v8027_v31  ;;  %v4214_v3 = vadd.f32 %v4213_v47, %v3956_v29  ;;  %v3974_v41 = vadd.f32 %v5281_v0, %v3710_v44 }
 0x37f   :  { %v3967_v20 = vpop.f32.mrf.mxu0 }
 0x380   :  { %4307 = vst.msk [vmem:[%s7490_s2 + $0xd8] sm:$0xff] %vm4279_vm4, %v4274_v7  ;;  %v4273_v27 = vmul.f32 %v4214_v3, %v8028_v21  ;;  %v4232_v49 = vadd.f32 %v5331_v34, %v3974_v41  ;;  %v3968_v32 = vadd.f32 %v3967_v20, %v3702_v48 }
 0x381   :  { %v5284_v5 = vpop.f32.mrf.mxu0 }
 0x382   :  { %4306 = vst.msk [vmem:[%s7490_s2 + $0xd0] sm:$0xff] %vm4279_vm4, %v4273_v27  ;;  %v4276_v33 = vmul.f32 %v4232_v49, %v8030_v9  ;;  %v4226_v47 = vadd.f32 %v4225_v56, %v3968_v32  ;;  %v3986_v50 = vadd.f32 %v5284_v5, %v3726_v17 }
 0x383   :  { %v3979_v14 = vpop.f32.mrf.mxu0 }
 0x384   :  { %4309 = vst.msk [vmem:[%s7490_s2 + $0xe8] sm:$0xff] %vm4279_vm4, %v4276_v33  ;;  %v4275_v22 = vmul.f32 %v4226_v47, %v8032_v25  ;;  %v4244_v42 = vadd.f32 %v5334_v1, %v3986_v50  ;;  %v3980_v54 = vadd.f32 %v3979_v14, %v3718_v16 }
 0x386   :  { %4308 = vst.msk [vmem:[%s7490_s2 + $0xe0] sm:$0xff] %vm4279_vm4, %v4275_v22  ;;  %v4278_v53 = vmul.f32 %v4244_v42, %v8033_v15  ;;  %v4238_v12 = vadd.f32 %v4237_v36, %v3980_v54 }
 0x388   :  { %4311 = vst.msk [vmem:[%s7490_s2 + $0xf8] sm:$0xff] %vm4279_vm4, %v4278_v53  ;;  %v4277_v19 = vmul.f32 %v4238_v12, %v8034_v28 }
 0x38a   :  { %4310 = vst.msk [vmem:[%s7490_s2 + $0xf0] sm:$0xff] %vm4279_vm4, %v4277_v19 }
 0x38b   :  { %4316 = vsyncpa [#allocation3], 1 }
 0x38c   :  { %4317 = vsyncpa [#allocation5], 1 }

// kernel: tpu_custom_call.1
= control target key start
LH: loop header
LB: loop body
LE: loop exit
PB: predicated region body
PF: predicated region fallthrough
CT: control target
= control target key end

     0   :  { %v673_v1 = vmov 0   ;;  %s1082_s0 = inlined_call_operand.vmem [shape: f32[32,1], index: 0, kind: input, shape index: {}]   ;;  %s1083_s1 = inlined_call_operand.vmem [shape: f32[32,1], index: 1, kind: input, shape index: {}]   ;;  %s1084_s2 = inlined_call_operand.vmem [shape: f32[32,1], index: 2, kind: input, shape index: {}]   ;;  %s1085_s3 = inlined_call_operand.vmem [shape: f32[1,128], index: 3, kind: input, shape index: {}]   ;;  %s1086_s4 = inlined_call_operand.vmem [shape: f32[1,128], index: 4, kind: input, shape index: {}]   ;;  %s1087_s5 = inlined_call_operand.hbm [shape: f32[32,128], index: 5, kind: output, shape index: {}]  }
   0x1   :  { %v40_v0 = vld [vmem:[%s1082_s0 + $0x10] sm:$0xff]  ;;  %624 = vset.pattern.permute.xlu1 %v673_v1  ;;  %623 = vset.pattern.permute.xlu0 %v673_v1  ;;  %v38_v3 = vld [vmem:[%s1082_s0] sm:$0xff]  ;;  %v41_v4 = vld [vmem:[%s1082_s0 + $0x18] sm:$0xff] }
   0x2   :  { %v44_v2 = vmul.f32 6.2831855, %v40_v0  ;;  %v42_v5 = vmul.f32 6.2831855, %v38_v3  ;;  %v39_v6 = vld [vmem:[%s1082_s0 + $0x8] sm:$0xff] }
   0x3   :  { %v45_v7 = vmul.f32 6.2831855, %v41_v4  ;;  %v43_v8 = vmul.f32 6.2831855, %v39_v6 }
   0x4   :  { %58 = vperm.xlu1 %624, %v44_v2   ;;  %48 = vperm.xlu0 %623, %v42_v5  }
   0x5   :  { %10 = vsyncpa [#allocation3], 0  ;;  %v71_v9 = vld [vmem:[%s1083_s1 + $0x8] sm:$0xff]  ;;  %v70_v10 = vld [vmem:[%s1083_s1] sm:$0xff]  ;;  %v27_v17 = vlaneseq  ;;  %v674_v5 = vmov 683565275  }
   0x6   :  { %v73_v11 = vld [vmem:[%s1083_s1 + $0x18] sm:$0xff]  ;;  %v72_v12 = vld [vmem:[%s1083_s1 + $0x10] sm:$0xff]  ;;  %v516_v13 = vld [vmem:[%s1084_s2 + $0x8] sm:$0xff] }
   0x7   :  { %v515_v14 = vld [vmem:[%s1084_s2] sm:$0xff]  ;;  %v518_v15 = vld [vmem:[%s1084_s2 + $0x18] sm:$0xff]  ;;  %v517_v16 = vld [vmem:[%s1084_s2 + $0x10] sm:$0xff]  ;;  %v28_v18 = vshrl.u32 %v27_v17, 7  ;;  %s680_s2 = smov [#allocation2]  }
   0x8   :  { %63 = vperm.xlu1 %624, %v45_v7   ;;  %53 = vperm.xlu0 %623, %v43_v8   ;;  %v21_v19 = vld [vmem:[%s1085_s3] sm:$0x1]  ;;  %s570_s3 = sshll.u32 %s680_s2, 4  ;;  %s571_s3 = int_to_ptr.vmem [resolvable:$true] %s570_s3 }
   0x9   :  { %v22_v20 = vld [vmem:[%s1086_s4] sm:$0x1]  ;;  %v29_v21 = vsub.s32 0, %v28_v18  ;;  %vm24_vm1 = vcmp.gt.f32.partialorder %v21_v19, 0.0  ;;  %s651_s4 = scalar_lea.vmem %s571_s3, 512  ;;  %p656_p1 = scmp.lt.s32.totalorder %s571_s3, %s571_s3 }
   0xa   :  { %vm23_vm0 = vcmp.ne.f32.partialorder %v22_v20, 0.0  ;;  %p652_p0 = scmp.ne.s32.totalorder %s571_s3, %s651_s4  ;;  %p657_p2 = scmp.lt.s32.totalorder %s651_s4, %s651_s4 }
   0xb   :  { %vm25_vm2 = vmand %vm23_vm0, %vm24_vm1  ;;  %v30_v24 = vrot.slane %v21_v19, %v29_v21 }
   0xc   :  { %81 = vperm.xlu1 %624, %v71_v9   ;;  %76 = vperm.xlu0 %623, %v70_v10   ;;  %v32_v27 = vsel %vm25_vm2, 1, %v673_v1  ;;  %v675_v9 = vmov 2475754826   ;;  %p658_p3 = por %p657_p2, %p656_p1 }
   0xd   :  { %v757_v33 = vrot.slane %v32_v27, %v29_v21 }
   0xe   :  { %p659_p4 = pnand %p658_p3, %p652_p0 }
   0xf   :  { %vm37_vm3 = vcmp.eq.s32.totalorder %v757_v33, 1 }
  0x10   :  { %91 = vperm.xlu1 %624, %v73_v11   ;;  %86 = vperm.xlu0 %623, %v72_v12   ;;  %v514_v49 = vsel %vm37_vm3, %v30_v24, 1.0  ;;  %v676_v11 = vmov 2131351028  }
  0x11   :  { %625 = vlog2.f32 %v514_v49 }
  0x14   :  { %528 = vperm.xlu1 %624, %v516_v13   ;;  %523 = vperm.xlu0 %623, %v515_v14   ;;  %v677_v13 = vmov 2102212464  }
  0x18   :  { %538 = vperm.xlu1 %624, %v518_v15   ;;  %533 = vperm.xlu0 %623, %v517_v16   ;;  %v678_v15 = vmov 920167782  }
  0x7f   :  { %v59_v22 = vpop.permute.xlu1 %58  ;;  %v49_v23 = vpop.permute.xlu0 %48 }
  0x80   :  { %v66_v29 = vmul.f32 %v49_v23, %v30_v24  ;;  %v68_v57 = vmul.f32 %v59_v22, %v30_v24  ;;  %v679_v22 = vmov 1326507024  }
  0x83   :  { %v64_v25 = vpop.permute.xlu1 %63  ;;  %v54_v26 = vpop.permute.xlu0 %53 }
  0x84   :  { %v67_v28 = vmul.f32 %v54_v26, %v30_v24  ;;  %v69_v35 = vmul.f32 %v64_v25, %v30_v24 }
  0x87   :  { %v82_v30 = vpop.permute.xlu1 %81  ;;  %v77_v32 = vpop.permute.xlu0 %76 }
  0x88   :  { %v755_v31 = vadd.f32 %v82_v30, %v67_v28  ;;  %v759_v34 = vadd.f32 %v77_v32, %v66_v29 }
  0x8a   :  { %v202_v36 = vand.u32 2147483647, %v755_v31  ;;  %v205_v37 = vand.u32 2139095040, %v755_v31  ;;  %v98_v38 = vand.u32 2147483647, %v759_v34  ;;  %v101_v39 = vand.u32 2139095040, %v759_v34 }
  0x8b   :  { %v92_v40 = vpop.permute.xlu1 %91  ;;  %v87_v56 = vpop.permute.xlu0 %86  ;;  %vm204_vm1 = vcmp.lt.s32.totalorder %v755_v31, 0 }
  0x8c   :  { %v206_v41 = vshrl.u32 %v205_v37, 23  ;;  %v209_v42 = vand.u32 8388607, %v202_v36  ;;  %v767_v43 = vadd.f32 %v92_v40, %v69_v35  ;;  %v102_v44 = vshrl.u32 %v101_v39, 23 }
  0x8d   :  { %v105_v45 = vand.u32 8388607, %v98_v38  ;;  %v776_v63 = vadd.f32 %v87_v56, %v68_v57  ;;  %vm883_vm2 = vcmp.le.f32.partialorder %v202_v36, 0.7853982 }
  0x8e   :  { %v585_v46 = vadd.s32 4294967169, %v206_v41  ;;  %v581_v47 = vadd.s32 4294967169, %v102_v44  ;;  %v413_v48 = vand.u32 2139095040, %v767_v43  ;;  %v210_v50 = vor.u32 8388608, %v209_v42 }
  0x8f   :  { %v106_v52 = vor.u32 8388608, %v105_v45  ;;  %v410_v54 = vand.u32 2147483647, %v767_v43 }
  0x90   :  { %v212_v51 = vadd.s32 1, %v585_v46  ;;  %v108_v53 = vadd.s32 1, %v581_v47  ;;  %v414_v55 = vshrl.u32 %v413_v48, 23  ;;  %v778_v0 = vshll.u32 %v210_v50, 8 }
  0x91   :  { %v782_v2 = vshll.u32 %v106_v52, 8  ;;  %v786_v3 = vand.u32 8388607, %v410_v54  ;;  %v626_v52 = vpop.eup %625 }
  0x92   :  { %vm213_vm4 = vcmp.gt.s32.totalorder %v212_v51, 0  ;;  %vm109_vm5 = vcmp.gt.s32.totalorder %v108_v53, 0  ;;  %v593_v59 = vadd.s32 4294967169, %v414_v55 }
  0x93   :  { %v214_v58 = vsel %vm213_vm4, %v212_v51, 0  ;;  %v110_v62 = vsel %vm109_vm5, %v108_v53, 0 }
  0x94   :  { %v215_v60 = vshrl.u32 %v214_v58, 5  ;;  %v216_v61 = vand.u32 31, %v214_v58  ;;  %v780_v1 = vshrl.u32 %v110_v62, 5  ;;  %v112_v7 = vand.u32 31, %v110_v62 }
  0x95   :  { %v789_v8 = vadd.s32 1, %v593_v59 }
  0x96   :  { %v217_v4 = vsub.s32 32, %v216_v61  ;;  %v219_v6 = vshll.u32 %v674_v5, %v216_v61  ;;  %v222_v10 = vshll.u32 %v675_v9, %v216_v61  ;;  %v225_v12 = vshll.u32 %v676_v11, %v216_v61 }
  0x97   :  { %v228_v14 = vshll.u32 %v677_v13, %v216_v61  ;;  %v231_v16 = vshll.u32 %v678_v15, %v216_v61  ;;  %vm234_vm6 = vcmp.lt.s32.totalorder %v215_v60, 1  ;;  %vm235_vm7 = vcmp.lt.s32.totalorder %v215_v60, 2 }
  0x98   :  { %v220_v17 = vshrl.u32 %v675_v9, %v217_v4  ;;  %v223_v18 = vshrl.u32 %v676_v11, %v217_v4  ;;  %v226_v19 = vshrl.u32 %v677_v13, %v217_v4  ;;  %v218_v20 = vshrl.u32 %v674_v5, %v217_v4 }
  0x99   :  { %v229_v21 = vshrl.u32 %v678_v15, %v217_v4  ;;  %v232_v23 = vshrl.u32 %v679_v22, %v217_v4  ;;  %v113_v27 = vsub.s32 32, %v112_v7  ;;  %vm236_vm8 = vcmp.lt.s32.totalorder %v215_v60, 3 }
  0x9a   :  { %v221_v24 = vor.u32 %v220_v17, %v219_v6  ;;  %v224_v25 = vor.u32 %v223_v18, %v222_v10  ;;  %v227_v26 = vor.u32 %v226_v19, %v225_v12  ;;  %vm237_vm9 = vcmp.lt.s32.totalorder %v215_v60, 4 }
  0x9b   :  { %v230_v28 = vor.u32 %v229_v21, %v228_v14  ;;  %v233_v29 = vor.u32 %v232_v23, %v231_v16  ;;  %v115_v42 = vshll.u32 %v674_v5, %v112_v7  ;;  %v116_v46 = vshrl.u32 %v675_v9, %v113_v27 }
  0x9c   :  { %v238_v30 = vsel %vm234_vm6, %v218_v20, %v221_v24  ;;  %v239_v32 = vsel %vm237_vm9, %v227_v26, 2102212464  ;;  %v242_v35 = vsel %vm234_vm6, %v221_v24, %v224_v25  ;;  %v246_v37 = vsel %vm234_vm6, %v224_v25, %v227_v26 }
  0x9d   :  { %v240_v39 = vsel %vm236_vm8, %v224_v25, %v239_v32  ;;  %v243_v40 = vsel %vm237_vm9, %v230_v28, 920167782  ;;  %v247_v41 = vsel %vm237_vm9, %v233_v29, 1326507024  ;;  %v118_v47 = vshll.u32 %v675_v9, %v112_v7 }
  0x9e   :  { %v244_v44 = vsel %vm236_vm8, %v227_v26, %v243_v40  ;;  %v248_v45 = vsel %vm236_vm8, %v230_v28, %v247_v41  ;;  %v241_v48 = vsel %vm235_vm7, %v238_v30, %v240_v39  ;;  %v119_v51 = vshrl.u32 %v676_v11, %v113_v27 }
  0x9f   :  { %v245_v49 = vsel %vm235_vm7, %v242_v35, %v244_v44  ;;  %v249_v50 = vsel %vm235_vm7, %v246_v37, %v248_v45  ;;  %v117_v58 = vor.u32 %v116_v46, %v115_v42  ;;  %v121_v61 = vshll.u32 %v676_v11, %v112_v7 }
  0xa0   :  { %v812_v53 = vmul.u32.u64.low %v778_v0, %v249_v50  ;;  %v813_v55 = vmul.u32.u64.high %v778_v0, %v249_v50, %v812_v53  ;;  %v816_v56 = vmul.u32.u64.low %v778_v0, %v245_v49  ;;  %v817_v57 = vmul.u32.u64.high %v778_v0, %v245_v49, %v816_v56 }
  0xa1   :  { %v120_v59 = vor.u32 %v119_v51, %v118_v47  ;;  %v122_v62 = vshrl.u32 %v677_v13, %v113_v27  ;;  %v114_v60 = vshrl.u32 %v674_v5, %v113_v27  ;;  %v124_v4 = vshll.u32 %v677_v13, %v112_v7 }
  0xa2   :  { %v125_v6 = vshrl.u32 %v678_v15, %v113_v27  ;;  %v128_v10 = vshrl.u32 %v679_v22, %v113_v27  ;;  %v257_v12 = vmul.u32 %v778_v0, %v241_v48  ;;  %v127_v16 = vshll.u32 %v678_v15, %v112_v7 }
  0xa3   :  { %v123_v14 = vor.u32 %v122_v62, %v121_v61  ;;  %vm130_vm10 = vcmp.lt.s32.totalorder %v780_v1, 1  ;;  %vm259_vm11 = vc.u32 %v813_v55, %v816_v56  ;;  %v260_v17 = vadd.s32 1, %v817_v57 }
  0xa4   :  { %v126_v18 = vor.u32 %v125_v6, %v124_v4  ;;  %vm131_vm12 = vcmp.lt.s32.totalorder %v780_v1, 2  ;;  %v129_v19 = vor.u32 %v128_v10, %v127_v16  ;;  %vm132_vm13 = vcmp.lt.s32.totalorder %v780_v1, 3 }
  0xa5   :  { %vm133_vm14 = vcmp.lt.s32.totalorder %v780_v1, 4  ;;  %v138_v20 = vsel %vm130_vm10, %v117_v58, %v120_v59  ;;  %v261_v0 = vsel %vm259_vm11, %v260_v17, %v817_v57  ;;  %v142_v7 = vsel %vm130_vm10, %v120_v59, %v123_v14 }
  0xa6   :  { %v135_v21 = vsel %vm133_vm14, %v123_v14, 2102212464  ;;  %v139_v23 = vsel %vm133_vm14, %v126_v18, 920167782  ;;  %v262_v24 = vadd.s32 %v261_v0, %v257_v12  ;;  %v134_v25 = vsel %vm130_vm10, %v114_v60, %v117_v58 }
  0xa7   :  { %v140_v26 = vsel %vm132_vm13, %v123_v14, %v139_v23  ;;  %v143_v27 = vsel %vm133_vm14, %v129_v19, 1326507024  ;;  %v136_v28 = vsel %vm132_vm13, %v120_v59, %v135_v21  ;;  %vm421_vm15 = vcmp.gt.s32.totalorder %v789_v8, 0 }
  0xa8   :  { %v141_v29 = vsel %vm131_vm12, %v138_v20, %v140_v26  ;;  %v144_v30 = vsel %vm132_vm13, %v126_v18, %v143_v27  ;;  %v263_v32 = vadd.s32 536870912, %v262_v24  ;;  %v422_v42 = vsel %vm421_vm15, %v789_v8, 0 }
  0xa9   :  { %v145_v35 = vsel %vm131_vm12, %v142_v7, %v144_v30  ;;  %v840_v37 = vmul.u32.u64.low %v782_v2, %v141_v29  ;;  %v841_v39 = vmul.u32.u64.high %v782_v2, %v141_v29, %v840_v37  ;;  %v137_v45 = vsel %vm131_vm12, %v134_v25, %v136_v28 }
  0xaa   :  { %v845_v40 = vmul.u32.u64.low %v782_v2, %v145_v35  ;;  %v846_v41 = vmul.u32.u64.high %v782_v2, %v145_v35, %v845_v40  ;;  %v264_v44 = vshrl.u32 %v263_v32, 30  ;;  %v424_v46 = vand.u32 31, %v422_v42 }
  0xab   :  { %v309_v47 = vand.u32 2139095040, %v776_v63  ;;  %v156_v49 = vadd.s32 1, %v841_v39  ;;  %v418_v50 = vor.u32 8388608, %v786_v3  ;;  %v153_v51 = vmul.u32 %v782_v2, %v137_v45 }
  0xac   :  { %v265_v48 = vshll.u32 %v264_v44, 30  ;;  %vm155_vm0 = vc.u32 %v846_v41, %v840_v37  ;;  %v425_v53 = vsub.s32 32, %v424_v46  ;;  %v861_v59 = vmul.f32 0.6931472, %v626_v52 }
  0xad   :  { %v157_v8 = vsel %vm155_vm0, %v156_v49, %v841_v39  ;;  %v310_v1 = vshrl.u32 %v309_v47, 23  ;;  %v258_v61 = vadd.s32 %v816_v56, %v813_v55  ;;  %v865_v62 = vshll.u32 %v418_v50, 8  ;;  %v529_v56 = vpop.permute.xlu1 %528 }
  0xae   :  { %v857_v57 = vsub.s32 %v262_v24, %v265_v48  ;;  %v158_v58 = vadd.s32 %v157_v8, %v153_v51  ;;  %v306_v2 = vand.u32 2147483647, %v776_v63  ;;  %v868_v4 = vshrl.u32 %v422_v42, 5 }
  0xaf   :  { %v428_v6 = vshrl.u32 %v675_v9, %v425_v53  ;;  %v431_v10 = vshrl.u32 %v676_v11, %v425_v53  ;;  %v434_v52 = vshrl.u32 %v677_v13, %v425_v53  ;;  %v437_v14 = vshrl.u32 %v678_v15, %v425_v53 }
  0xb0   :  { %v268_v3 = vsub.s32 0, %v857_v57  ;;  %v159_v60 = vadd.s32 536870912, %v158_v58  ;;  %v875_v55 = vadd.s32 4294967169, %v310_v1  ;;  %v288_v16 = vsub.s32 4, %v264_v44 }
  0xb1   :  { %v427_v18 = vshll.u32 %v674_v5, %v424_v46  ;;  %v430_v19 = vshll.u32 %v675_v9, %v424_v46  ;;  %v433_v21 = vshll.u32 %v676_v11, %v424_v46  ;;  %v436_v23 = vshll.u32 %v677_v13, %v424_v46 }
  0xb2   :  { %v586_v12 = vmin.u32 %v268_v3, %v857_v57  ;;  %v877_v17 = vshrl.u32 %v159_v60, 30  ;;  %v440_v7 = vshrl.u32 %v679_v22, %v425_v53  ;;  %v892_v27 = vmul.f32 %v529_v56, %v861_v59 }
  0xb3   :  { %v429_v25 = vor.u32 %v428_v6, %v427_v18  ;;  %v432_v26 = vor.u32 %v431_v10, %v430_v19  ;;  %v435_v29 = vor.u32 %v434_v52, %v433_v21  ;;  %v438_v36 = vor.u32 %v437_v14, %v436_v23 }
  0xb4   :  { %v270_v0 = vclz %v586_v12  ;;  %v161_v24 = vshll.u32 %v877_v17, 30  ;;  %v439_v30 = vshll.u32 %v678_v15, %v424_v46  ;;  %v289_v32 = vsel %vm204_vm1, %v288_v16, %v264_v44 }
  0xb5   :  { %v426_v39 = vshrl.u32 %v674_v5, %v425_v53  ;;  %vm442_vm4 = vcmp.lt.s32.totalorder %v868_v4, 1  ;;  %vm443_vm6 = vcmp.lt.s32.totalorder %v868_v4, 2  ;;  %vm444_vm7 = vcmp.lt.s32.totalorder %v868_v4, 3 }
  0xb6   :  { %v587_v28 = vadd.s32 4294967294, %v270_v0  ;;  %v897_v35 = vsub.s32 %v158_v58, %v161_v24  ;;  %v441_v40 = vor.u32 %v440_v7, %v439_v30  ;;  %vm100_vm8 = vcmp.lt.s32.totalorder %v759_v34, 0 }
  0xb7   :  { %vm445_vm9 = vcmp.lt.s32.totalorder %v868_v4, 4  ;;  %v450_v44 = vsel %vm442_vm4, %v429_v25, %v432_v26  ;;  %v454_v8 = vsel %vm442_vm4, %v432_v26, %v435_v29  ;;  %v291_v6 = vsel %vm883_vm2, 0, %v289_v32 }
  0xb8   :  { %vm588_vm5 = vcmp.lt.s32.totalorder %v587_v28, 0  ;;  %v164_v45 = vsub.s32 0, %v897_v35  ;;  %v447_v48 = vsel %vm445_vm9, %v435_v29, 2102212464  ;;  %v451_v49 = vsel %vm445_vm9, %v438_v36, 920167782 }
  0xb9   :  { %v273_v42 = vsel %vm588_vm5, 0, %v587_v28  ;;  %v452_v53 = vsel %vm444_vm7, %v435_v29, %v451_v49  ;;  %v455_v60 = vsel %vm445_vm9, %v441_v40, 1326507024  ;;  %vm920_vm10 = vcmp.le.f32.partialorder %v98_v38, 0.7853982 }
  0xba   :  { %v274_v46 = vsub.s32 32, %v273_v42  ;;  %v278_v47 = vsub.s32 4294967266, %v273_v42  ;;  %v275_v50 = vshll.u32 %v857_v57, %v273_v42  ;;  %v582_v51 = vmin.u32 %v164_v45, %v897_v35 }
  0xbb   :  { %v453_v3 = vsel %vm443_vm6, %v450_v44, %v452_v53  ;;  %v446_v12 = vsel %vm442_vm4, %v426_v39, %v429_v25  ;;  %v184_v56 = vsub.s32 4, %v877_v17  ;;  %v456_v16 = vsel %vm444_vm7, %v438_v36, %v455_v60 }
  0xbc   :  { %v276_v1 = vshrl.u32 %v258_v61, %v274_v46  ;;  %v279_v58 = vadd.s32 127, %v278_v47  ;;  %v166_v10 = vclz %v582_v51  ;;  %v448_v61 = vsel %vm444_vm7, %v432_v26, %v447_v48  ;;  %v524_v47 = vpop.permute.xlu0 %523 }
  0xbd   :  { %v457_v38 = vsel %vm443_vm6, %v454_v8, %v456_v16  ;;  %v934_v19 = vmul.u32.u64.low %v865_v62, %v453_v3  ;;  %v935_v0 = vmul.u32.u64.high %v865_v62, %v453_v3, %v934_v19  ;;  %v449_v23 = vsel %vm443_vm6, %v446_v12, %v448_v61 }
  0xbe   :  { %v277_v52 = vor.u32 %v276_v1, %v275_v50  ;;  %v280_v14 = vshll.u32 %v279_v58, 23  ;;  %v583_v18 = vadd.s32 4294967294, %v166_v10  ;;  %v295_v25 = vadd.s32 3, %v291_v6 }
  0xbf   :  { %v941_v7 = vmul.u32.u64.low %v865_v62, %v457_v38  ;;  %v942_v24 = vmul.u32.u64.high %v865_v62, %v457_v38, %v941_v7  ;;  %v154_v26 = vadd.s32 %v840_v37, %v846_v41  ;;  %v316_v28 = vadd.s32 1, %v875_v55 }
  0xc0   :  { %v281_v21 = vor.u32 4788187, %v280_v14  ;;  %vm584_vm11 = vcmp.lt.s32.totalorder %v583_v18, 0  ;;  %v284_v36 = vcvt.s32.f32 %v277_v52  ;;  %v185_v32 = vsel %vm100_vm8, %v184_v56, %v877_v17 }
  0xc1   :  { %v169_v30 = vsel %vm584_vm11, 0, %v583_v18  ;;  %v465_v40 = vmul.u32 %v865_v62, %v449_v23  ;;  %v468_v42 = vadd.s32 1, %v935_v0  ;;  %vm467_vm12 = vc.u32 %v942_v24, %v934_v19 }
  0xc2   :  { %v282_v29 = vand.u32 2147483647, %v281_v21  ;;  %v170_v4 = vsub.s32 32, %v169_v30  ;;  %v174_v39 = vsub.s32 4294967266, %v169_v30  ;;  %v171_v44 = vshll.u32 %v897_v35, %v169_v30 }
  0xc3   :  { %vm317_vm13 = vcmp.gt.s32.totalorder %v316_v28, 0  ;;  %v469_v55 = vsel %vm467_vm12, %v468_v42, %v935_v0  ;;  %v187_v48 = vsel %vm920_vm10, 0, %v185_v32  ;;  %v313_v35 = vand.u32 8388607, %v306_v2 }
  0xc4   :  { %v285_v45 = vmul.f32 %v284_v36, %v282_v29  ;;  %v172_v37 = vshrl.u32 %v154_v26, %v170_v4  ;;  %v175_v41 = vadd.s32 127, %v174_v39  ;;  %v318_v46 = vsel %vm317_vm13, %v316_v28, 0 }
  0xc5   :  { %v470_v62 = vadd.s32 %v469_v55, %v465_v40  ;;  %v320_v49 = vand.u32 31, %v318_v46  ;;  %v541_v58 = vmul.f32 %v524_v47, %v861_v59  ;;  %v966_v60 = vand.u32 3, %v295_v25 }
  0xc6   :  { %v286_v17 = vxor.u32 2147483648, %v285_v45  ;;  %v173_v50 = vor.u32 %v172_v37, %v171_v44  ;;  %v176_v51 = vshll.u32 %v175_v41, 23  ;;  %v968_v10 = vadd.s32 3, %v187_v48 }
  0xc7   :  { %v471_v8 = vadd.s32 536870912, %v470_v62  ;;  %v321_v1 = vsub.s32 32, %v320_v49  ;;  %v547_v52 = vmul.f32 1.442695, %v892_v27  ;;  %v976_v18 = vshrl.u32 %v318_v46, 5 }
  0xc8   :  { %v287_v53 = vsel %vm204_vm1, %v286_v17, %v285_v45  ;;  %v177_v6 = vor.u32 4788187, %v176_v51  ;;  %v180_v56 = vcvt.s32.f32 %v173_v50  ;;  %v323_v38 = vshll.u32 %v674_v5, %v320_v49 }
  0xc9   :  { %v290_v3 = vsel %vm883_vm2, %v755_v31, %v287_v53  ;;  %v970_v12 = vshrl.u32 %v471_v8, 30  ;;  %v324_v61 = vshrl.u32 %v675_v9, %v321_v1  ;;  %v327_v16 = vshrl.u32 %v676_v11, %v321_v1 }
  0xca   :  { %627 = vcosq.f32 %v290_v3  ;;  %v178_v14 = vand.u32 2147483647, %v177_v6  ;;  %v330_v0 = vshrl.u32 %v677_v13, %v321_v1  ;;  %v326_v23 = vshll.u32 %v675_v9, %v320_v49 }
  0xcb   :  { %629 = vsinq.f32 %v290_v3  ;;  %v473_v20 = vshll.u32 %v970_v12, 30  ;;  %v332_v7 = vshll.u32 %v677_v13, %v320_v49  ;;  %v333_v27 = vshrl.u32 %v678_v15, %v321_v1 }
  0xcc   :  { %v181_v21 = vmul.f32 %v180_v56, %v178_v14  ;;  %v314_v26 = vor.u32 8388608, %v313_v35  ;;  %v325_v28 = vor.u32 %v324_v61, %v323_v38  ;;  %v329_v29 = vshll.u32 %v676_v11, %v320_v49 }
  0xcd   :  { %v983_v25 = vsub.s32 %v470_v62, %v473_v20  ;;  %v328_v30 = vor.u32 %v327_v16, %v326_v23  ;;  %v334_v32 = vor.u32 %v333_v27, %v332_v7  ;;  %v336_v4 = vshrl.u32 %v679_v22, %v321_v1 }
  0xce   :  { %v182_v36 = vxor.u32 2147483648, %v181_v21  ;;  %v331_v40 = vor.u32 %v330_v0, %v329_v29  ;;  %v335_v9 = vshll.u32 %v678_v15, %v320_v49  ;;  %631 = vpow2.f32 %v547_v52 }
  0xcf   :  { %v476_v39 = vsub.s32 0, %v983_v25  ;;  %vm301_vm14 = vcmp.eq.s32.totalorder %v966_v60, 2  ;;  %v466_v42 = vadd.s32 %v934_v19, %v942_v24  ;;  %vm338_vm15 = vcmp.lt.s32.totalorder %v976_v18, 1 }
  0xd0   :  { %v183_v13 = vsel %vm100_vm8, %v182_v36, %v181_v21  ;;  %v545_v11 = vmul.f32 1.442695, %v541_v58  ;;  %vm298_vm0 = vcmp.eq.s32.totalorder %v966_v60, 0  ;;  %v337_v45 = vor.u32 %v336_v4, %v335_v9 }
  0xd1   :  { %v186_v22 = vsel %vm920_vm10, %v759_v34, %v183_v13  ;;  %v594_v15 = vmin.u32 %v476_v39, %v983_v25  ;;  %vm341_vm1 = vcmp.lt.s32.totalorder %v976_v18, 4  ;;  %v322_v44 = vshrl.u32 %v674_v5, %v321_v1 }
  0xd2   :  { %633 = vcosq.f32 %v186_v22  ;;  %v346_v19 = vsel %vm338_vm15, %v325_v28, %v328_v30  ;;  %v347_v24 = vsel %vm341_vm1, %v334_v32, 920167782  ;;  %vm340_vm2 = vcmp.lt.s32.totalorder %v976_v18, 3 }
  0xd3   :  { %635 = vsinq.f32 %v186_v22  ;;  %v478_v37 = vclz %v594_v15  ;;  %v343_v57 = vsel %vm341_vm1, %v331_v40, 2102212464  ;;  %vm339_vm4 = vcmp.lt.s32.totalorder %v976_v18, 2 }
  0xd4   :  { %v348_v41 = vsel %vm340_vm2, %v331_v40, %v347_v24  ;;  %v350_v55 = vsel %vm338_vm15, %v328_v30, %v331_v40  ;;  %v354_v5 = vshll.u32 %v314_v26, 8  ;;  %v342_v47 = vsel %vm338_vm15, %v322_v44, %v325_v28 }
  0xd5   :  { %v595_v46 = vadd.s32 4294967294, %v478_v37  ;;  %v349_v17 = vsel %vm339_vm4, %v346_v19, %v348_v41  ;;  %v351_v48 = vsel %vm341_vm1, %v337_v45, 1326507024  ;;  %v344_v49 = vsel %vm340_vm2, %v328_v30, %v343_v57  ;;  %v539_v37 = vpop.permute.xlu1 %538 }
  0xd6   :  { %v352_v50 = vsel %vm340_vm2, %v334_v32, %v351_v48  ;;  %v1018_v51 = vmul.u32.u64.low %v354_v5, %v349_v17  ;;  %v1019_v35 = vmul.u32.u64.high %v354_v5, %v349_v17, %v1018_v51  ;;  %637 = vpow2.f32 %v545_v11 }
  0xd7   :  { %v628_v62 = vpop.eup %627  ;;  %vm596_vm5 = vcmp.lt.s32.totalorder %v595_v46, 0  ;;  %v353_v1 = vsel %vm339_vm4, %v350_v55, %v352_v50  ;;  %v345_v16 = vsel %vm339_vm4, %v342_v47, %v344_v49  ;;  %vm294_vm6 = vweird.f32 %v755_v31 }
  0xd8   :  { %v630_v53 = vpop.eup %629  ;;  %v302_v8 = vxor.u32 2147483648, %v628_v62  ;;  %v481_v3 = vsel %vm596_vm5, 0, %v595_v46  ;;  %v1024_v6 = vmul.u32.u64.low %v354_v5, %v353_v1  ;;  %v1025_v61 = vmul.u32.u64.high %v354_v5, %v353_v1, %v1024_v6 }
  0xd9   :  { %v299_v58 = vxor.u32 2147483648, %v630_v53  ;;  %v482_v14 = vsub.s32 32, %v481_v3  ;;  %v486_v56 = vsub.s32 4294967266, %v481_v3  ;;  %vm297_vm7 = vcmp.lt.s32.totalorder %v966_v60, 2 }
  0xda   :  { %v303_v52 = vsel %vm301_vm14, %v302_v8, %v630_v53  ;;  %v364_v38 = vadd.s32 1, %v1019_v35  ;;  %v483_v21 = vshll.u32 %v983_v25, %v481_v3  ;;  %v192_v28 = vand.u32 3, %v968_v10 }
  0xdb   :  { %v300_v20 = vsel %vm298_vm0, %v628_v62, %v299_v58  ;;  %v484_v23 = vshrl.u32 %v466_v42, %v482_v14  ;;  %v487_v7 = vadd.s32 127, %v486_v56  ;;  %v632_v27 = vpop.eup %631  ;;  %v361_v18 = vmul.u32 %v354_v5, %v345_v16 }
  0xdc   :  { %v304_v0 = vsel %vm297_vm7, %v300_v20, %v303_v52  ;;  %vm363_vm8 = vc.u32 %v1025_v61, %v1018_v51  ;;  %vm197_vm9 = vcmp.eq.s32.totalorder %v192_v28, 2  ;;  %vm194_vm10 = vcmp.eq.s32.totalorder %v192_v28, 0 }
  0xdd   :  { %v305_v26 = vsel %vm294_vm6, nan, %v304_v0  ;;  %v485_v31 = vor.u32 %v484_v23, %v483_v21  ;;  %v488_v29 = vshll.u32 %v487_v7, 23  ;;  %v365_v60 = vsel %vm363_vm8, %v364_v38, %v1019_v35 }
  0xde   :  { %v554_v36 = vmul.f32 %v632_v27, %v305_v26  ;;  %v366_v30 = vadd.s32 %v365_v60, %v361_v18  ;;  %vm193_vm11 = vcmp.lt.s32.totalorder %v192_v28, 2  ;;  %vm190_vm12 = vweird.f32 %v759_v34 }
  0xdf   :  { %v634_v32 = vpop.eup %633  ;;  %v489_v4 = vor.u32 4788187, %v488_v29  ;;  %v492_v42 = vcvt.s32.f32 %v485_v31  ;;  %vm412_vm13 = vcmp.lt.s32.totalorder %v767_v43, 0  ;;  %v496_v55 = vsub.s32 4, %v970_v12 }
  0xe0   :  { %v558_v25 = vsel %vm37_vm3, %v554_v36, 0.0  ;;  %v636_v39 = vpop.eup %635  ;;  %v198_v40 = vxor.u32 2147483648, %v634_v32  ;;  %v367_v9 = vadd.s32 536870912, %v366_v30  ;;  %vm1051_vm14 = vcmp.le.f32.partialorder %v410_v54, 0.7853982 }
  0xe1   :  { %562 = vst [vmem:[#allocation2 + $0x8] sm:$0xff] %v558_v25  ;;  %v195_v10 = vxor.u32 2147483648, %v636_v39  ;;  %v490_v13 = vand.u32 2147483647, %v489_v4  ;;  %v544_v34 = vmul.f32 %v539_v37, %v861_v59  ;;  %v497_v50 = vsel %vm412_vm13, %v496_v55, %v970_v12 }
  0xe2   :  { %v199_v11 = vsel %vm197_vm9, %v198_v40, %v636_v39  ;;  %v1043_v22 = vshrl.u32 %v367_v9, 30  ;;  %v499_v8 = vsel %vm1051_vm14, 0, %v497_v50  ;;  %v362_v6 = vadd.s32 %v1018_v51, %v1025_v61 }
  0xe3   :  { %v196_v15 = vsel %vm194_vm10, %v634_v32, %v195_v10  ;;  %v493_v45 = vmul.f32 %v492_v42, %v490_v13  ;;  %v638_v44 = vpop.eup %637  ;;  %v551_v35 = vmul.f32 1.442695, %v544_v34  ;;  %v503_v58 = vadd.s32 3, %v499_v8  ;;  %v534_v32 = vpop.permute.xlu0 %533 }
  0xe4   :  { %v200_v19 = vsel %vm193_vm11, %v196_v15, %v199_v11  ;;  %v369_v24 = vshll.u32 %v1043_v22, 30  ;;  %vm502_vm4 = vweird.f32 %v767_v43  ;;  %vm308_vm5 = vcmp.lt.s32.totalorder %v776_v63, 0 }
  0xe5   :  { %v201_v57 = vsel %vm190_vm12, nan, %v200_v19  ;;  %v494_v41 = vxor.u32 2147483648, %v493_v45  ;;  %v504_v56 = vand.u32 3, %v503_v58  ;;  %v392_v25 = vsub.s32 4, %v1043_v22 }
  0xe6   :  { %v370_v5 = vsub.s32 %v366_v30, %v369_v24  ;;  %v553_v46 = vmul.f32 %v638_v44, %v201_v57  ;;  %vm307_vm6 = vcmp.le.f32.partialorder %v306_v2, 0.7853982  ;;  %vm398_vm10 = vweird.f32 %v776_v63 }
  0xe7   :  { %v495_v17 = vsel %vm412_vm13, %v494_v41, %v493_v45  ;;  %vm509_vm0 = vcmp.eq.s32.totalorder %v504_v56, 2  ;;  %vm506_vm1 = vcmp.eq.s32.totalorder %v504_v56, 0  ;;  %vm505_vm2 = vcmp.lt.s32.totalorder %v504_v56, 2 }
  0xe8   :  { %v498_v48 = vsel %vm1051_vm14, %v767_v43, %v495_v17  ;;  %v372_v62 = vsub.s32 0, %v370_v5  ;;  %v557_v49 = vsel %vm37_vm3, %v553_v46, 0.0  ;;  %v543_v43 = vmul.f32 %v534_v32, %v861_v59 }
  0xe9   :  { %639 = vcosq.f32 %v498_v48  ;;  %561 = vst [vmem:[#allocation2] sm:$0xff] %v557_v49  ;;  %v393_v10 = vsel %vm308_vm5, %v392_v25, %v1043_v22 }
  0xea   :  { %641 = vsinq.f32 %v498_v48  ;;  %v590_v54 = vmin.u32 %v372_v62, %v370_v5  ;;  %v549_v13 = vmul.f32 1.442695, %v543_v43  ;;  %v395_v42 = vsel %vm307_vm6, 0, %v393_v10 }
  0xeb   :  { %643 = vpow2.f32 %v551_v35  ;;  %v399_v11 = vadd.s32 3, %v395_v42 }
  0xec   :  { %v374_v53 = vclz %v590_v54 }
  0xed   :  { %v400_v15 = vand.u32 3, %v399_v11 }
  0xee   :  { %v591_v1 = vadd.s32 4294967294, %v374_v53 }
  0xef   :  { %vm405_vm7 = vcmp.eq.s32.totalorder %v400_v15, 2  ;;  %vm402_vm8 = vcmp.eq.s32.totalorder %v400_v15, 0  ;;  %vm401_vm9 = vcmp.lt.s32.totalorder %v400_v15, 2 }
  0xf0   :  { %vm592_vm15 = vcmp.lt.s32.totalorder %v591_v1, 0 }
  0xf1   :  { %v377_v3 = vsel %vm592_vm15, 0, %v591_v1 }
  0xf2   :  { %v378_v52 = vsub.s32 32, %v377_v3  ;;  %v382_v14 = vsub.s32 4294967266, %v377_v3  ;;  %v379_v16 = vshll.u32 %v370_v5, %v377_v3 }
  0xf4   :  { %v380_v12 = vshrl.u32 %v362_v6, %v378_v52  ;;  %v383_v20 = vadd.s32 127, %v382_v14 }
  0xf6   :  { %v640_v38 = vpop.eup %639  ;;  %v381_v0 = vor.u32 %v380_v12, %v379_v16  ;;  %v384_v21 = vshll.u32 %v383_v20, 23 }
  0xf7   :  { %v642_v23 = vpop.eup %641  ;;  %v510_v7 = vxor.u32 2147483648, %v640_v38 }
  0xf8   :  { %v507_v27 = vxor.u32 2147483648, %v642_v23  ;;  %v385_v26 = vor.u32 4788187, %v384_v21  ;;  %v388_v51 = vcvt.s32.f32 %v381_v0  ;;  %v644_v29 = vpop.eup %643 }
  0xf9   :  { %v511_v28 = vsel %vm509_vm0, %v510_v7, %v642_v23 }
  0xfa   :  { %v508_v18 = vsel %vm506_vm1, %v640_v38, %v507_v27  ;;  %v386_v31 = vand.u32 2147483647, %v385_v26 }
  0xfb   :  { %v512_v61 = vsel %vm505_vm2, %v508_v18, %v511_v28 }
  0xfc   :  { %v513_v60 = vsel %vm502_vm4, nan, %v512_v61  ;;  %v389_v36 = vmul.f32 %v388_v51, %v386_v31 }
  0xfd   :  { %v556_v30 = vmul.f32 %v644_v29, %v513_v60 }
  0xfe   :  { %v390_v4 = vxor.u32 2147483648, %v389_v36 }
  0xff   :  { %v560_v39 = vsel %vm37_vm3, %v556_v30, 0.0 }
 0x100   :  { %v391_v40 = vsel %vm308_vm5, %v390_v4, %v389_v36  ;;  %564 = vst [vmem:[#allocation2 + $0x18] sm:$0xff] %v560_v39 }
 0x101   :  { %v394_v9 = vsel %vm307_vm6, %v776_v63, %v391_v40 }
 0x102   :  { %645 = vcosq.f32 %v394_v9 }
 0x103   :  { %647 = vsinq.f32 %v394_v9 }
 0x104   :  { %649 = vpow2.f32 %v549_v13 }
 0x10f   :  { %v646_v45 = vpop.eup %645 }
 0x110   :  { %v648_v44 = vpop.eup %647  ;;  %v406_v19 = vxor.u32 2147483648, %v646_v45 }
 0x111   :  { %v403_v24 = vxor.u32 2147483648, %v648_v44  ;;  %v650_v22 = vpop.eup %649 }
 0x112   :  { %v407_v2 = vsel %vm405_vm7, %v406_v19, %v648_v44 }
 0x113   :  { %v404_v59 = vsel %vm402_vm8, %v646_v45, %v403_v24 }
 0x114   :  { %v408_v37 = vsel %vm401_vm9, %v404_v59, %v407_v2 }
 0x115   :  { %v409_v57 = vsel %vm398_vm10, nan, %v408_v37 }
 0x116   :  { %v555_v41 = vmul.f32 %v650_v22, %v409_v57 }
 0x118   :  { %v559_v55 = vsel %vm37_vm3, %v555_v41, 0.0 }
 0x119   :  { %563 = vst [vmem:[#allocation2 + $0x10] sm:$0xff] %v559_v55 }
 0x11a   :  { %662 = shalt.err (!%p659_p4)
}
 0x11b   :  { %s681_s19 = smov 128   ;;  %s682_s20 = smov 8  }
 0x11c   :  { %576 = dma.vmem_to_hbm [thread:$0]  %s571_s3, 512, %s1087_s5, [#allocation3], %s681_s19, %s681_s19, %s682_s20  }
 0x11d   :  { %671 = dma.done.wait [#allocation3], 512  }
 0x11e   :  { %672 = vsyncadd [#allocation3], 4294966784 }
 0x11f   :  { %580 = vsyncpa [#allocation3], 1 }

</bundles_post_ra>
